<compile_context>
chip_gen: v6e
topology: v6e:2x2x1
jax: 0.10.0
libtpu: 0.0.40
codegen_flags: <defaults>
</compile_context>

<pallas_src>
import jax
import jax.numpy as jnp
import numpy as np
from jax.experimental import pallas as pl
from jax.experimental.pallas import tpu as pltpu


PARTY = 2  # the reference hard-codes `1 - p` in the party attention, i.e. party == 2


# ----------------------------------------------------------------------------- kernel helpers

def _dot(a, b):
    return jnp.dot(a, b, preferred_element_type=jnp.float32)


def _gru_gates(gi, gh, h, H):
    # PyTorch GRUCell, gates packed (r, z, n) along the 3H axis.
    r = jax.nn.sigmoid(gi[:, :H] + gh[:, :H])
    z = jax.nn.sigmoid(gi[:, H:2 * H] + gh[:, H:2 * H])
    n = jnp.tanh(gi[:, 2 * H:] + r * gh[:, 2 * H:])
    return (1.0 - z) * n + z * h


# ----------------------------------------------------------------------------- fused DialogueRNN kernel

def _dialogue_rnn_kernel(
        U_ref, qm_ref,
        g_w_ref, g_bih_ref, g_bhh_ref,
        p_w_ref, p_whh_ref, p_bih_ref, p_bhh_ref,
        e_w_ref, e_whh_ref, e_bih_ref, e_bhh_ref,
        out_ref):
    # One grid step == one full direction's recurrence.  Everything below is a single
    # fully-unrolled trace over the static seq_len.
    seq_len, B = U_ref.shape[1], U_ref.shape[2]
    B2 = 2 * B

    g_w = g_w_ref[0]
    p_w, p_whh = p_w_ref[0], p_whh_ref[0]
    e_w, e_whh = e_w_ref[0], e_whh_ref[0]

    D_g = g_bih_ref.shape[-1] // 3
    D_p = p_whh.shape[0]
    D_e = e_whh.shape[0]

    # Hoisted bias broadcasts (review item: don't re-materialize per step).
    g_bih = jnp.broadcast_to(g_bih_ref[0], (B, 3 * D_g))
    g_bhh = jnp.broadcast_to(g_bhh_ref[0], (B, 3 * D_g))   # g hidden == 0 -> gh == b_hh
    p_bih = jnp.broadcast_to(p_bih_ref[0], (B, 3 * D_p))
    p_bhh = jnp.broadcast_to(p_bhh_ref[0], (B2, 3 * D_p))
    e_bih = jnp.broadcast_to(e_bih_ref[0], (B2, 3 * D_e))
    e_bhh = jnp.broadcast_to(e_bhh_ref[0], (B2, 3 * D_e))

    zeros_g = jnp.zeros((B, D_g), jnp.float32)

    # Per-party recurrent states stacked along the sublane (row) axis:
    #   rows [0:B]  -> party 0,   rows [B:2B] -> party 1.
    q_st = jnp.zeros((B2, D_p), jnp.float32)
    e_st = jnp.zeros((B2, D_e), jnp.float32)

    for t in range(seq_len):                       # fully unrolled (static seq_len)
        U = U_ref[0, t]                            # (B, D_m)
        qm = qm_ref[0, t]                          # (B, party), one-hot speaker mask
        qc0 = qm[:, 0:1]
        qc1 = qm[:, 1:2]
        qm2 = jnp.concatenate([qc0, qc1], axis=0)  # (2B, 1)

        # _select_parties(x, argmax(qmask)) == one-hot-weighted sum (qmask is one-hot).
        q0_sel = q_st[:B] * qc0 + q_st[B:] * qc1   # (B, D_p)
        e0_sel = e_st[:B] * qc0 + e_st[B:] * qc1   # (B, D_e)

        # ---- global GRU.  Hidden state identically zero; context attention over the
        # length-1 history is an exact identity (gc_ == g_).
        g_gi = _dot(jnp.concatenate([U, q0_sel, e0_sel], axis=1), g_w) + g_bih
        g_ = _gru_gates(g_gi, g_bhh, zeros_g, D_g)

        # ---- party GRU.  Input projection is shared by both parties; recurrent
        # matmul + gate math run once on the party-stacked (2B, ...) block.
        p_gi = _dot(jnp.concatenate([U, g_, e0_sel], axis=1), p_w) + p_bih   # (B, 3*D_p)
        p_gi2 = jnp.concatenate([p_gi, p_gi], axis=0)                        # (2B, 3*D_p)
        p_gh2 = _dot(q_st, p_whh) + p_bhh
        qs2 = _gru_gates(p_gi2, p_gh2, q_st, D_p)
        q_st = q_st * (1.0 - qm2) + qs2 * qm2

        # ---- emotion GRU.  Party attention over the length-1 q_hist is an exact
        # identity: per-party input = [q_{1-p}, q_p, g_]; both parties in one matmul.
        q_sw = jnp.concatenate([q_st[B:], q_st[:B]], axis=0)                 # party-swapped
        g2 = jnp.concatenate([g_, g_], axis=0)
        e_gi = _dot(jnp.concatenate([q_sw, q_st, g2], axis=1), e_w) + e_bih
        e_gh = _dot(e_st, e_whh) + e_bhh
        es2 = _gru_gates(e_gi, e_gh, e_st, D_e)
        e_st = e_st * (1.0 - qm2) + es2 * qm2

        # e_out = _select_parties(e_, qm_idx)  (identical to the c_ the reference emits).
        # VMEM store only; the whole (seq_len, B, D_e) slab is DMA'd out once per direction.
        out_ref[0, t] = e_st[:B] * qc0 + e_st[B:] * qc1


def dialogue_rnn_fused(rnn, U_both, qmask_both):
    """rnn: pytree with every leaf stacked over the direction axis (leading dim 2).
    U_both: (2, seq, B, D_m), qmask_both: (2, seq, B, party).
    Returns per-direction selected emotion states: (2, seq, B, D_e)."""
    ndir, seq_len, B, D_m = U_both.shape
    party = qmask_both.shape[-1]
    assert party == PARTY

    g, p, e = rnn['g_cell'], rnn['p_cell'], rnn['e_cell']
    weights = [g['w'], g['bih'], g['bhh'],
               p['w'], p['whh'], p['bih'], p['bhh'],
               e['w'], e['whh'], e['bih'], e['bhh']]
    D_e = e['whh'].shape[1]

    in_specs = [
        # Whole per-direction input slabs: one DMA per direction.
        pl.BlockSpec((1, seq_len, B, D_m), lambda d: (d, 0, 0, 0)),     # U[d]
        pl.BlockSpec((1, seq_len, B, party), lambda d: (d, 0, 0, 0)),   # qmask[d]
    ] + [
        # Per-direction weights, VMEM-resident for the whole recurrence.
        pl.BlockSpec((1,) + w.shape[1:], lambda d: (d, 0, 0)) for w in weights
    ]

    return pl.pallas_call(
        _dialogue_rnn_kernel,
        out_shape=jax.ShapeDtypeStruct((ndir, seq_len, B, D_e), jnp.float32),
        grid_spec=pltpu.PrefetchScalarGridSpec(
            num_scalar_prefetch=0,
            grid=(ndir,),
            in_specs=in_specs,
            out_specs=pl.BlockSpec((1, seq_len, B, D_e), lambda d: (d, 0, 0, 0)),
        ),
        compiler_params=pltpu.CompilerParams(
            # forward / backward directions are fully independent -> both TCs on v7x.
            dimension_semantics=("parallel",)),
    )(U_both, qmask_both, *weights)


# ----------------------------------------------------------------------------- glue (plain JAX, jitted)

def reverse_seq(X, mask):
    # _reverse_seq: flip each sequence's first sum(mask) entries, zero-pad.
    # pad_sequence pads to max(mask_sum); the reference only works when that equals
    # seq_len, so we use the static seq_len (jit-safe, no tracer concretization).
    Xb = jnp.swapaxes(X, 0, 1)                     # (batch, seq, ...)
    seq = X.shape[0]
    c = jnp.sum(mask, axis=1).astype(jnp.int32)    # (batch,)
    s = jnp.arange(seq)
    idx = c[:, None] - 1 - s[None, :]              # (batch, seq)
    valid = idx >= 0
    idx_c = jnp.clip(idx, 0, seq - 1)
    extra = (1,) * (Xb.ndim - 2)
    gathered = jnp.take_along_axis(Xb, idx_c.reshape(Xb.shape[0], seq, *extra), axis=1)
    out = jnp.where(valid.reshape(Xb.shape[0], seq, *extra), gathered, jnp.zeros((), X.dtype))
    return jnp.swapaxes(out, 0, 1)


@jax.jit
def model_forward(params, U, qmask, umask):
    rev_U = reverse_seq(U, umask)
    rev_qmask = reverse_seq(qmask, umask)
    U_both = jnp.stack([U, rev_U], axis=0)
    qmask_both = jnp.stack([qmask, rev_qmask], axis=0)

    e_both = dialogue_rnn_fused(params['rnn'], U_both, qmask_both)  # (2, seq, B, D_e)
    emotions_f = e_both[0]         # == c_f (the reference appends the same selection twice)
    emotions_b_rev = e_both[1]     # backward-direction states, still reversed == c_b
    emotions_b = reverse_seq(emotions_b_rev, umask)

    emotions = jnp.concatenate([emotions_f, emotions_b], axis=-1)   # (seq, B, 2*D_e)
    c = jnp.concatenate([emotions_f, emotions_b_rev], axis=-1)      # c_b NOT re-reversed (reference)

    # Classification head (linear1+relu, linear2+relu, smax_fc + log_softmax).
    # Tiny (seq*B rows x <=32 lanes): plain jnp inside the jit; XLA fuses it and we
    # avoid a second pallas_call launch + HBM round-trip (perf review item 5).
    head = params['head']
    h1 = jax.nn.relu(emotions @ head['w1'] + head['b1'])
    h2 = jax.nn.relu(h1 @ head['w2'] + head['b2'])
    logits = h2 @ head['w3'] + head['b3']
    log_prob = jax.nn.log_softmax(logits, axis=-1)
    return log_prob, c


# ----------------------------------------------------------------------------- params (deterministic)

def init_linear(key, in_dim, out_dim):
    k = 1.0 / np.sqrt(in_dim)
    k1, k2 = jax.random.split(key)
    w = jax.random.uniform(k1, (in_dim, out_dim), jnp.float32, -k, k)   # stored (in, out)
    b = jax.random.uniform(k2, (1, out_dim), jnp.float32, -k, k)
    return w, b


def init_dialogue_rnn(key, D_m, D_g, D_p, D_e):
    # GRU weights stored transposed (In, 3H), gate order (r, z, n).  Each cell's
    # input-projection weights for its concatenated inputs are pre-packed into ONE
    # (In_total, 3H) matrix so the kernel needs a single matmul per projection.
    def u(k, shape, bound):
        return jax.random.uniform(k, shape, jnp.float32, -bound, bound)

    kg, kp, ke = jax.random.split(key, 3)

    bg = 1.0 / np.sqrt(D_g)
    ks = jax.random.split(kg, 3)
    # g_cell: GRUCell(D_m + D_p + D_e, D_g).  W_hh is omitted: the reference never
    # propagates g_hist, so the hidden state is identically zero (0 @ W_hh == 0).
    g_cell = dict(w=u(ks[0], (D_m + D_p + D_e, 3 * D_g), bg),
                  bih=u(ks[1], (1, 3 * D_g), bg), bhh=u(ks[2], (1, 3 * D_g), bg))

    bp = 1.0 / np.sqrt(D_p)
    ks = jax.random.split(kp, 4)
    # p_cell: GRUCell(D_m + D_g + D_e, D_p)
    p_cell = dict(w=u(ks[0], (D_m + D_g + D_e, 3 * D_p), bp),
                  whh=u(ks[1], (D_p, 3 * D_p), bp),
                  bih=u(ks[2], (1, 3 * D_p), bp), bhh=u(ks[3], (1, 3 * D_p), bp))

    be = 1.0 / np.sqrt(D_e)
    ks = jax.random.split(ke, 4)
    # e_cell: GRUCell(D_p + D_p + D_g, D_e)
    e_cell = dict(w=u(ks[0], (2 * D_p + D_g, 3 * D_e), be),
                  whh=u(ks[1], (D_e, 3 * D_e), be),
                  bih=u(ks[2], (1, 3 * D_e), be), bhh=u(ks[3], (1, 3 * D_e), be))

    # MatchingAttention transform weights are not materialized: with the reference's
    # always-length-1 histories the softmax is identically 1 and the attention output
    # is exactly the single history entry, so they never influence the forward pass.
    return dict(g_cell=g_cell, p_cell=p_cell, e_cell=e_cell)


def init_head(key, D_e, D_y, n_classes):
    ks = jax.random.split(key, 3)
    w1, b1 = init_linear(ks[0], 2 * D_e, D_y)
    w2, b2 = init_linear(ks[1], D_y, D_y // 2)
    w3, b3 = init_linear(ks[2], D_y // 2, n_classes)
    return dict(w1=w1, b1=b1, w2=w2, b2=b2, w3=w3, b3=b3)


# ----------------------------------------------------------------------------- main

if __name__ == "__main__":
    D_h = D_g = D_p = D_e = D_y = 16   # D_h == D_m (utterance feature dim)
    party = PARTY
    n_classes = 4
    seq_len = 8
    batch = 2

    key = jax.random.PRNGKey(0)
    kU, kq, kpf, kpb, kh = jax.random.split(key, 5)
    U = jax.random.normal(kU, (seq_len, batch, D_h), jnp.float32)
    speakers = jax.random.randint(kq, (seq_len, batch), 0, party)
    qmask = jax.nn.one_hot(speakers, party, dtype=jnp.float32)
    umask = jnp.ones((batch, seq_len), jnp.float32)

    rnn_f = init_dialogue_rnn(kpf, D_h, D_g, D_p, D_e)
    rnn_b = init_dialogue_rnn(kpb, D_h, D_g, D_p, D_e)
    params = {
        # forward / backward DialogueRNNs stacked along a leading direction axis of 2
        'rnn': jax.tree_util.tree_map(lambda a, b: jnp.stack([a, b], axis=0), rnn_f, rnn_b),
        'head': init_head(kh, D_e, D_y, n_classes),
    }

    log_prob, c = model_forward(params, U, qmask, umask)
    jax.block_until_ready((log_prob, c))
    assert log_prob.shape == (seq_len, batch, n_classes)
    assert c.shape == (seq_len, batch, 2 * D_e)
    assert bool(jnp.all(jnp.isfinite(log_prob)))
    assert bool(jnp.all(jnp.isfinite(c)))
    print("KERNEL_OK")
</pallas_src>

<mosaic_0001>
module attributes {stable_mosaic.version = 11 : i64} {
  func.func @_dialogue_rnn_kernel(%arg0: i32, %arg1: memref<1x8x2x16xf32, #tpu.memory_space<vmem>>, %arg2: memref<1x8x2x2xf32, #tpu.memory_space<vmem>>, %arg3: memref<1x48x48xf32, #tpu.memory_space<vmem>>, %arg4: memref<1x1x48xf32, #tpu.memory_space<vmem>>, %arg5: memref<1x1x48xf32, #tpu.memory_space<vmem>>, %arg6: memref<1x48x48xf32, #tpu.memory_space<vmem>>, %arg7: memref<1x16x48xf32, #tpu.memory_space<vmem>>, %arg8: memref<1x1x48xf32, #tpu.memory_space<vmem>>, %arg9: memref<1x1x48xf32, #tpu.memory_space<vmem>>, %arg10: memref<1x48x48xf32, #tpu.memory_space<vmem>>, %arg11: memref<1x16x48xf32, #tpu.memory_space<vmem>>, %arg12: memref<1x1x48xf32, #tpu.memory_space<vmem>>, %arg13: memref<1x1x48xf32, #tpu.memory_space<vmem>>, %arg14: memref<1x8x2x16xf32, #tpu.memory_space<vmem>>) attributes {dimension_semantics = [#tpu.dimension_semantics<parallel>], iteration_bounds = array<i64: 2>, scalar_prefetch = 0 : i64, scratch_operands = 0 : i64, tpu.core_type = #tpu.core_type<tc>, window_params = [{transform_indices = @transform_0, window_bounds = array<i64: 1, 8, 2, 16>}, {transform_indices = @transform_1, window_bounds = array<i64: 1, 8, 2, 2>}, {transform_indices = @transform_2, window_bounds = array<i64: 1, 48, 48>}, {transform_indices = @transform_3, window_bounds = array<i64: 1, 1, 48>}, {transform_indices = @transform_4, window_bounds = array<i64: 1, 1, 48>}, {transform_indices = @transform_5, window_bounds = array<i64: 1, 48, 48>}, {transform_indices = @transform_6, window_bounds = array<i64: 1, 16, 48>}, {transform_indices = @transform_7, window_bounds = array<i64: 1, 1, 48>}, {transform_indices = @transform_8, window_bounds = array<i64: 1, 1, 48>}, {transform_indices = @transform_9, window_bounds = array<i64: 1, 48, 48>}, {transform_indices = @transform_10, window_bounds = array<i64: 1, 16, 48>}, {transform_indices = @transform_11, window_bounds = array<i64: 1, 1, 48>}, {transform_indices = @transform_12, window_bounds = array<i64: 1, 1, 48>}, {transform_indices = @transform_13, window_bounds = array<i64: 1, 8, 2, 16>}]} {
    %c0 = arith.constant 0 : index
    %c0_0 = arith.constant 0 : index
    %c0_1 = arith.constant 0 : index
    %0 = vector.load %arg3[%c0, %c0_0, %c0_1] : memref<1x48x48xf32, #tpu.memory_space<vmem>>, vector<1x48x48xf32>
    %1 = vector.shape_cast %0 : vector<1x48x48xf32> to vector<48x48xf32>
    %c0_2 = arith.constant 0 : index
    %c0_3 = arith.constant 0 : index
    %c0_4 = arith.constant 0 : index
    %2 = vector.load %arg6[%c0_2, %c0_3, %c0_4] : memref<1x48x48xf32, #tpu.memory_space<vmem>>, vector<1x48x48xf32>
    %3 = vector.shape_cast %2 : vector<1x48x48xf32> to vector<48x48xf32>
    %c0_5 = arith.constant 0 : index
    %c0_6 = arith.constant 0 : index
    %c0_7 = arith.constant 0 : index
    %4 = vector.load %arg7[%c0_5, %c0_6, %c0_7] : memref<1x16x48xf32, #tpu.memory_space<vmem>>, vector<1x16x48xf32>
    %5 = vector.shape_cast %4 : vector<1x16x48xf32> to vector<16x48xf32>
    %c0_8 = arith.constant 0 : index
    %c0_9 = arith.constant 0 : index
    %c0_10 = arith.constant 0 : index
    %6 = vector.load %arg10[%c0_8, %c0_9, %c0_10] : memref<1x48x48xf32, #tpu.memory_space<vmem>>, vector<1x48x48xf32>
    %7 = vector.shape_cast %6 : vector<1x48x48xf32> to vector<48x48xf32>
    %c0_11 = arith.constant 0 : index
    %c0_12 = arith.constant 0 : index
    %c0_13 = arith.constant 0 : index
    %8 = vector.load %arg11[%c0_11, %c0_12, %c0_13] : memref<1x16x48xf32, #tpu.memory_space<vmem>>, vector<1x16x48xf32>
    %9 = vector.shape_cast %8 : vector<1x16x48xf32> to vector<16x48xf32>
    %c0_14 = arith.constant 0 : index
    %c0_15 = arith.constant 0 : index
    %c0_16 = arith.constant 0 : index
    %10 = vector.load %arg4[%c0_14, %c0_15, %c0_16] : memref<1x1x48xf32, #tpu.memory_space<vmem>>, vector<1x1x48xf32>
    %11 = vector.shape_cast %10 : vector<1x1x48xf32> to vector<1x48xf32>
    %12 = vector.shape_cast %11 : vector<1x48xf32> to vector<1x48xf32>
    %13 = vector.broadcast %12 : vector<1x48xf32> to vector<2x48xf32>
    %c0_17 = arith.constant 0 : index
    %c0_18 = arith.constant 0 : index
    %c0_19 = arith.constant 0 : index
    %14 = vector.load %arg5[%c0_17, %c0_18, %c0_19] : memref<1x1x48xf32, #tpu.memory_space<vmem>>, vector<1x1x48xf32>
    %15 = vector.shape_cast %14 : vector<1x1x48xf32> to vector<1x48xf32>
    %16 = vector.shape_cast %15 : vector<1x48xf32> to vector<1x48xf32>
    %17 = vector.broadcast %16 : vector<1x48xf32> to vector<2x48xf32>
    %c0_20 = arith.constant 0 : index
    %c0_21 = arith.constant 0 : index
    %c0_22 = arith.constant 0 : index
    %18 = vector.load %arg8[%c0_20, %c0_21, %c0_22] : memref<1x1x48xf32, #tpu.memory_space<vmem>>, vector<1x1x48xf32>
    %19 = vector.shape_cast %18 : vector<1x1x48xf32> to vector<1x48xf32>
    %20 = vector.shape_cast %19 : vector<1x48xf32> to vector<1x48xf32>
    %21 = vector.broadcast %20 : vector<1x48xf32> to vector<2x48xf32>
    %c0_23 = arith.constant 0 : index
    %c0_24 = arith.constant 0 : index
    %c0_25 = arith.constant 0 : index
    %22 = vector.load %arg9[%c0_23, %c0_24, %c0_25] : memref<1x1x48xf32, #tpu.memory_space<vmem>>, vector<1x1x48xf32>
    %23 = vector.shape_cast %22 : vector<1x1x48xf32> to vector<1x48xf32>
    %24 = vector.shape_cast %23 : vector<1x48xf32> to vector<1x48xf32>
    %25 = vector.broadcast %24 : vector<1x48xf32> to vector<4x48xf32>
    %c0_26 = arith.constant 0 : index
    %c0_27 = arith.constant 0 : index
    %c0_28 = arith.constant 0 : index
    %26 = vector.load %arg12[%c0_26, %c0_27, %c0_28] : memref<1x1x48xf32, #tpu.memory_space<vmem>>, vector<1x1x48xf32>
    %27 = vector.shape_cast %26 : vector<1x1x48xf32> to vector<1x48xf32>
    %28 = vector.shape_cast %27 : vector<1x48xf32> to vector<1x48xf32>
    %29 = vector.broadcast %28 : vector<1x48xf32> to vector<4x48xf32>
    %c0_29 = arith.constant 0 : index
    %c0_30 = arith.constant 0 : index
    %c0_31 = arith.constant 0 : index
    %30 = vector.load %arg13[%c0_29, %c0_30, %c0_31] : memref<1x1x48xf32, #tpu.memory_space<vmem>>, vector<1x1x48xf32>
    %31 = vector.shape_cast %30 : vector<1x1x48xf32> to vector<1x48xf32>
    %32 = vector.shape_cast %31 : vector<1x48xf32> to vector<1x48xf32>
    %33 = vector.broadcast %32 : vector<1x48xf32> to vector<4x48xf32>
    %cst = arith.constant 0.000000e+00 : f32
    %34 = vector.broadcast %cst : f32 to vector<2x16xf32>
    %cst_32 = arith.constant 0.000000e+00 : f32
    %35 = vector.broadcast %cst_32 : f32 to vector<4x16xf32>
    %cst_33 = arith.constant 0.000000e+00 : f32
    %36 = vector.broadcast %cst_33 : f32 to vector<4x16xf32>
    %c0_34 = arith.constant 0 : index
    %c0_35 = arith.constant 0 : index
    %c0_36 = arith.constant 0 : index
    %c0_37 = arith.constant 0 : index
    %37 = vector.load %arg1[%c0_34, %c0_35, %c0_36, %c0_37] : memref<1x8x2x16xf32, #tpu.memory_space<vmem>>, vector<1x1x2x16xf32>
    %38 = vector.shape_cast %37 : vector<1x1x2x16xf32> to vector<2x16xf32>
    %c0_38 = arith.constant 0 : index
    %c0_39 = arith.constant 0 : index
    %c0_40 = arith.constant 0 : index
    %c0_41 = arith.constant 0 : index
    %39 = vector.load %arg2[%c0_38, %c0_39, %c0_40, %c0_41] : memref<1x8x2x2xf32, #tpu.memory_space<vmem>>, vector<1x1x2x2xf32>
    %40 = vector.shape_cast %39 : vector<1x1x2x2xf32> to vector<2x2xf32>
    %41 = vector.extract_strided_slice %40 {offsets = [0, 0], sizes = [2, 1], strides = [1, 1]} : vector<2x2xf32> to vector<2x1xf32>
    %42 = vector.extract_strided_slice %40 {offsets = [0, 1], sizes = [2, 1], strides = [1, 1]} : vector<2x2xf32> to vector<2x1xf32>
    %43 = tpu.concatenate %41, %42 in 0 : vector<2x1xf32>, vector<2x1xf32> -> vector<4x1xf32>
    %44 = vector.extract_strided_slice %35 {offsets = [0, 0], sizes = [2, 16], strides = [1, 1]} : vector<4x16xf32> to vector<2x16xf32>
    %45 = vector.broadcast %41 : vector<2x1xf32> to vector<2x16xf32>
    %46 = arith.mulf %44, %45 : vector<2x16xf32>
    %47 = vector.extract_strided_slice %35 {offsets = [2, 0], sizes = [2, 16], strides = [1, 1]} : vector<4x16xf32> to vector<2x16xf32>
    %48 = vector.broadcast %42 : vector<2x1xf32> to vector<2x16xf32>
    %49 = arith.mulf %47, %48 : vector<2x16xf32>
    %50 = arith.addf %46, %49 : vector<2x16xf32>
    %51 = vector.extract_strided_slice %36 {offsets = [0, 0], sizes = [2, 16], strides = [1, 1]} : vector<4x16xf32> to vector<2x16xf32>
    %52 = vector.broadcast %41 : vector<2x1xf32> to vector<2x16xf32>
    %53 = arith.mulf %51, %52 : vector<2x16xf32>
    %54 = vector.extract_strided_slice %36 {offsets = [2, 0], sizes = [2, 16], strides = [1, 1]} : vector<4x16xf32> to vector<2x16xf32>
    %55 = vector.broadcast %42 : vector<2x1xf32> to vector<2x16xf32>
    %56 = arith.mulf %54, %55 : vector<2x16xf32>
    %57 = arith.addf %53, %56 : vector<2x16xf32>
    %58 = tpu.concatenate %38, %50, %57 in 1 : vector<2x16xf32>, vector<2x16xf32>, vector<2x16xf32> -> vector<2x48xf32>
    %cst_42 = arith.constant dense<0.000000e+00> : vector<2x48xf32>
    %59 = tpu.matmul %58, %1, %cst_42 {dimension_numbers = #tpu.dot_dimension_numbers<[1], [0], [0], [1], [0, 0, 1, 1], [], []>} : vector<2x48xf32>, vector<48x48xf32>, vector<2x48xf32> -> vector<2x48xf32>
    %60 = arith.addf %59, %13 : vector<2x48xf32>
    %61 = vector.extract_strided_slice %60 {offsets = [0, 0], sizes = [2, 16], strides = [1, 1]} : vector<2x48xf32> to vector<2x16xf32>
    %62 = vector.extract_strided_slice %17 {offsets = [0, 0], sizes = [2, 16], strides = [1, 1]} : vector<2x48xf32> to vector<2x16xf32>
    %63 = arith.addf %61, %62 : vector<2x16xf32>
    %64 = arith.negf %63 : vector<2x16xf32>
    %65 = math.exp %64 : vector<2x16xf32>
    %cst_43 = arith.constant 1.000000e+00 : f32
    %66 = vector.broadcast %cst_43 : f32 to vector<2x16xf32>
    %67 = arith.addf %66, %65 : vector<2x16xf32>
    %68 = arith.divf %66, %67 : vector<2x16xf32>
    %69 = vector.extract_strided_slice %60 {offsets = [0, 16], sizes = [2, 16], strides = [1, 1]} : vector<2x48xf32> to vector<2x16xf32>
    %70 = vector.extract_strided_slice %17 {offsets = [0, 16], sizes = [2, 16], strides = [1, 1]} : vector<2x48xf32> to vector<2x16xf32>
    %71 = arith.addf %69, %70 : vector<2x16xf32>
    %72 = arith.negf %71 : vector<2x16xf32>
    %73 = math.exp %72 : vector<2x16xf32>
    %cst_44 = arith.constant 1.000000e+00 : f32
    %74 = vector.broadcast %cst_44 : f32 to vector<2x16xf32>
    %75 = arith.addf %74, %73 : vector<2x16xf32>
    %76 = arith.divf %74, %75 : vector<2x16xf32>
    %77 = vector.extract_strided_slice %60 {offsets = [0, 32], sizes = [2, 16], strides = [1, 1]} : vector<2x48xf32> to vector<2x16xf32>
    %78 = vector.extract_strided_slice %17 {offsets = [0, 32], sizes = [2, 16], strides = [1, 1]} : vector<2x48xf32> to vector<2x16xf32>
    %79 = arith.mulf %68, %78 : vector<2x16xf32>
    %80 = arith.addf %77, %79 : vector<2x16xf32>
    %81 = math.tanh %80 : vector<2x16xf32>
    %cst_45 = arith.constant 1.000000e+00 : f32
    %82 = vector.broadcast %cst_45 : f32 to vector<2x16xf32>
    %83 = arith.subf %82, %76 : vector<2x16xf32>
    %84 = arith.mulf %83, %81 : vector<2x16xf32>
    %85 = arith.mulf %76, %34 : vector<2x16xf32>
    %86 = arith.addf %84, %85 : vector<2x16xf32>
    %87 = tpu.concatenate %38, %86, %57 in 1 : vector<2x16xf32>, vector<2x16xf32>, vector<2x16xf32> -> vector<2x48xf32>
    %cst_46 = arith.constant dense<0.000000e+00> : vector<2x48xf32>
    %88 = tpu.matmul %87, %3, %cst_46 {dimension_numbers = #tpu.dot_dimension_numbers<[1], [0], [0], [1], [0, 0, 1, 1], [], []>} : vector<2x48xf32>, vector<48x48xf32>, vector<2x48xf32> -> vector<2x48xf32>
    %89 = arith.addf %88, %21 : vector<2x48xf32>
    %90 = tpu.concatenate %89, %89 in 0 : vector<2x48xf32>, vector<2x48xf32> -> vector<4x48xf32>
    %cst_47 = arith.constant dense<0.000000e+00> : vector<4x48xf32>
    %91 = tpu.matmul %35, %5, %cst_47 {dimension_numbers = #tpu.dot_dimension_numbers<[1], [0], [0], [1], [0, 0, 1, 1], [], []>} : vector<4x16xf32>, vector<16x48xf32>, vector<4x48xf32> -> vector<4x48xf32>
    %92 = arith.addf %91, %25 : vector<4x48xf32>
    %93 = vector.extract_strided_slice %90 {offsets = [0, 0], sizes = [4, 16], strides = [1, 1]} : vector<4x48xf32> to vector<4x16xf32>
    %94 = vector.extract_strided_slice %92 {offsets = [0, 0], sizes = [4, 16], strides = [1, 1]} : vector<4x48xf32> to vector<4x16xf32>
    %95 = arith.addf %93, %94 : vector<4x16xf32>
    %96 = arith.negf %95 : vector<4x16xf32>
    %97 = math.exp %96 : vector<4x16xf32>
    %cst_48 = arith.constant 1.000000e+00 : f32
    %98 = vector.broadcast %cst_48 : f32 to vector<4x16xf32>
    %99 = arith.addf %98, %97 : vector<4x16xf32>
    %100 = arith.divf %98, %99 : vector<4x16xf32>
    %101 = vector.extract_strided_slice %90 {offsets = [0, 16], sizes = [4, 16], strides = [1, 1]} : vector<4x48xf32> to vector<4x16xf32>
    %102 = vector.extract_strided_slice %92 {offsets = [0, 16], sizes = [4, 16], strides = [1, 1]} : vector<4x48xf32> to vector<4x16xf32>
    %103 = arith.addf %101, %102 : vector<4x16xf32>
    %104 = arith.negf %103 : vector<4x16xf32>
    %105 = math.exp %104 : vector<4x16xf32>
    %cst_49 = arith.constant 1.000000e+00 : f32
    %106 = vector.broadcast %cst_49 : f32 to vector<4x16xf32>
    %107 = arith.addf %106, %105 : vector<4x16xf32>
    %108 = arith.divf %106, %107 : vector<4x16xf32>
    %109 = vector.extract_strided_slice %90 {offsets = [0, 32], sizes = [4, 16], strides = [1, 1]} : vector<4x48xf32> to vector<4x16xf32>
    %110 = vector.extract_strided_slice %92 {offsets = [0, 32], sizes = [4, 16], strides = [1, 1]} : vector<4x48xf32> to vector<4x16xf32>
    %111 = arith.mulf %100, %110 : vector<4x16xf32>
    %112 = arith.addf %109, %111 : vector<4x16xf32>
    %113 = math.tanh %112 : vector<4x16xf32>
    %cst_50 = arith.constant 1.000000e+00 : f32
    %114 = vector.broadcast %cst_50 : f32 to vector<4x16xf32>
    %115 = arith.subf %114, %108 : vector<4x16xf32>
    %116 = arith.mulf %115, %113 : vector<4x16xf32>
    %117 = arith.mulf %108, %35 : vector<4x16xf32>
    %118 = arith.addf %116, %117 : vector<4x16xf32>
    %cst_51 = arith.constant 1.000000e+00 : f32
    %119 = vector.broadcast %cst_51 : f32 to vector<4x1xf32>
    %120 = arith.subf %119, %43 : vector<4x1xf32>
    %121 = vector.broadcast %120 : vector<4x1xf32> to vector<4x16xf32>
    %122 = arith.mulf %35, %121 : vector<4x16xf32>
    %123 = vector.broadcast %43 : vector<4x1xf32> to vector<4x16xf32>
    %124 = arith.mulf %118, %123 : vector<4x16xf32>
    %125 = arith.addf %122, %124 : vector<4x16xf32>
    %126 = vector.extract_strided_slice %125 {offsets = [2, 0], sizes = [2, 16], strides = [1, 1]} : vector<4x16xf32> to vector<2x16xf32>
    %127 = vector.extract_strided_slice %125 {offsets = [0, 0], sizes = [2, 16], strides = [1, 1]} : vector<4x16xf32> to vector<2x16xf32>
    %128 = tpu.concatenate %126, %127 in 0 : vector<2x16xf32>, vector<2x16xf32> -> vector<4x16xf32>
    %129 = tpu.concatenate %86, %86 in 0 : vector<2x16xf32>, vector<2x16xf32> -> vector<4x16xf32>
    %130 = tpu.concatenate %128, %125, %129 in 1 : vector<4x16xf32>, vector<4x16xf32>, vector<4x16xf32> -> vector<4x48xf32>
    %cst_52 = arith.constant dense<0.000000e+00> : vector<4x48xf32>
    %131 = tpu.matmul %130, %7, %cst_52 {dimension_numbers = #tpu.dot_dimension_numbers<[1], [0], [0], [1], [0, 0, 1, 1], [], []>} : vector<4x48xf32>, vector<48x48xf32>, vector<4x48xf32> -> vector<4x48xf32>
    %132 = arith.addf %131, %29 : vector<4x48xf32>
    %cst_53 = arith.constant dense<0.000000e+00> : vector<4x48xf32>
    %133 = tpu.matmul %36, %9, %cst_53 {dimension_numbers = #tpu.dot_dimension_numbers<[1], [0], [0], [1], [0, 0, 1, 1], [], []>} : vector<4x16xf32>, vector<16x48xf32>, vector<4x48xf32> -> vector<4x48xf32>
    %134 = arith.addf %133, %33 : vector<4x48xf32>
    %135 = vector.extract_strided_slice %132 {offsets = [0, 0], sizes = [4, 16], strides = [1, 1]} : vector<4x48xf32> to vector<4x16xf32>
    %136 = vector.extract_strided_slice %134 {offsets = [0, 0], sizes = [4, 16], strides = [1, 1]} : vector<4x48xf32> to vector<4x16xf32>
    %137 = arith.addf %135, %136 : vector<4x16xf32>
    %138 = arith.negf %137 : vector<4x16xf32>
    %139 = math.exp %138 : vector<4x16xf32>
    %cst_54 = arith.constant 1.000000e+00 : f32
    %140 = vector.broadcast %cst_54 : f32 to vector<4x16xf32>
    %141 = arith.addf %140, %139 : vector<4x16xf32>
    %142 = arith.divf %140, %141 : vector<4x16xf32>
    %143 = vector.extract_strided_slice %132 {offsets = [0, 16], sizes = [4, 16], strides = [1, 1]} : vector<4x48xf32> to vector<4x16xf32>
    %144 = vector.extract_strided_slice %134 {offsets = [0, 16], sizes = [4, 16], strides = [1, 1]} : vector<4x48xf32> to vector<4x16xf32>
    %145 = arith.addf %143, %144 : vector<4x16xf32>
    %146 = arith.negf %145 : vector<4x16xf32>
    %147 = math.exp %146 : vector<4x16xf32>
    %cst_55 = arith.constant 1.000000e+00 : f32
    %148 = vector.broadcast %cst_55 : f32 to vector<4x16xf32>
    %149 = arith.addf %148, %147 : vector<4x16xf32>
    %150 = arith.divf %148, %149 : vector<4x16xf32>
    %151 = vector.extract_strided_slice %132 {offsets = [0, 32], sizes = [4, 16], strides = [1, 1]} : vector<4x48xf32> to vector<4x16xf32>
    %152 = vector.extract_strided_slice %134 {offsets = [0, 32], sizes = [4, 16], strides = [1, 1]} : vector<4x48xf32> to vector<4x16xf32>
    %153 = arith.mulf %142, %152 : vector<4x16xf32>
    %154 = arith.addf %151, %153 : vector<4x16xf32>
    %155 = math.tanh %154 : vector<4x16xf32>
    %cst_56 = arith.constant 1.000000e+00 : f32
    %156 = vector.broadcast %cst_56 : f32 to vector<4x16xf32>
    %157 = arith.subf %156, %150 : vector<4x16xf32>
    %158 = arith.mulf %157, %155 : vector<4x16xf32>
    %159 = arith.mulf %150, %36 : vector<4x16xf32>
    %160 = arith.addf %158, %159 : vector<4x16xf32>
    %cst_57 = arith.constant 1.000000e+00 : f32
    %161 = vector.broadcast %cst_57 : f32 to vector<4x1xf32>
    %162 = arith.subf %161, %43 : vector<4x1xf32>
    %163 = vector.broadcast %162 : vector<4x1xf32> to vector<4x16xf32>
    %164 = arith.mulf %36, %163 : vector<4x16xf32>
    %165 = vector.broadcast %43 : vector<4x1xf32> to vector<4x16xf32>
    %166 = arith.mulf %160, %165 : vector<4x16xf32>
    %167 = arith.addf %164, %166 : vector<4x16xf32>
    %168 = vector.extract_strided_slice %167 {offsets = [0, 0], sizes = [2, 16], strides = [1, 1]} : vector<4x16xf32> to vector<2x16xf32>
    %169 = vector.broadcast %41 : vector<2x1xf32> to vector<2x16xf32>
    %170 = arith.mulf %168, %169 : vector<2x16xf32>
    %171 = vector.extract_strided_slice %167 {offsets = [2, 0], sizes = [2, 16], strides = [1, 1]} : vector<4x16xf32> to vector<2x16xf32>
    %172 = vector.broadcast %42 : vector<2x1xf32> to vector<2x16xf32>
    %173 = arith.mulf %171, %172 : vector<2x16xf32>
    %174 = arith.addf %170, %173 : vector<2x16xf32>
    %c0_58 = arith.constant 0 : index
    %c0_59 = arith.constant 0 : index
    %c0_60 = arith.constant 0 : index
    %c0_61 = arith.constant 0 : index
    %175 = vector.load %arg14[%c0_58, %c0_59, %c0_60, %c0_61] : memref<1x8x2x16xf32, #tpu.memory_space<vmem>>, vector<1x1x2x16xf32>
    %176 = vector.shape_cast %175 : vector<1x1x2x16xf32> to vector<2x16xf32>
    %177 = vector.shape_cast %174 : vector<2x16xf32> to vector<1x1x2x16xf32>
    tpu.vector_store %arg14[%c0_58, %c0_59, %c0_60, %c0_61], %177 {strides = array<i32>} : memref<1x8x2x16xf32, #tpu.memory_space<vmem>>, vector<1x1x2x16xf32>,
    %c0_62 = arith.constant 0 : index
    %c1 = arith.constant 1 : index
    %c0_63 = arith.constant 0 : index
    %c0_64 = arith.constant 0 : index
    %178 = vector.load %arg1[%c0_62, %c1, %c0_63, %c0_64] : memref<1x8x2x16xf32, #tpu.memory_space<vmem>>, vector<1x1x2x16xf32>
    %179 = vector.shape_cast %178 : vector<1x1x2x16xf32> to vector<2x16xf32>
    %c0_65 = arith.constant 0 : index
    %c1_66 = arith.constant 1 : index
    %c0_67 = arith.constant 0 : index
    %c0_68 = arith.constant 0 : index
    %180 = vector.load %arg2[%c0_65, %c1_66, %c0_67, %c0_68] : memref<1x8x2x2xf32, #tpu.memory_space<vmem>>, vector<1x1x2x2xf32>
    %181 = vector.shape_cast %180 : vector<1x1x2x2xf32> to vector<2x2xf32>
    %182 = vector.extract_strided_slice %181 {offsets = [0, 0], sizes = [2, 1], strides = [1, 1]} : vector<2x2xf32> to vector<2x1xf32>
    %183 = vector.extract_strided_slice %181 {offsets = [0, 1], sizes = [2, 1], strides = [1, 1]} : vector<2x2xf32> to vector<2x1xf32>
    %184 = tpu.concatenate %182, %183 in 0 : vector<2x1xf32>, vector<2x1xf32> -> vector<4x1xf32>
    %185 = vector.extract_strided_slice %125 {offsets = [0, 0], sizes = [2, 16], strides = [1, 1]} : vector<4x16xf32> to vector<2x16xf32>
    %186 = vector.broadcast %182 : vector<2x1xf32> to vector<2x16xf32>
    %187 = arith.mulf %185, %186 : vector<2x16xf32>
    %188 = vector.extract_strided_slice %125 {offsets = [2, 0], sizes = [2, 16], strides = [1, 1]} : vector<4x16xf32> to vector<2x16xf32>
    %189 = vector.broadcast %183 : vector<2x1xf32> to vector<2x16xf32>
    %190 = arith.mulf %188, %189 : vector<2x16xf32>
    %191 = arith.addf %187, %190 : vector<2x16xf32>
    %192 = vector.extract_strided_slice %167 {offsets = [0, 0], sizes = [2, 16], strides = [1, 1]} : vector<4x16xf32> to vector<2x16xf32>
    %193 = vector.broadcast %182 : vector<2x1xf32> to vector<2x16xf32>
    %194 = arith.mulf %192, %193 : vector<2x16xf32>
    %195 = vector.extract_strided_slice %167 {offsets = [2, 0], sizes = [2, 16], strides = [1, 1]} : vector<4x16xf32> to vector<2x16xf32>
    %196 = vector.broadcast %183 : vector<2x1xf32> to vector<2x16xf32>
    %197 = arith.mulf %195, %196 : vector<2x16xf32>
    %198 = arith.addf %194, %197 : vector<2x16xf32>
    %199 = tpu.concatenate %179, %191, %198 in 1 : vector<2x16xf32>, vector<2x16xf32>, vector<2x16xf32> -> vector<2x48xf32>
    %cst_69 = arith.constant dense<0.000000e+00> : vector<2x48xf32>
    %200 = tpu.matmul %199, %1, %cst_69 {dimension_numbers = #tpu.dot_dimension_numbers<[1], [0], [0], [1], [0, 0, 1, 1], [], []>} : vector<2x48xf32>, vector<48x48xf32>, vector<2x48xf32> -> vector<2x48xf32>
    %201 = arith.addf %200, %13 : vector<2x48xf32>
    %202 = vector.extract_strided_slice %201 {offsets = [0, 0], sizes = [2, 16], strides = [1, 1]} : vector<2x48xf32> to vector<2x16xf32>
    %203 = vector.extract_strided_slice %17 {offsets = [0, 0], sizes = [2, 16], strides = [1, 1]} : vector<2x48xf32> to vector<2x16xf32>
    %204 = arith.addf %202, %203 : vector<2x16xf32>
    %205 = arith.negf %204 : vector<2x16xf32>
    %206 = math.exp %205 : vector<2x16xf32>
    %cst_70 = arith.constant 1.000000e+00 : f32
    %207 = vector.broadcast %cst_70 : f32 to vector<2x16xf32>
    %208 = arith.addf %207, %206 : vector<2x16xf32>
    %209 = arith.divf %207, %208 : vector<2x16xf32>
    %210 = vector.extract_strided_slice %201 {offsets = [0, 16], sizes = [2, 16], strides = [1, 1]} : vector<2x48xf32> to vector<2x16xf32>
    %211 = vector.extract_strided_slice %17 {offsets = [0, 16], sizes = [2, 16], strides = [1, 1]} : vector<2x48xf32> to vector<2x16xf32>
    %212 = arith.addf %210, %211 : vector<2x16xf32>
    %213 = arith.negf %212 : vector<2x16xf32>
    %214 = math.exp %213 : vector<2x16xf32>
    %cst_71 = arith.constant 1.000000e+00 : f32
    %215 = vector.broadcast %cst_71 : f32 to vector<2x16xf32>
    %216 = arith.addf %215, %214 : vector<2x16xf32>
    %217 = arith.divf %215, %216 : vector<2x16xf32>
    %218 = vector.extract_strided_slice %201 {offsets = [0, 32], sizes = [2, 16], strides = [1, 1]} : vector<2x48xf32> to vector<2x16xf32>
    %219 = vector.extract_strided_slice %17 {offsets = [0, 32], sizes = [2, 16], strides = [1, 1]} : vector<2x48xf32> to vector<2x16xf32>
    %220 = arith.mulf %209, %219 : vector<2x16xf32>
    %221 = arith.addf %218, %220 : vector<2x16xf32>
    %222 = math.tanh %221 : vector<2x16xf32>
    %cst_72 = arith.constant 1.000000e+00 : f32
    %223 = vector.broadcast %cst_72 : f32 to vector<2x16xf32>
    %224 = arith.subf %223, %217 : vector<2x16xf32>
    %225 = arith.mulf %224, %222 : vector<2x16xf32>
    %226 = arith.mulf %217, %34 : vector<2x16xf32>
    %227 = arith.addf %225, %226 : vector<2x16xf32>
    %228 = tpu.concatenate %179, %227, %198 in 1 : vector<2x16xf32>, vector<2x16xf32>, vector<2x16xf32> -> vector<2x48xf32>
    %cst_73 = arith.constant dense<0.000000e+00> : vector<2x48xf32>
    %229 = tpu.matmul %228, %3, %cst_73 {dimension_numbers = #tpu.dot_dimension_numbers<[1], [0], [0], [1], [0, 0, 1, 1], [], []>} : vector<2x48xf32>, vector<48x48xf32>, vector<2x48xf32> -> vector<2x48xf32>
    %230 = arith.addf %229, %21 : vector<2x48xf32>
    %231 = tpu.concatenate %230, %230 in 0 : vector<2x48xf32>, vector<2x48xf32> -> vector<4x48xf32>
    %cst_74 = arith.constant dense<0.000000e+00> : vector<4x48xf32>
    %232 = tpu.matmul %125, %5, %cst_74 {dimension_numbers = #tpu.dot_dimension_numbers<[1], [0], [0], [1], [0, 0, 1, 1], [], []>} : vector<4x16xf32>, vector<16x48xf32>, vector<4x48xf32> -> vector<4x48xf32>
    %233 = arith.addf %232, %25 : vector<4x48xf32>
    %234 = vector.extract_strided_slice %231 {offsets = [0, 0], sizes = [4, 16], strides = [1, 1]} : vector<4x48xf32> to vector<4x16xf32>
    %235 = vector.extract_strided_slice %233 {offsets = [0, 0], sizes = [4, 16], strides = [1, 1]} : vector<4x48xf32> to vector<4x16xf32>
    %236 = arith.addf %234, %235 : vector<4x16xf32>
    %237 = arith.negf %236 : vector<4x16xf32>
    %238 = math.exp %237 : vector<4x16xf32>
    %cst_75 = arith.constant 1.000000e+00 : f32
    %239 = vector.broadcast %cst_75 : f32 to vector<4x16xf32>
    %240 = arith.addf %239, %238 : vector<4x16xf32>
    %241 = arith.divf %239, %240 : vector<4x16xf32>
    %242 = vector.extract_strided_slice %231 {offsets = [0, 16], sizes = [4, 16], strides = [1, 1]} : vector<4x48xf32> to vector<4x16xf32>
    %243 = vector.extract_strided_slice %233 {offsets = [0, 16], sizes = [4, 16], strides = [1, 1]} : vector<4x48xf32> to vector<4x16xf32>
    %244 = arith.addf %242, %243 : vector<4x16xf32>
    %245 = arith.negf %244 : vector<4x16xf32>
    %246 = math.exp %245 : vector<4x16xf32>
    %cst_76 = arith.constant 1.000000e+00 : f32
    %247 = vector.broadcast %cst_76 : f32 to vector<4x16xf32>
    %248 = arith.addf %247, %246 : vector<4x16xf32>
    %249 = arith.divf %247, %248 : vector<4x16xf32>
    %250 = vector.extract_strided_slice %231 {offsets = [0, 32], sizes = [4, 16], strides = [1, 1]} : vector<4x48xf32> to vector<4x16xf32>
    %251 = vector.extract_strided_slice %233 {offsets = [0, 32], sizes = [4, 16], strides = [1, 1]} : vector<4x48xf32> to vector<4x16xf32>
    %252 = arith.mulf %241, %251 : vector<4x16xf32>
    %253 = arith.addf %250, %252 : vector<4x16xf32>
    %254 = math.tanh %253 : vector<4x16xf32>
    %cst_77 = arith.constant 1.000000e+00 : f32
    %255 = vector.broadcast %cst_77 : f32 to vector<4x16xf32>
    %256 = arith.subf %255, %249 : vector<4x16xf32>
    %257 = arith.mulf %256, %254 : vector<4x16xf32>
    %258 = arith.mulf %249, %125 : vector<4x16xf32>
    %259 = arith.addf %257, %258 : vector<4x16xf32>
    %cst_78 = arith.constant 1.000000e+00 : f32
    %260 = vector.broadcast %cst_78 : f32 to vector<4x1xf32>
    %261 = arith.subf %260, %184 : vector<4x1xf32>
    %262 = vector.broadcast %261 : vector<4x1xf32> to vector<4x16xf32>
    %263 = arith.mulf %125, %262 : vector<4x16xf32>
    %264 = vector.broadcast %184 : vector<4x1xf32> to vector<4x16xf32>
    %265 = arith.mulf %259, %264 : vector<4x16xf32>
    %266 = arith.addf %263, %265 : vector<4x16xf32>
    %267 = vector.extract_strided_slice %266 {offsets = [2, 0], sizes = [2, 16], strides = [1, 1]} : vector<4x16xf32> to vector<2x16xf32>
    %268 = vector.extract_strided_slice %266 {offsets = [0, 0], sizes = [2, 16], strides = [1, 1]} : vector<4x16xf32> to vector<2x16xf32>
    %269 = tpu.concatenate %267, %268 in 0 : vector<2x16xf32>, vector<2x16xf32> -> vector<4x16xf32>
    %270 = tpu.concatenate %227, %227 in 0 : vector<2x16xf32>, vector<2x16xf32> -> vector<4x16xf32>
    %271 = tpu.concatenate %269, %266, %270 in 1 : vector<4x16xf32>, vector<4x16xf32>, vector<4x16xf32> -> vector<4x48xf32>
    %cst_79 = arith.constant dense<0.000000e+00> : vector<4x48xf32>
    %272 = tpu.matmul %271, %7, %cst_79 {dimension_numbers = #tpu.dot_dimension_numbers<[1], [0], [0], [1], [0, 0, 1, 1], [], []>} : vector<4x48xf32>, vector<48x48xf32>, vector<4x48xf32> -> vector<4x48xf32>
    %273 = arith.addf %272, %29 : vector<4x48xf32>
    %cst_80 = arith.constant dense<0.000000e+00> : vector<4x48xf32>
    %274 = tpu.matmul %167, %9, %cst_80 {dimension_numbers = #tpu.dot_dimension_numbers<[1], [0], [0], [1], [0, 0, 1, 1], [], []>} : vector<4x16xf32>, vector<16x48xf32>, vector<4x48xf32> -> vector<4x48xf32>
    %275 = arith.addf %274, %33 : vector<4x48xf32>
    %276 = vector.extract_strided_slice %273 {offsets = [0, 0], sizes = [4, 16], strides = [1, 1]} : vector<4x48xf32> to vector<4x16xf32>
    %277 = vector.extract_strided_slice %275 {offsets = [0, 0], sizes = [4, 16], strides = [1, 1]} : vector<4x48xf32> to vector<4x16xf32>
    %278 = arith.addf %276, %277 : vector<4x16xf32>
    %279 = arith.negf %278 : vector<4x16xf32>
    %280 = math.exp %279 : vector<4x16xf32>
    %cst_81 = arith.constant 1.000000e+00 : f32
    %281 = vector.broadcast %cst_81 : f32 to vector<4x16xf32>
    %282 = arith.addf %281, %280 : vector<4x16xf32>
    %283 = arith.divf %281, %282 : vector<4x16xf32>
    %284 = vector.extract_strided_slice %273 {offsets = [0, 16], sizes = [4, 16], strides = [1, 1]} : vector<4x48xf32> to vector<4x16xf32>
    %285 = vector.extract_strided_slice %275 {offsets = [0, 16], sizes = [4, 16], strides = [1, 1]} : vector<4x48xf32> to vector<4x16xf32>
    %286 = arith.addf %284, %285 : vector<4x16xf32>
    %287 = arith.negf %286 : vector<4x16xf32>
    %288 = math.exp %287 : vector<4x16xf32>
    %cst_82 = arith.constant 1.000000e+00 : f32
    %289 = vector.broadcast %cst_82 : f32 to vector<4x16xf32>
    %290 = arith.addf %289, %288 : vector<4x16xf32>
    %291 = arith.divf %289, %290 : vector<4x16xf32>
    %292 = vector.extract_strided_slice %273 {offsets = [0, 32], sizes = [4, 16], strides = [1, 1]} : vector<4x48xf32> to vector<4x16xf32>
    %293 = vector.extract_strided_slice %275 {offsets = [0, 32], sizes = [4, 16], strides = [1, 1]} : vector<4x48xf32> to vector<4x16xf32>
    %294 = arith.mulf %283, %293 : vector<4x16xf32>
    %295 = arith.addf %292, %294 : vector<4x16xf32>
    %296 = math.tanh %295 : vector<4x16xf32>
    %cst_83 = arith.constant 1.000000e+00 : f32
    %297 = vector.broadcast %cst_83 : f32 to vector<4x16xf32>
    %298 = arith.subf %297, %291 : vector<4x16xf32>
    %299 = arith.mulf %298, %296 : vector<4x16xf32>
    %300 = arith.mulf %291, %167 : vector<4x16xf32>
    %301 = arith.addf %299, %300 : vector<4x16xf32>
    %cst_84 = arith.constant 1.000000e+00 : f32
    %302 = vector.broadcast %cst_84 : f32 to vector<4x1xf32>
    %303 = arith.subf %302, %184 : vector<4x1xf32>
    %304 = vector.broadcast %303 : vector<4x1xf32> to vector<4x16xf32>
    %305 = arith.mulf %167, %304 : vector<4x16xf32>
    %306 = vector.broadcast %184 : vector<4x1xf32> to vector<4x16xf32>
    %307 = arith.mulf %301, %306 : vector<4x16xf32>
    %308 = arith.addf %305, %307 : vector<4x16xf32>
    %309 = vector.extract_strided_slice %308 {offsets = [0, 0], sizes = [2, 16], strides = [1, 1]} : vector<4x16xf32> to vector<2x16xf32>
    %310 = vector.broadcast %182 : vector<2x1xf32> to vector<2x16xf32>
    %311 = arith.mulf %309, %310 : vector<2x16xf32>
    %312 = vector.extract_strided_slice %308 {offsets = [2, 0], sizes = [2, 16], strides = [1, 1]} : vector<4x16xf32> to vector<2x16xf32>
    %313 = vector.broadcast %183 : vector<2x1xf32> to vector<2x16xf32>
    %314 = arith.mulf %312, %313 : vector<2x16xf32>
    %315 = arith.addf %311, %314 : vector<2x16xf32>
    %c0_85 = arith.constant 0 : index
    %c1_86 = arith.constant 1 : index
    %c0_87 = arith.constant 0 : index
    %c0_88 = arith.constant 0 : index
    %316 = vector.load %arg14[%c0_85, %c1_86, %c0_87, %c0_88] : memref<1x8x2x16xf32, #tpu.memory_space<vmem>>, vector<1x1x2x16xf32>
    %317 = vector.shape_cast %316 : vector<1x1x2x16xf32> to vector<2x16xf32>
    %318 = vector.shape_cast %315 : vector<2x16xf32> to vector<1x1x2x16xf32>
    tpu.vector_store %arg14[%c0_85, %c1_86, %c0_87, %c0_88], %318 {strides = array<i32>} : memref<1x8x2x16xf32, #tpu.memory_space<vmem>>, vector<1x1x2x16xf32>,
    %c0_89 = arith.constant 0 : index
    %c2 = arith.constant 2 : index
    %c0_90 = arith.constant 0 : index
    %c0_91 = arith.constant 0 : index
    %319 = vector.load %arg1[%c0_89, %c2, %c0_90, %c0_91] : memref<1x8x2x16xf32, #tpu.memory_space<vmem>>, vector<1x1x2x16xf32>
    %320 = vector.shape_cast %319 : vector<1x1x2x16xf32> to vector<2x16xf32>
    %c0_92 = arith.constant 0 : index
    %c2_93 = arith.constant 2 : index
    %c0_94 = arith.constant 0 : index
    %c0_95 = arith.constant 0 : index
    %321 = vector.load %arg2[%c0_92, %c2_93, %c0_94, %c0_95] : memref<1x8x2x2xf32, #tpu.memory_space<vmem>>, vector<1x1x2x2xf32>
    %322 = vector.shape_cast %321 : vector<1x1x2x2xf32> to vector<2x2xf32>
    %323 = vector.extract_strided_slice %322 {offsets = [0, 0], sizes = [2, 1], strides = [1, 1]} : vector<2x2xf32> to vector<2x1xf32>
    %324 = vector.extract_strided_slice %322 {offsets = [0, 1], sizes = [2, 1], strides = [1, 1]} : vector<2x2xf32> to vector<2x1xf32>
    %325 = tpu.concatenate %323, %324 in 0 : vector<2x1xf32>, vector<2x1xf32> -> vector<4x1xf32>
    %326 = vector.extract_strided_slice %266 {offsets = [0, 0], sizes = [2, 16], strides = [1, 1]} : vector<4x16xf32> to vector<2x16xf32>
    %327 = vector.broadcast %323 : vector<2x1xf32> to vector<2x16xf32>
    %328 = arith.mulf %326, %327 : vector<2x16xf32>
    %329 = vector.extract_strided_slice %266 {offsets = [2, 0], sizes = [2, 16], strides = [1, 1]} : vector<4x16xf32> to vector<2x16xf32>
    %330 = vector.broadcast %324 : vector<2x1xf32> to vector<2x16xf32>
    %331 = arith.mulf %329, %330 : vector<2x16xf32>
    %332 = arith.addf %328, %331 : vector<2x16xf32>
    %333 = vector.extract_strided_slice %308 {offsets = [0, 0], sizes = [2, 16], strides = [1, 1]} : vector<4x16xf32> to vector<2x16xf32>
    %334 = vector.broadcast %323 : vector<2x1xf32> to vector<2x16xf32>
    %335 = arith.mulf %333, %334 : vector<2x16xf32>
    %336 = vector.extract_strided_slice %308 {offsets = [2, 0], sizes = [2, 16], strides = [1, 1]} : vector<4x16xf32> to vector<2x16xf32>
    %337 = vector.broadcast %324 : vector<2x1xf32> to vector<2x16xf32>
    %338 = arith.mulf %336, %337 : vector<2x16xf32>
    %339 = arith.addf %335, %338 : vector<2x16xf32>
    %340 = tpu.concatenate %320, %332, %339 in 1 : vector<2x16xf32>, vector<2x16xf32>, vector<2x16xf32> -> vector<2x48xf32>
    %cst_96 = arith.constant dense<0.000000e+00> : vector<2x48xf32>
    %341 = tpu.matmul %340, %1, %cst_96 {dimension_numbers = #tpu.dot_dimension_numbers<[1], [0], [0], [1], [0, 0, 1, 1], [], []>} : vector<2x48xf32>, vector<48x48xf32>, vector<2x48xf32> -> vector<2x48xf32>
    %342 = arith.addf %341, %13 : vector<2x48xf32>
    %343 = vector.extract_strided_slice %342 {offsets = [0, 0], sizes = [2, 16], strides = [1, 1]} : vector<2x48xf32> to vector<2x16xf32>
    %344 = vector.extract_strided_slice %17 {offsets = [0, 0], sizes = [2, 16], strides = [1, 1]} : vector<2x48xf32> to vector<2x16xf32>
    %345 = arith.addf %343, %344 : vector<2x16xf32>
    %346 = arith.negf %345 : vector<2x16xf32>
    %347 = math.exp %346 : vector<2x16xf32>
    %cst_97 = arith.constant 1.000000e+00 : f32
    %348 = vector.broadcast %cst_97 : f32 to vector<2x16xf32>
    %349 = arith.addf %348, %347 : vector<2x16xf32>
    %350 = arith.divf %348, %349 : vector<2x16xf32>
    %351 = vector.extract_strided_slice %342 {offsets = [0, 16], sizes = [2, 16], strides = [1, 1]} : vector<2x48xf32> to vector<2x16xf32>
    %352 = vector.extract_strided_slice %17 {offsets = [0, 16], sizes = [2, 16], strides = [1, 1]} : vector<2x48xf32> to vector<2x16xf32>
    %353 = arith.addf %351, %352 : vector<2x16xf32>
    %354 = arith.negf %353 : vector<2x16xf32>
    %355 = math.exp %354 : vector<2x16xf32>
    %cst_98 = arith.constant 1.000000e+00 : f32
    %356 = vector.broadcast %cst_98 : f32 to vector<2x16xf32>
    %357 = arith.addf %356, %355 : vector<2x16xf32>
    %358 = arith.divf %356, %357 : vector<2x16xf32>
    %359 = vector.extract_strided_slice %342 {offsets = [0, 32], sizes = [2, 16], strides = [1, 1]} : vector<2x48xf32> to vector<2x16xf32>
    %360 = vector.extract_strided_slice %17 {offsets = [0, 32], sizes = [2, 16], strides = [1, 1]} : vector<2x48xf32> to vector<2x16xf32>
    %361 = arith.mulf %350, %360 : vector<2x16xf32>
    %362 = arith.addf %359, %361 : vector<2x16xf32>
    %363 = math.tanh %362 : vector<2x16xf32>
    %cst_99 = arith.constant 1.000000e+00 : f32
    %364 = vector.broadcast %cst_99 : f32 to vector<2x16xf32>
    %365 = arith.subf %364, %358 : vector<2x16xf32>
    %366 = arith.mulf %365, %363 : vector<2x16xf32>
    %367 = arith.mulf %358, %34 : vector<2x16xf32>
    %368 = arith.addf %366, %367 : vector<2x16xf32>
    %369 = tpu.concatenate %320, %368, %339 in 1 : vector<2x16xf32>, vector<2x16xf32>, vector<2x16xf32> -> vector<2x48xf32>
    %cst_100 = arith.constant dense<0.000000e+00> : vector<2x48xf32>
    %370 = tpu.matmul %369, %3, %cst_100 {dimension_numbers = #tpu.dot_dimension_numbers<[1], [0], [0], [1], [0, 0, 1, 1], [], []>} : vector<2x48xf32>, vector<48x48xf32>, vector<2x48xf32> -> vector<2x48xf32>
    %371 = arith.addf %370, %21 : vector<2x48xf32>
    %372 = tpu.concatenate %371, %371 in 0 : vector<2x48xf32>, vector<2x48xf32> -> vector<4x48xf32>
    %cst_101 = arith.constant dense<0.000000e+00> : vector<4x48xf32>
    %373 = tpu.matmul %266, %5, %cst_101 {dimension_numbers = #tpu.dot_dimension_numbers<[1], [0], [0], [1], [0, 0, 1, 1], [], []>} : vector<4x16xf32>, vector<16x48xf32>, vector<4x48xf32> -> vector<4x48xf32>
    %374 = arith.addf %373, %25 : vector<4x48xf32>
    %375 = vector.extract_strided_slice %372 {offsets = [0, 0], sizes = [4, 16], strides = [1, 1]} : vector<4x48xf32> to vector<4x16xf32>
    %376 = vector.extract_strided_slice %374 {offsets = [0, 0], sizes = [4, 16], strides = [1, 1]} : vector<4x48xf32> to vector<4x16xf32>
    %377 = arith.addf %375, %376 : vector<4x16xf32>
    %378 = arith.negf %377 : vector<4x16xf32>
    %379 = math.exp %378 : vector<4x16xf32>
    %cst_102 = arith.constant 1.000000e+00 : f32
    %380 = vector.broadcast %cst_102 : f32 to vector<4x16xf32>
    %381 = arith.addf %380, %379 : vector<4x16xf32>
    %382 = arith.divf %380, %381 : vector<4x16xf32>
    %383 = vector.extract_strided_slice %372 {offsets = [0, 16], sizes = [4, 16], strides = [1, 1]} : vector<4x48xf32> to vector<4x16xf32>
    %384 = vector.extract_strided_slice %374 {offsets = [0, 16], sizes = [4, 16], strides = [1, 1]} : vector<4x48xf32> to vector<4x16xf32>
    %385 = arith.addf %383, %384 : vector<4x16xf32>
    %386 = arith.negf %385 : vector<4x16xf32>
    %387 = math.exp %386 : vector<4x16xf32>
    %cst_103 = arith.constant 1.000000e+00 : f32
    %388 = vector.broadcast %cst_103 : f32 to vector<4x16xf32>
    %389 = arith.addf %388, %387 : vector<4x16xf32>
    %390 = arith.divf %388, %389 : vector<4x16xf32>
    %391 = vector.extract_strided_slice %372 {offsets = [0, 32], sizes = [4, 16], strides = [1, 1]} : vector<4x48xf32> to vector<4x16xf32>
    %392 = vector.extract_strided_slice %374 {offsets = [0, 32], sizes = [4, 16], strides = [1, 1]} : vector<4x48xf32> to vector<4x16xf32>
    %393 = arith.mulf %382, %392 : vector<4x16xf32>
    %394 = arith.addf %391, %393 : vector<4x16xf32>
    %395 = math.tanh %394 : vector<4x16xf32>
    %cst_104 = arith.constant 1.000000e+00 : f32
    %396 = vector.broadcast %cst_104 : f32 to vector<4x16xf32>
    %397 = arith.subf %396, %390 : vector<4x16xf32>
    %398 = arith.mulf %397, %395 : vector<4x16xf32>
    %399 = arith.mulf %390, %266 : vector<4x16xf32>
    %400 = arith.addf %398, %399 : vector<4x16xf32>
    %cst_105 = arith.constant 1.000000e+00 : f32
    %401 = vector.broadcast %cst_105 : f32 to vector<4x1xf32>
    %402 = arith.subf %401, %325 : vector<4x1xf32>
    %403 = vector.broadcast %402 : vector<4x1xf32> to vector<4x16xf32>
    %404 = arith.mulf %266, %403 : vector<4x16xf32>
    %405 = vector.broadcast %325 : vector<4x1xf32> to vector<4x16xf32>
    %406 = arith.mulf %400, %405 : vector<4x16xf32>
    %407 = arith.addf %404, %406 : vector<4x16xf32>
    %408 = vector.extract_strided_slice %407 {offsets = [2, 0], sizes = [2, 16], strides = [1, 1]} : vector<4x16xf32> to vector<2x16xf32>
    %409 = vector.extract_strided_slice %407 {offsets = [0, 0], sizes = [2, 16], strides = [1, 1]} : vector<4x16xf32> to vector<2x16xf32>
    %410 = tpu.concatenate %408, %409 in 0 : vector<2x16xf32>, vector<2x16xf32> -> vector<4x16xf32>
    %411 = tpu.concatenate %368, %368 in 0 : vector<2x16xf32>, vector<2x16xf32> -> vector<4x16xf32>
    %412 = tpu.concatenate %410, %407, %411 in 1 : vector<4x16xf32>, vector<4x16xf32>, vector<4x16xf32> -> vector<4x48xf32>
    %cst_106 = arith.constant dense<0.000000e+00> : vector<4x48xf32>
    %413 = tpu.matmul %412, %7, %cst_106 {dimension_numbers = #tpu.dot_dimension_numbers<[1], [0], [0], [1], [0, 0, 1, 1], [], []>} : vector<4x48xf32>, vector<48x48xf32>, vector<4x48xf32> -> vector<4x48xf32>
    %414 = arith.addf %413, %29 : vector<4x48xf32>
    %cst_107 = arith.constant dense<0.000000e+00> : vector<4x48xf32>
    %415 = tpu.matmul %308, %9, %cst_107 {dimension_numbers = #tpu.dot_dimension_numbers<[1], [0], [0], [1], [0, 0, 1, 1], [], []>} : vector<4x16xf32>, vector<16x48xf32>, vector<4x48xf32> -> vector<4x48xf32>
    %416 = arith.addf %415, %33 : vector<4x48xf32>
    %417 = vector.extract_strided_slice %414 {offsets = [0, 0], sizes = [4, 16], strides = [1, 1]} : vector<4x48xf32> to vector<4x16xf32>
    %418 = vector.extract_strided_slice %416 {offsets = [0, 0], sizes = [4, 16], strides = [1, 1]} : vector<4x48xf32> to vector<4x16xf32>
    %419 = arith.addf %417, %418 : vector<4x16xf32>
    %420 = arith.negf %419 : vector<4x16xf32>
    %421 = math.exp %420 : vector<4x16xf32>
    %cst_108 = arith.constant 1.000000e+00 : f32
    %422 = vector.broadcast %cst_108 : f32 to vector<4x16xf32>
    %423 = arith.addf %422, %421 : vector<4x16xf32>
    %424 = arith.divf %422, %423 : vector<4x16xf32>
    %425 = vector.extract_strided_slice %414 {offsets = [0, 16], sizes = [4, 16], strides = [1, 1]} : vector<4x48xf32> to vector<4x16xf32>
    %426 = vector.extract_strided_slice %416 {offsets = [0, 16], sizes = [4, 16], strides = [1, 1]} : vector<4x48xf32> to vector<4x16xf32>
    %427 = arith.addf %425, %426 : vector<4x16xf32>
    %428 = arith.negf %427 : vector<4x16xf32>
    %429 = math.exp %428 : vector<4x16xf32>
    %cst_109 = arith.constant 1.000000e+00 : f32
    %430 = vector.broadcast %cst_109 : f32 to vector<4x16xf32>
    %431 = arith.addf %430, %429 : vector<4x16xf32>
    %432 = arith.divf %430, %431 : vector<4x16xf32>
    %433 = vector.extract_strided_slice %414 {offsets = [0, 32], sizes = [4, 16], strides = [1, 1]} : vector<4x48xf32> to vector<4x16xf32>
    %434 = vector.extract_strided_slice %416 {offsets = [0, 32], sizes = [4, 16], strides = [1, 1]} : vector<4x48xf32> to vector<4x16xf32>
    %435 = arith.mulf %424, %434 : vector<4x16xf32>
    %436 = arith.addf %433, %435 : vector<4x16xf32>
    %437 = math.tanh %436 : vector<4x16xf32>
    %cst_110 = arith.constant 1.000000e+00 : f32
    %438 = vector.broadcast %cst_110 : f32 to vector<4x16xf32>
    %439 = arith.subf %438, %432 : vector<4x16xf32>
    %440 = arith.mulf %439, %437 : vector<4x16xf32>
    %441 = arith.mulf %432, %308 : vector<4x16xf32>
    %442 = arith.addf %440, %441 : vector<4x16xf32>
    %cst_111 = arith.constant 1.000000e+00 : f32
    %443 = vector.broadcast %cst_111 : f32 to vector<4x1xf32>
    %444 = arith.subf %443, %325 : vector<4x1xf32>
    %445 = vector.broadcast %444 : vector<4x1xf32> to vector<4x16xf32>
    %446 = arith.mulf %308, %445 : vector<4x16xf32>
    %447 = vector.broadcast %325 : vector<4x1xf32> to vector<4x16xf32>
    %448 = arith.mulf %442, %447 : vector<4x16xf32>
    %449 = arith.addf %446, %448 : vector<4x16xf32>
    %450 = vector.extract_strided_slice %449 {offsets = [0, 0], sizes = [2, 16], strides = [1, 1]} : vector<4x16xf32> to vector<2x16xf32>
    %451 = vector.broadcast %323 : vector<2x1xf32> to vector<2x16xf32>
    %452 = arith.mulf %450, %451 : vector<2x16xf32>
    %453 = vector.extract_strided_slice %449 {offsets = [2, 0], sizes = [2, 16], strides = [1, 1]} : vector<4x16xf32> to vector<2x16xf32>
    %454 = vector.broadcast %324 : vector<2x1xf32> to vector<2x16xf32>
    %455 = arith.mulf %453, %454 : vector<2x16xf32>
    %456 = arith.addf %452, %455 : vector<2x16xf32>
    %c0_112 = arith.constant 0 : index
    %c2_113 = arith.constant 2 : index
    %c0_114 = arith.constant 0 : index
    %c0_115 = arith.constant 0 : index
    %457 = vector.load %arg14[%c0_112, %c2_113, %c0_114, %c0_115] : memref<1x8x2x16xf32, #tpu.memory_space<vmem>>, vector<1x1x2x16xf32>
    %458 = vector.shape_cast %457 : vector<1x1x2x16xf32> to vector<2x16xf32>
    %459 = vector.shape_cast %456 : vector<2x16xf32> to vector<1x1x2x16xf32>
    tpu.vector_store %arg14[%c0_112, %c2_113, %c0_114, %c0_115], %459 {strides = array<i32>} : memref<1x8x2x16xf32, #tpu.memory_space<vmem>>, vector<1x1x2x16xf32>,
    %c0_116 = arith.constant 0 : index
    %c3 = arith.constant 3 : index
    %c0_117 = arith.constant 0 : index
    %c0_118 = arith.constant 0 : index
    %460 = vector.load %arg1[%c0_116, %c3, %c0_117, %c0_118] : memref<1x8x2x16xf32, #tpu.memory_space<vmem>>, vector<1x1x2x16xf32>
    %461 = vector.shape_cast %460 : vector<1x1x2x16xf32> to vector<2x16xf32>
    %c0_119 = arith.constant 0 : index
    %c3_120 = arith.constant 3 : index
    %c0_121 = arith.constant 0 : index
    %c0_122 = arith.constant 0 : index
    %462 = vector.load %arg2[%c0_119, %c3_120, %c0_121, %c0_122] : memref<1x8x2x2xf32, #tpu.memory_space<vmem>>, vector<1x1x2x2xf32>
    %463 = vector.shape_cast %462 : vector<1x1x2x2xf32> to vector<2x2xf32>
    %464 = vector.extract_strided_slice %463 {offsets = [0, 0], sizes = [2, 1], strides = [1, 1]} : vector<2x2xf32> to vector<2x1xf32>
    %465 = vector.extract_strided_slice %463 {offsets = [0, 1], sizes = [2, 1], strides = [1, 1]} : vector<2x2xf32> to vector<2x1xf32>
    %466 = tpu.concatenate %464, %465 in 0 : vector<2x1xf32>, vector<2x1xf32> -> vector<4x1xf32>
    %467 = vector.extract_strided_slice %407 {offsets = [0, 0], sizes = [2, 16], strides = [1, 1]} : vector<4x16xf32> to vector<2x16xf32>
    %468 = vector.broadcast %464 : vector<2x1xf32> to vector<2x16xf32>
    %469 = arith.mulf %467, %468 : vector<2x16xf32>
    %470 = vector.extract_strided_slice %407 {offsets = [2, 0], sizes = [2, 16], strides = [1, 1]} : vector<4x16xf32> to vector<2x16xf32>
    %471 = vector.broadcast %465 : vector<2x1xf32> to vector<2x16xf32>
    %472 = arith.mulf %470, %471 : vector<2x16xf32>
    %473 = arith.addf %469, %472 : vector<2x16xf32>
    %474 = vector.extract_strided_slice %449 {offsets = [0, 0], sizes = [2, 16], strides = [1, 1]} : vector<4x16xf32> to vector<2x16xf32>
    %475 = vector.broadcast %464 : vector<2x1xf32> to vector<2x16xf32>
    %476 = arith.mulf %474, %475 : vector<2x16xf32>
    %477 = vector.extract_strided_slice %449 {offsets = [2, 0], sizes = [2, 16], strides = [1, 1]} : vector<4x16xf32> to vector<2x16xf32>
    %478 = vector.broadcast %465 : vector<2x1xf32> to vector<2x16xf32>
    %479 = arith.mulf %477, %478 : vector<2x16xf32>
    %480 = arith.addf %476, %479 : vector<2x16xf32>
    %481 = tpu.concatenate %461, %473, %480 in 1 : vector<2x16xf32>, vector<2x16xf32>, vector<2x16xf32> -> vector<2x48xf32>
    %cst_123 = arith.constant dense<0.000000e+00> : vector<2x48xf32>
    %482 = tpu.matmul %481, %1, %cst_123 {dimension_numbers = #tpu.dot_dimension_numbers<[1], [0], [0], [1], [0, 0, 1, 1], [], []>} : vector<2x48xf32>, vector<48x48xf32>, vector<2x48xf32> -> vector<2x48xf32>
    %483 = arith.addf %482, %13 : vector<2x48xf32>
    %484 = vector.extract_strided_slice %483 {offsets = [0, 0], sizes = [2, 16], strides = [1, 1]} : vector<2x48xf32> to vector<2x16xf32>
    %485 = vector.extract_strided_slice %17 {offsets = [0, 0], sizes = [2, 16], strides = [1, 1]} : vector<2x48xf32> to vector<2x16xf32>
    %486 = arith.addf %484, %485 : vector<2x16xf32>
    %487 = arith.negf %486 : vector<2x16xf32>
    %488 = math.exp %487 : vector<2x16xf32>
    %cst_124 = arith.constant 1.000000e+00 : f32
    %489 = vector.broadcast %cst_124 : f32 to vector<2x16xf32>
    %490 = arith.addf %489, %488 : vector<2x16xf32>
    %491 = arith.divf %489, %490 : vector<2x16xf32>
    %492 = vector.extract_strided_slice %483 {offsets = [0, 16], sizes = [2, 16], strides = [1, 1]} : vector<2x48xf32> to vector<2x16xf32>
    %493 = vector.extract_strided_slice %17 {offsets = [0, 16], sizes = [2, 16], strides = [1, 1]} : vector<2x48xf32> to vector<2x16xf32>
    %494 = arith.addf %492, %493 : vector<2x16xf32>
    %495 = arith.negf %494 : vector<2x16xf32>
    %496 = math.exp %495 : vector<2x16xf32>
    %cst_125 = arith.constant 1.000000e+00 : f32
    %497 = vector.broadcast %cst_125 : f32 to vector<2x16xf32>
    %498 = arith.addf %497, %496 : vector<2x16xf32>
    %499 = arith.divf %497, %498 : vector<2x16xf32>
    %500 = vector.extract_strided_slice %483 {offsets = [0, 32], sizes = [2, 16], strides = [1, 1]} : vector<2x48xf32> to vector<2x16xf32>
    %501 = vector.extract_strided_slice %17 {offsets = [0, 32], sizes = [2, 16], strides = [1, 1]} : vector<2x48xf32> to vector<2x16xf32>
    %502 = arith.mulf %491, %501 : vector<2x16xf32>
    %503 = arith.addf %500, %502 : vector<2x16xf32>
    %504 = math.tanh %503 : vector<2x16xf32>
    %cst_126 = arith.constant 1.000000e+00 : f32
    %505 = vector.broadcast %cst_126 : f32 to vector<2x16xf32>
    %506 = arith.subf %505, %499 : vector<2x16xf32>
    %507 = arith.mulf %506, %504 : vector<2x16xf32>
    %508 = arith.mulf %499, %34 : vector<2x16xf32>
    %509 = arith.addf %507, %508 : vector<2x16xf32>
    %510 = tpu.concatenate %461, %509, %480 in 1 : vector<2x16xf32>, vector<2x16xf32>, vector<2x16xf32> -> vector<2x48xf32>
    %cst_127 = arith.constant dense<0.000000e+00> : vector<2x48xf32>
    %511 = tpu.matmul %510, %3, %cst_127 {dimension_numbers = #tpu.dot_dimension_numbers<[1], [0], [0], [1], [0, 0, 1, 1], [], []>} : vector<2x48xf32>, vector<48x48xf32>, vector<2x48xf32> -> vector<2x48xf32>
    %512 = arith.addf %511, %21 : vector<2x48xf32>
    %513 = tpu.concatenate %512, %512 in 0 : vector<2x48xf32>, vector<2x48xf32> -> vector<4x48xf32>
    %cst_128 = arith.constant dense<0.000000e+00> : vector<4x48xf32>
    %514 = tpu.matmul %407, %5, %cst_128 {dimension_numbers = #tpu.dot_dimension_numbers<[1], [0], [0], [1], [0, 0, 1, 1], [], []>} : vector<4x16xf32>, vector<16x48xf32>, vector<4x48xf32> -> vector<4x48xf32>
    %515 = arith.addf %514, %25 : vector<4x48xf32>
    %516 = vector.extract_strided_slice %513 {offsets = [0, 0], sizes = [4, 16], strides = [1, 1]} : vector<4x48xf32> to vector<4x16xf32>
    %517 = vector.extract_strided_slice %515 {offsets = [0, 0], sizes = [4, 16], strides = [1, 1]} : vector<4x48xf32> to vector<4x16xf32>
    %518 = arith.addf %516, %517 : vector<4x16xf32>
    %519 = arith.negf %518 : vector<4x16xf32>
    %520 = math.exp %519 : vector<4x16xf32>
    %cst_129 = arith.constant 1.000000e+00 : f32
    %521 = vector.broadcast %cst_129 : f32 to vector<4x16xf32>
    %522 = arith.addf %521, %520 : vector<4x16xf32>
    %523 = arith.divf %521, %522 : vector<4x16xf32>
    %524 = vector.extract_strided_slice %513 {offsets = [0, 16], sizes = [4, 16], strides = [1, 1]} : vector<4x48xf32> to vector<4x16xf32>
    %525 = vector.extract_strided_slice %515 {offsets = [0, 16], sizes = [4, 16], strides = [1, 1]} : vector<4x48xf32> to vector<4x16xf32>
    %526 = arith.addf %524, %525 : vector<4x16xf32>
    %527 = arith.negf %526 : vector<4x16xf32>
    %528 = math.exp %527 : vector<4x16xf32>
    %cst_130 = arith.constant 1.000000e+00 : f32
    %529 = vector.broadcast %cst_130 : f32 to vector<4x16xf32>
    %530 = arith.addf %529, %528 : vector<4x16xf32>
    %531 = arith.divf %529, %530 : vector<4x16xf32>
    %532 = vector.extract_strided_slice %513 {offsets = [0, 32], sizes = [4, 16], strides = [1, 1]} : vector<4x48xf32> to vector<4x16xf32>
    %533 = vector.extract_strided_slice %515 {offsets = [0, 32], sizes = [4, 16], strides = [1, 1]} : vector<4x48xf32> to vector<4x16xf32>
    %534 = arith.mulf %523, %533 : vector<4x16xf32>
    %535 = arith.addf %532, %534 : vector<4x16xf32>
    %536 = math.tanh %535 : vector<4x16xf32>
    %cst_131 = arith.constant 1.000000e+00 : f32
    %537 = vector.broadcast %cst_131 : f32 to vector<4x16xf32>
    %538 = arith.subf %537, %531 : vector<4x16xf32>
    %539 = arith.mulf %538, %536 : vector<4x16xf32>
    %540 = arith.mulf %531, %407 : vector<4x16xf32>
    %541 = arith.addf %539, %540 : vector<4x16xf32>
    %cst_132 = arith.constant 1.000000e+00 : f32
    %542 = vector.broadcast %cst_132 : f32 to vector<4x1xf32>
    %543 = arith.subf %542, %466 : vector<4x1xf32>
    %544 = vector.broadcast %543 : vector<4x1xf32> to vector<4x16xf32>
    %545 = arith.mulf %407, %544 : vector<4x16xf32>
    %546 = vector.broadcast %466 : vector<4x1xf32> to vector<4x16xf32>
    %547 = arith.mulf %541, %546 : vector<4x16xf32>
    %548 = arith.addf %545, %547 : vector<4x16xf32>
    %549 = vector.extract_strided_slice %548 {offsets = [2, 0], sizes = [2, 16], strides = [1, 1]} : vector<4x16xf32> to vector<2x16xf32>
    %550 = vector.extract_strided_slice %548 {offsets = [0, 0], sizes = [2, 16], strides = [1, 1]} : vector<4x16xf32> to vector<2x16xf32>
    %551 = tpu.concatenate %549, %550 in 0 : vector<2x16xf32>, vector<2x16xf32> -> vector<4x16xf32>
    %552 = tpu.concatenate %509, %509 in 0 : vector<2x16xf32>, vector<2x16xf32> -> vector<4x16xf32>
    %553 = tpu.concatenate %551, %548, %552 in 1 : vector<4x16xf32>, vector<4x16xf32>, vector<4x16xf32> -> vector<4x48xf32>
    %cst_133 = arith.constant dense<0.000000e+00> : vector<4x48xf32>
    %554 = tpu.matmul %553, %7, %cst_133 {dimension_numbers = #tpu.dot_dimension_numbers<[1], [0], [0], [1], [0, 0, 1, 1], [], []>} : vector<4x48xf32>, vector<48x48xf32>, vector<4x48xf32> -> vector<4x48xf32>
    %555 = arith.addf %554, %29 : vector<4x48xf32>
    %cst_134 = arith.constant dense<0.000000e+00> : vector<4x48xf32>
    %556 = tpu.matmul %449, %9, %cst_134 {dimension_numbers = #tpu.dot_dimension_numbers<[1], [0], [0], [1], [0, 0, 1, 1], [], []>} : vector<4x16xf32>, vector<16x48xf32>, vector<4x48xf32> -> vector<4x48xf32>
    %557 = arith.addf %556, %33 : vector<4x48xf32>
    %558 = vector.extract_strided_slice %555 {offsets = [0, 0], sizes = [4, 16], strides = [1, 1]} : vector<4x48xf32> to vector<4x16xf32>
    %559 = vector.extract_strided_slice %557 {offsets = [0, 0], sizes = [4, 16], strides = [1, 1]} : vector<4x48xf32> to vector<4x16xf32>
    %560 = arith.addf %558, %559 : vector<4x16xf32>
    %561 = arith.negf %560 : vector<4x16xf32>
    %562 = math.exp %561 : vector<4x16xf32>
    %cst_135 = arith.constant 1.000000e+00 : f32
    %563 = vector.broadcast %cst_135 : f32 to vector<4x16xf32>
    %564 = arith.addf %563, %562 : vector<4x16xf32>
    %565 = arith.divf %563, %564 : vector<4x16xf32>
    %566 = vector.extract_strided_slice %555 {offsets = [0, 16], sizes = [4, 16], strides = [1, 1]} : vector<4x48xf32> to vector<4x16xf32>
    %567 = vector.extract_strided_slice %557 {offsets = [0, 16], sizes = [4, 16], strides = [1, 1]} : vector<4x48xf32> to vector<4x16xf32>
    %568 = arith.addf %566, %567 : vector<4x16xf32>
    %569 = arith.negf %568 : vector<4x16xf32>
    %570 = math.exp %569 : vector<4x16xf32>
    %cst_136 = arith.constant 1.000000e+00 : f32
    %571 = vector.broadcast %cst_136 : f32 to vector<4x16xf32>
    %572 = arith.addf %571, %570 : vector<4x16xf32>
    %573 = arith.divf %571, %572 : vector<4x16xf32>
    %574 = vector.extract_strided_slice %555 {offsets = [0, 32], sizes = [4, 16], strides = [1, 1]} : vector<4x48xf32> to vector<4x16xf32>
    %575 = vector.extract_strided_slice %557 {offsets = [0, 32], sizes = [4, 16], strides = [1, 1]} : vector<4x48xf32> to vector<4x16xf32>
    %576 = arith.mulf %565, %575 : vector<4x16xf32>
    %577 = arith.addf %574, %576 : vector<4x16xf32>
    %578 = math.tanh %577 : vector<4x16xf32>
    %cst_137 = arith.constant 1.000000e+00 : f32
    %579 = vector.broadcast %cst_137 : f32 to vector<4x16xf32>
    %580 = arith.subf %579, %573 : vector<4x16xf32>
    %581 = arith.mulf %580, %578 : vector<4x16xf32>
    %582 = arith.mulf %573, %449 : vector<4x16xf32>
    %583 = arith.addf %581, %582 : vector<4x16xf32>
    %cst_138 = arith.constant 1.000000e+00 : f32
    %584 = vector.broadcast %cst_138 : f32 to vector<4x1xf32>
    %585 = arith.subf %584, %466 : vector<4x1xf32>
    %586 = vector.broadcast %585 : vector<4x1xf32> to vector<4x16xf32>
    %587 = arith.mulf %449, %586 : vector<4x16xf32>
    %588 = vector.broadcast %466 : vector<4x1xf32> to vector<4x16xf32>
    %589 = arith.mulf %583, %588 : vector<4x16xf32>
    %590 = arith.addf %587, %589 : vector<4x16xf32>
    %591 = vector.extract_strided_slice %590 {offsets = [0, 0], sizes = [2, 16], strides = [1, 1]} : vector<4x16xf32> to vector<2x16xf32>
    %592 = vector.broadcast %464 : vector<2x1xf32> to vector<2x16xf32>
    %593 = arith.mulf %591, %592 : vector<2x16xf32>
    %594 = vector.extract_strided_slice %590 {offsets = [2, 0], sizes = [2, 16], strides = [1, 1]} : vector<4x16xf32> to vector<2x16xf32>
    %595 = vector.broadcast %465 : vector<2x1xf32> to vector<2x16xf32>
    %596 = arith.mulf %594, %595 : vector<2x16xf32>
    %597 = arith.addf %593, %596 : vector<2x16xf32>
    %c0_139 = arith.constant 0 : index
    %c3_140 = arith.constant 3 : index
    %c0_141 = arith.constant 0 : index
    %c0_142 = arith.constant 0 : index
    %598 = vector.load %arg14[%c0_139, %c3_140, %c0_141, %c0_142] : memref<1x8x2x16xf32, #tpu.memory_space<vmem>>, vector<1x1x2x16xf32>
    %599 = vector.shape_cast %598 : vector<1x1x2x16xf32> to vector<2x16xf32>
    %600 = vector.shape_cast %597 : vector<2x16xf32> to vector<1x1x2x16xf32>
    tpu.vector_store %arg14[%c0_139, %c3_140, %c0_141, %c0_142], %600 {strides = array<i32>} : memref<1x8x2x16xf32, #tpu.memory_space<vmem>>, vector<1x1x2x16xf32>,
    %c0_143 = arith.constant 0 : index
    %c4 = arith.constant 4 : index
    %c0_144 = arith.constant 0 : index
    %c0_145 = arith.constant 0 : index
    %601 = vector.load %arg1[%c0_143, %c4, %c0_144, %c0_145] : memref<1x8x2x16xf32, #tpu.memory_space<vmem>>, vector<1x1x2x16xf32>
    %602 = vector.shape_cast %601 : vector<1x1x2x16xf32> to vector<2x16xf32>
    %c0_146 = arith.constant 0 : index
    %c4_147 = arith.constant 4 : index
    %c0_148 = arith.constant 0 : index
    %c0_149 = arith.constant 0 : index
    %603 = vector.load %arg2[%c0_146, %c4_147, %c0_148, %c0_149] : memref<1x8x2x2xf32, #tpu.memory_space<vmem>>, vector<1x1x2x2xf32>
    %604 = vector.shape_cast %603 : vector<1x1x2x2xf32> to vector<2x2xf32>
    %605 = vector.extract_strided_slice %604 {offsets = [0, 0], sizes = [2, 1], strides = [1, 1]} : vector<2x2xf32> to vector<2x1xf32>
    %606 = vector.extract_strided_slice %604 {offsets = [0, 1], sizes = [2, 1], strides = [1, 1]} : vector<2x2xf32> to vector<2x1xf32>
    %607 = tpu.concatenate %605, %606 in 0 : vector<2x1xf32>, vector<2x1xf32> -> vector<4x1xf32>
    %608 = vector.extract_strided_slice %548 {offsets = [0, 0], sizes = [2, 16], strides = [1, 1]} : vector<4x16xf32> to vector<2x16xf32>
    %609 = vector.broadcast %605 : vector<2x1xf32> to vector<2x16xf32>
    %610 = arith.mulf %608, %609 : vector<2x16xf32>
    %611 = vector.extract_strided_slice %548 {offsets = [2, 0], sizes = [2, 16], strides = [1, 1]} : vector<4x16xf32> to vector<2x16xf32>
    %612 = vector.broadcast %606 : vector<2x1xf32> to vector<2x16xf32>
    %613 = arith.mulf %611, %612 : vector<2x16xf32>
    %614 = arith.addf %610, %613 : vector<2x16xf32>
    %615 = vector.extract_strided_slice %590 {offsets = [0, 0], sizes = [2, 16], strides = [1, 1]} : vector<4x16xf32> to vector<2x16xf32>
    %616 = vector.broadcast %605 : vector<2x1xf32> to vector<2x16xf32>
    %617 = arith.mulf %615, %616 : vector<2x16xf32>
    %618 = vector.extract_strided_slice %590 {offsets = [2, 0], sizes = [2, 16], strides = [1, 1]} : vector<4x16xf32> to vector<2x16xf32>
    %619 = vector.broadcast %606 : vector<2x1xf32> to vector<2x16xf32>
    %620 = arith.mulf %618, %619 : vector<2x16xf32>
    %621 = arith.addf %617, %620 : vector<2x16xf32>
    %622 = tpu.concatenate %602, %614, %621 in 1 : vector<2x16xf32>, vector<2x16xf32>, vector<2x16xf32> -> vector<2x48xf32>
    %cst_150 = arith.constant dense<0.000000e+00> : vector<2x48xf32>
    %623 = tpu.matmul %622, %1, %cst_150 {dimension_numbers = #tpu.dot_dimension_numbers<[1], [0], [0], [1], [0, 0, 1, 1], [], []>} : vector<2x48xf32>, vector<48x48xf32>, vector<2x48xf32> -> vector<2x48xf32>
    %624 = arith.addf %623, %13 : vector<2x48xf32>
    %625 = vector.extract_strided_slice %624 {offsets = [0, 0], sizes = [2, 16], strides = [1, 1]} : vector<2x48xf32> to vector<2x16xf32>
    %626 = vector.extract_strided_slice %17 {offsets = [0, 0], sizes = [2, 16], strides = [1, 1]} : vector<2x48xf32> to vector<2x16xf32>
    %627 = arith.addf %625, %626 : vector<2x16xf32>
    %628 = arith.negf %627 : vector<2x16xf32>
    %629 = math.exp %628 : vector<2x16xf32>
    %cst_151 = arith.constant 1.000000e+00 : f32
    %630 = vector.broadcast %cst_151 : f32 to vector<2x16xf32>
    %631 = arith.addf %630, %629 : vector<2x16xf32>
    %632 = arith.divf %630, %631 : vector<2x16xf32>
    %633 = vector.extract_strided_slice %624 {offsets = [0, 16], sizes = [2, 16], strides = [1, 1]} : vector<2x48xf32> to vector<2x16xf32>
    %634 = vector.extract_strided_slice %17 {offsets = [0, 16], sizes = [2, 16], strides = [1, 1]} : vector<2x48xf32> to vector<2x16xf32>
    %635 = arith.addf %633, %634 : vector<2x16xf32>
    %636 = arith.negf %635 : vector<2x16xf32>
    %637 = math.exp %636 : vector<2x16xf32>
    %cst_152 = arith.constant 1.000000e+00 : f32
    %638 = vector.broadcast %cst_152 : f32 to vector<2x16xf32>
    %639 = arith.addf %638, %637 : vector<2x16xf32>
    %640 = arith.divf %638, %639 : vector<2x16xf32>
    %641 = vector.extract_strided_slice %624 {offsets = [0, 32], sizes = [2, 16], strides = [1, 1]} : vector<2x48xf32> to vector<2x16xf32>
    %642 = vector.extract_strided_slice %17 {offsets = [0, 32], sizes = [2, 16], strides = [1, 1]} : vector<2x48xf32> to vector<2x16xf32>
    %643 = arith.mulf %632, %642 : vector<2x16xf32>
    %644 = arith.addf %641, %643 : vector<2x16xf32>
    %645 = math.tanh %644 : vector<2x16xf32>
    %cst_153 = arith.constant 1.000000e+00 : f32
    %646 = vector.broadcast %cst_153 : f32 to vector<2x16xf32>
    %647 = arith.subf %646, %640 : vector<2x16xf32>
    %648 = arith.mulf %647, %645 : vector<2x16xf32>
    %649 = arith.mulf %640, %34 : vector<2x16xf32>
    %650 = arith.addf %648, %649 : vector<2x16xf32>
    %651 = tpu.concatenate %602, %650, %621 in 1 : vector<2x16xf32>, vector<2x16xf32>, vector<2x16xf32> -> vector<2x48xf32>
    %cst_154 = arith.constant dense<0.000000e+00> : vector<2x48xf32>
    %652 = tpu.matmul %651, %3, %cst_154 {dimension_numbers = #tpu.dot_dimension_numbers<[1], [0], [0], [1], [0, 0, 1, 1], [], []>} : vector<2x48xf32>, vector<48x48xf32>, vector<2x48xf32> -> vector<2x48xf32>
    %653 = arith.addf %652, %21 : vector<2x48xf32>
    %654 = tpu.concatenate %653, %653 in 0 : vector<2x48xf32>, vector<2x48xf32> -> vector<4x48xf32>
    %cst_155 = arith.constant dense<0.000000e+00> : vector<4x48xf32>
    %655 = tpu.matmul %548, %5, %cst_155 {dimension_numbers = #tpu.dot_dimension_numbers<[1], [0], [0], [1], [0, 0, 1, 1], [], []>} : vector<4x16xf32>, vector<16x48xf32>, vector<4x48xf32> -> vector<4x48xf32>
    %656 = arith.addf %655, %25 : vector<4x48xf32>
    %657 = vector.extract_strided_slice %654 {offsets = [0, 0], sizes = [4, 16], strides = [1, 1]} : vector<4x48xf32> to vector<4x16xf32>
    %658 = vector.extract_strided_slice %656 {offsets = [0, 0], sizes = [4, 16], strides = [1, 1]} : vector<4x48xf32> to vector<4x16xf32>
    %659 = arith.addf %657, %658 : vector<4x16xf32>
    %660 = arith.negf %659 : vector<4x16xf32>
    %661 = math.exp %660 : vector<4x16xf32>
    %cst_156 = arith.constant 1.000000e+00 : f32
    %662 = vector.broadcast %cst_156 : f32 to vector<4x16xf32>
    %663 = arith.addf %662, %661 : vector<4x16xf32>
    %664 = arith.divf %662, %663 : vector<4x16xf32>
    %665 = vector.extract_strided_slice %654 {offsets = [0, 16], sizes = [4, 16], strides = [1, 1]} : vector<4x48xf32> to vector<4x16xf32>
    %666 = vector.extract_strided_slice %656 {offsets = [0, 16], sizes = [4, 16], strides = [1, 1]} : vector<4x48xf32> to vector<4x16xf32>
    %667 = arith.addf %665, %666 : vector<4x16xf32>
    %668 = arith.negf %667 : vector<4x16xf32>
    %669 = math.exp %668 : vector<4x16xf32>
    %cst_157 = arith.constant 1.000000e+00 : f32
    %670 = vector.broadcast %cst_157 : f32 to vector<4x16xf32>
    %671 = arith.addf %670, %669 : vector<4x16xf32>
    %672 = arith.divf %670, %671 : vector<4x16xf32>
    %673 = vector.extract_strided_slice %654 {offsets = [0, 32], sizes = [4, 16], strides = [1, 1]} : vector<4x48xf32> to vector<4x16xf32>
    %674 = vector.extract_strided_slice %656 {offsets = [0, 32], sizes = [4, 16], strides = [1, 1]} : vector<4x48xf32> to vector<4x16xf32>
    %675 = arith.mulf %664, %674 : vector<4x16xf32>
    %676 = arith.addf %673, %675 : vector<4x16xf32>
    %677 = math.tanh %676 : vector<4x16xf32>
    %cst_158 = arith.constant 1.000000e+00 : f32
    %678 = vector.broadcast %cst_158 : f32 to vector<4x16xf32>
    %679 = arith.subf %678, %672 : vector<4x16xf32>
    %680 = arith.mulf %679, %677 : vector<4x16xf32>
    %681 = arith.mulf %672, %548 : vector<4x16xf32>
    %682 = arith.addf %680, %681 : vector<4x16xf32>
    %cst_159 = arith.constant 1.000000e+00 : f32
    %683 = vector.broadcast %cst_159 : f32 to vector<4x1xf32>
    %684 = arith.subf %683, %607 : vector<4x1xf32>
    %685 = vector.broadcast %684 : vector<4x1xf32> to vector<4x16xf32>
    %686 = arith.mulf %548, %685 : vector<4x16xf32>
    %687 = vector.broadcast %607 : vector<4x1xf32> to vector<4x16xf32>
    %688 = arith.mulf %682, %687 : vector<4x16xf32>
    %689 = arith.addf %686, %688 : vector<4x16xf32>
    %690 = vector.extract_strided_slice %689 {offsets = [2, 0], sizes = [2, 16], strides = [1, 1]} : vector<4x16xf32> to vector<2x16xf32>
    %691 = vector.extract_strided_slice %689 {offsets = [0, 0], sizes = [2, 16], strides = [1, 1]} : vector<4x16xf32> to vector<2x16xf32>
    %692 = tpu.concatenate %690, %691 in 0 : vector<2x16xf32>, vector<2x16xf32> -> vector<4x16xf32>
    %693 = tpu.concatenate %650, %650 in 0 : vector<2x16xf32>, vector<2x16xf32> -> vector<4x16xf32>
    %694 = tpu.concatenate %692, %689, %693 in 1 : vector<4x16xf32>, vector<4x16xf32>, vector<4x16xf32> -> vector<4x48xf32>
    %cst_160 = arith.constant dense<0.000000e+00> : vector<4x48xf32>
    %695 = tpu.matmul %694, %7, %cst_160 {dimension_numbers = #tpu.dot_dimension_numbers<[1], [0], [0], [1], [0, 0, 1, 1], [], []>} : vector<4x48xf32>, vector<48x48xf32>, vector<4x48xf32> -> vector<4x48xf32>
    %696 = arith.addf %695, %29 : vector<4x48xf32>
    %cst_161 = arith.constant dense<0.000000e+00> : vector<4x48xf32>
    %697 = tpu.matmul %590, %9, %cst_161 {dimension_numbers = #tpu.dot_dimension_numbers<[1], [0], [0], [1], [0, 0, 1, 1], [], []>} : vector<4x16xf32>, vector<16x48xf32>, vector<4x48xf32> -> vector<4x48xf32>
    %698 = arith.addf %697, %33 : vector<4x48xf32>
    %699 = vector.extract_strided_slice %696 {offsets = [0, 0], sizes = [4, 16], strides = [1, 1]} : vector<4x48xf32> to vector<4x16xf32>
    %700 = vector.extract_strided_slice %698 {offsets = [0, 0], sizes = [4, 16], strides = [1, 1]} : vector<4x48xf32> to vector<4x16xf32>
    %701 = arith.addf %699, %700 : vector<4x16xf32>
    %702 = arith.negf %701 : vector<4x16xf32>
    %703 = math.exp %702 : vector<4x16xf32>
    %cst_162 = arith.constant 1.000000e+00 : f32
    %704 = vector.broadcast %cst_162 : f32 to vector<4x16xf32>
    %705 = arith.addf %704, %703 : vector<4x16xf32>
    %706 = arith.divf %704, %705 : vector<4x16xf32>
    %707 = vector.extract_strided_slice %696 {offsets = [0, 16], sizes = [4, 16], strides = [1, 1]} : vector<4x48xf32> to vector<4x16xf32>
    %708 = vector.extract_strided_slice %698 {offsets = [0, 16], sizes = [4, 16], strides = [1, 1]} : vector<4x48xf32> to vector<4x16xf32>
    %709 = arith.addf %707, %708 : vector<4x16xf32>
    %710 = arith.negf %709 : vector<4x16xf32>
    %711 = math.exp %710 : vector<4x16xf32>
    %cst_163 = arith.constant 1.000000e+00 : f32
    %712 = vector.broadcast %cst_163 : f32 to vector<4x16xf32>
    %713 = arith.addf %712, %711 : vector<4x16xf32>
    %714 = arith.divf %712, %713 : vector<4x16xf32>
    %715 = vector.extract_strided_slice %696 {offsets = [0, 32], sizes = [4, 16], strides = [1, 1]} : vector<4x48xf32> to vector<4x16xf32>
    %716 = vector.extract_strided_slice %698 {offsets = [0, 32], sizes = [4, 16], strides = [1, 1]} : vector<4x48xf32> to vector<4x16xf32>
    %717 = arith.mulf %706, %716 : vector<4x16xf32>
    %718 = arith.addf %715, %717 : vector<4x16xf32>
    %719 = math.tanh %718 : vector<4x16xf32>
    %cst_164 = arith.constant 1.000000e+00 : f32
    %720 = vector.broadcast %cst_164 : f32 to vector<4x16xf32>
    %721 = arith.subf %720, %714 : vector<4x16xf32>
    %722 = arith.mulf %721, %719 : vector<4x16xf32>
    %723 = arith.mulf %714, %590 : vector<4x16xf32>
    %724 = arith.addf %722, %723 : vector<4x16xf32>
    %cst_165 = arith.constant 1.000000e+00 : f32
    %725 = vector.broadcast %cst_165 : f32 to vector<4x1xf32>
    %726 = arith.subf %725, %607 : vector<4x1xf32>
    %727 = vector.broadcast %726 : vector<4x1xf32> to vector<4x16xf32>
    %728 = arith.mulf %590, %727 : vector<4x16xf32>
    %729 = vector.broadcast %607 : vector<4x1xf32> to vector<4x16xf32>
    %730 = arith.mulf %724, %729 : vector<4x16xf32>
    %731 = arith.addf %728, %730 : vector<4x16xf32>
    %732 = vector.extract_strided_slice %731 {offsets = [0, 0], sizes = [2, 16], strides = [1, 1]} : vector<4x16xf32> to vector<2x16xf32>
    %733 = vector.broadcast %605 : vector<2x1xf32> to vector<2x16xf32>
    %734 = arith.mulf %732, %733 : vector<2x16xf32>
    %735 = vector.extract_strided_slice %731 {offsets = [2, 0], sizes = [2, 16], strides = [1, 1]} : vector<4x16xf32> to vector<2x16xf32>
    %736 = vector.broadcast %606 : vector<2x1xf32> to vector<2x16xf32>
    %737 = arith.mulf %735, %736 : vector<2x16xf32>
    %738 = arith.addf %734, %737 : vector<2x16xf32>
    %c0_166 = arith.constant 0 : index
    %c4_167 = arith.constant 4 : index
    %c0_168 = arith.constant 0 : index
    %c0_169 = arith.constant 0 : index
    %739 = vector.load %arg14[%c0_166, %c4_167, %c0_168, %c0_169] : memref<1x8x2x16xf32, #tpu.memory_space<vmem>>, vector<1x1x2x16xf32>
    %740 = vector.shape_cast %739 : vector<1x1x2x16xf32> to vector<2x16xf32>
    %741 = vector.shape_cast %738 : vector<2x16xf32> to vector<1x1x2x16xf32>
    tpu.vector_store %arg14[%c0_166, %c4_167, %c0_168, %c0_169], %741 {strides = array<i32>} : memref<1x8x2x16xf32, #tpu.memory_space<vmem>>, vector<1x1x2x16xf32>,
    %c0_170 = arith.constant 0 : index
    %c5 = arith.constant 5 : index
    %c0_171 = arith.constant 0 : index
    %c0_172 = arith.constant 0 : index
    %742 = vector.load %arg1[%c0_170, %c5, %c0_171, %c0_172] : memref<1x8x2x16xf32, #tpu.memory_space<vmem>>, vector<1x1x2x16xf32>
    %743 = vector.shape_cast %742 : vector<1x1x2x16xf32> to vector<2x16xf32>
    %c0_173 = arith.constant 0 : index
    %c5_174 = arith.constant 5 : index
    %c0_175 = arith.constant 0 : index
    %c0_176 = arith.constant 0 : index
    %744 = vector.load %arg2[%c0_173, %c5_174, %c0_175, %c0_176] : memref<1x8x2x2xf32, #tpu.memory_space<vmem>>, vector<1x1x2x2xf32>
    %745 = vector.shape_cast %744 : vector<1x1x2x2xf32> to vector<2x2xf32>
    %746 = vector.extract_strided_slice %745 {offsets = [0, 0], sizes = [2, 1], strides = [1, 1]} : vector<2x2xf32> to vector<2x1xf32>
    %747 = vector.extract_strided_slice %745 {offsets = [0, 1], sizes = [2, 1], strides = [1, 1]} : vector<2x2xf32> to vector<2x1xf32>
    %748 = tpu.concatenate %746, %747 in 0 : vector<2x1xf32>, vector<2x1xf32> -> vector<4x1xf32>
    %749 = vector.extract_strided_slice %689 {offsets = [0, 0], sizes = [2, 16], strides = [1, 1]} : vector<4x16xf32> to vector<2x16xf32>
    %750 = vector.broadcast %746 : vector<2x1xf32> to vector<2x16xf32>
    %751 = arith.mulf %749, %750 : vector<2x16xf32>
    %752 = vector.extract_strided_slice %689 {offsets = [2, 0], sizes = [2, 16], strides = [1, 1]} : vector<4x16xf32> to vector<2x16xf32>
    %753 = vector.broadcast %747 : vector<2x1xf32> to vector<2x16xf32>
    %754 = arith.mulf %752, %753 : vector<2x16xf32>
    %755 = arith.addf %751, %754 : vector<2x16xf32>
    %756 = vector.extract_strided_slice %731 {offsets = [0, 0], sizes = [2, 16], strides = [1, 1]} : vector<4x16xf32> to vector<2x16xf32>
    %757 = vector.broadcast %746 : vector<2x1xf32> to vector<2x16xf32>
    %758 = arith.mulf %756, %757 : vector<2x16xf32>
    %759 = vector.extract_strided_slice %731 {offsets = [2, 0], sizes = [2, 16], strides = [1, 1]} : vector<4x16xf32> to vector<2x16xf32>
    %760 = vector.broadcast %747 : vector<2x1xf32> to vector<2x16xf32>
    %761 = arith.mulf %759, %760 : vector<2x16xf32>
    %762 = arith.addf %758, %761 : vector<2x16xf32>
    %763 = tpu.concatenate %743, %755, %762 in 1 : vector<2x16xf32>, vector<2x16xf32>, vector<2x16xf32> -> vector<2x48xf32>
    %cst_177 = arith.constant dense<0.000000e+00> : vector<2x48xf32>
    %764 = tpu.matmul %763, %1, %cst_177 {dimension_numbers = #tpu.dot_dimension_numbers<[1], [0], [0], [1], [0, 0, 1, 1], [], []>} : vector<2x48xf32>, vector<48x48xf32>, vector<2x48xf32> -> vector<2x48xf32>
    %765 = arith.addf %764, %13 : vector<2x48xf32>
    %766 = vector.extract_strided_slice %765 {offsets = [0, 0], sizes = [2, 16], strides = [1, 1]} : vector<2x48xf32> to vector<2x16xf32>
    %767 = vector.extract_strided_slice %17 {offsets = [0, 0], sizes = [2, 16], strides = [1, 1]} : vector<2x48xf32> to vector<2x16xf32>
    %768 = arith.addf %766, %767 : vector<2x16xf32>
    %769 = arith.negf %768 : vector<2x16xf32>
    %770 = math.exp %769 : vector<2x16xf32>
    %cst_178 = arith.constant 1.000000e+00 : f32
    %771 = vector.broadcast %cst_178 : f32 to vector<2x16xf32>
    %772 = arith.addf %771, %770 : vector<2x16xf32>
    %773 = arith.divf %771, %772 : vector<2x16xf32>
    %774 = vector.extract_strided_slice %765 {offsets = [0, 16], sizes = [2, 16], strides = [1, 1]} : vector<2x48xf32> to vector<2x16xf32>
    %775 = vector.extract_strided_slice %17 {offsets = [0, 16], sizes = [2, 16], strides = [1, 1]} : vector<2x48xf32> to vector<2x16xf32>
    %776 = arith.addf %774, %775 : vector<2x16xf32>
    %777 = arith.negf %776 : vector<2x16xf32>
    %778 = math.exp %777 : vector<2x16xf32>
    %cst_179 = arith.constant 1.000000e+00 : f32
    %779 = vector.broadcast %cst_179 : f32 to vector<2x16xf32>
    %780 = arith.addf %779, %778 : vector<2x16xf32>
    %781 = arith.divf %779, %780 : vector<2x16xf32>
    %782 = vector.extract_strided_slice %765 {offsets = [0, 32], sizes = [2, 16], strides = [1, 1]} : vector<2x48xf32> to vector<2x16xf32>
    %783 = vector.extract_strided_slice %17 {offsets = [0, 32], sizes = [2, 16], strides = [1, 1]} : vector<2x48xf32> to vector<2x16xf32>
    %784 = arith.mulf %773, %783 : vector<2x16xf32>
    %785 = arith.addf %782, %784 : vector<2x16xf32>
    %786 = math.tanh %785 : vector<2x16xf32>
    %cst_180 = arith.constant 1.000000e+00 : f32
    %787 = vector.broadcast %cst_180 : f32 to vector<2x16xf32>
    %788 = arith.subf %787, %781 : vector<2x16xf32>
    %789 = arith.mulf %788, %786 : vector<2x16xf32>
    %790 = arith.mulf %781, %34 : vector<2x16xf32>
    %791 = arith.addf %789, %790 : vector<2x16xf32>
    %792 = tpu.concatenate %743, %791, %762 in 1 : vector<2x16xf32>, vector<2x16xf32>, vector<2x16xf32> -> vector<2x48xf32>
    %cst_181 = arith.constant dense<0.000000e+00> : vector<2x48xf32>
    %793 = tpu.matmul %792, %3, %cst_181 {dimension_numbers = #tpu.dot_dimension_numbers<[1], [0], [0], [1], [0, 0, 1, 1], [], []>} : vector<2x48xf32>, vector<48x48xf32>, vector<2x48xf32> -> vector<2x48xf32>
    %794 = arith.addf %793, %21 : vector<2x48xf32>
    %795 = tpu.concatenate %794, %794 in 0 : vector<2x48xf32>, vector<2x48xf32> -> vector<4x48xf32>
    %cst_182 = arith.constant dense<0.000000e+00> : vector<4x48xf32>
    %796 = tpu.matmul %689, %5, %cst_182 {dimension_numbers = #tpu.dot_dimension_numbers<[1], [0], [0], [1], [0, 0, 1, 1], [], []>} : vector<4x16xf32>, vector<16x48xf32>, vector<4x48xf32> -> vector<4x48xf32>
    %797 = arith.addf %796, %25 : vector<4x48xf32>
    %798 = vector.extract_strided_slice %795 {offsets = [0, 0], sizes = [4, 16], strides = [1, 1]} : vector<4x48xf32> to vector<4x16xf32>
    %799 = vector.extract_strided_slice %797 {offsets = [0, 0], sizes = [4, 16], strides = [1, 1]} : vector<4x48xf32> to vector<4x16xf32>
    %800 = arith.addf %798, %799 : vector<4x16xf32>
    %801 = arith.negf %800 : vector<4x16xf32>
    %802 = math.exp %801 : vector<4x16xf32>
    %cst_183 = arith.constant 1.000000e+00 : f32
    %803 = vector.broadcast %cst_183 : f32 to vector<4x16xf32>
    %804 = arith.addf %803, %802 : vector<4x16xf32>
    %805 = arith.divf %803, %804 : vector<4x16xf32>
    %806 = vector.extract_strided_slice %795 {offsets = [0, 16], sizes = [4, 16], strides = [1, 1]} : vector<4x48xf32> to vector<4x16xf32>
    %807 = vector.extract_strided_slice %797 {offsets = [0, 16], sizes = [4, 16], strides = [1, 1]} : vector<4x48xf32> to vector<4x16xf32>
    %808 = arith.addf %806, %807 : vector<4x16xf32>
    %809 = arith.negf %808 : vector<4x16xf32>
    %810 = math.exp %809 : vector<4x16xf32>
    %cst_184 = arith.constant 1.000000e+00 : f32
    %811 = vector.broadcast %cst_184 : f32 to vector<4x16xf32>
    %812 = arith.addf %811, %810 : vector<4x16xf32>
    %813 = arith.divf %811, %812 : vector<4x16xf32>
    %814 = vector.extract_strided_slice %795 {offsets = [0, 32], sizes = [4, 16], strides = [1, 1]} : vector<4x48xf32> to vector<4x16xf32>
    %815 = vector.extract_strided_slice %797 {offsets = [0, 32], sizes = [4, 16], strides = [1, 1]} : vector<4x48xf32> to vector<4x16xf32>
    %816 = arith.mulf %805, %815 : vector<4x16xf32>
    %817 = arith.addf %814, %816 : vector<4x16xf32>
    %818 = math.tanh %817 : vector<4x16xf32>
    %cst_185 = arith.constant 1.000000e+00 : f32
    %819 = vector.broadcast %cst_185 : f32 to vector<4x16xf32>
    %820 = arith.subf %819, %813 : vector<4x16xf32>
    %821 = arith.mulf %820, %818 : vector<4x16xf32>
    %822 = arith.mulf %813, %689 : vector<4x16xf32>
    %823 = arith.addf %821, %822 : vector<4x16xf32>
    %cst_186 = arith.constant 1.000000e+00 : f32
    %824 = vector.broadcast %cst_186 : f32 to vector<4x1xf32>
    %825 = arith.subf %824, %748 : vector<4x1xf32>
    %826 = vector.broadcast %825 : vector<4x1xf32> to vector<4x16xf32>
    %827 = arith.mulf %689, %826 : vector<4x16xf32>
    %828 = vector.broadcast %748 : vector<4x1xf32> to vector<4x16xf32>
    %829 = arith.mulf %823, %828 : vector<4x16xf32>
    %830 = arith.addf %827, %829 : vector<4x16xf32>
    %831 = vector.extract_strided_slice %830 {offsets = [2, 0], sizes = [2, 16], strides = [1, 1]} : vector<4x16xf32> to vector<2x16xf32>
    %832 = vector.extract_strided_slice %830 {offsets = [0, 0], sizes = [2, 16], strides = [1, 1]} : vector<4x16xf32> to vector<2x16xf32>
    %833 = tpu.concatenate %831, %832 in 0 : vector<2x16xf32>, vector<2x16xf32> -> vector<4x16xf32>
    %834 = tpu.concatenate %791, %791 in 0 : vector<2x16xf32>, vector<2x16xf32> -> vector<4x16xf32>
    %835 = tpu.concatenate %833, %830, %834 in 1 : vector<4x16xf32>, vector<4x16xf32>, vector<4x16xf32> -> vector<4x48xf32>
    %cst_187 = arith.constant dense<0.000000e+00> : vector<4x48xf32>
    %836 = tpu.matmul %835, %7, %cst_187 {dimension_numbers = #tpu.dot_dimension_numbers<[1], [0], [0], [1], [0, 0, 1, 1], [], []>} : vector<4x48xf32>, vector<48x48xf32>, vector<4x48xf32> -> vector<4x48xf32>
    %837 = arith.addf %836, %29 : vector<4x48xf32>
    %cst_188 = arith.constant dense<0.000000e+00> : vector<4x48xf32>
    %838 = tpu.matmul %731, %9, %cst_188 {dimension_numbers = #tpu.dot_dimension_numbers<[1], [0], [0], [1], [0, 0, 1, 1], [], []>} : vector<4x16xf32>, vector<16x48xf32>, vector<4x48xf32> -> vector<4x48xf32>
    %839 = arith.addf %838, %33 : vector<4x48xf32>
    %840 = vector.extract_strided_slice %837 {offsets = [0, 0], sizes = [4, 16], strides = [1, 1]} : vector<4x48xf32> to vector<4x16xf32>
    %841 = vector.extract_strided_slice %839 {offsets = [0, 0], sizes = [4, 16], strides = [1, 1]} : vector<4x48xf32> to vector<4x16xf32>
    %842 = arith.addf %840, %841 : vector<4x16xf32>
    %843 = arith.negf %842 : vector<4x16xf32>
    %844 = math.exp %843 : vector<4x16xf32>
    %cst_189 = arith.constant 1.000000e+00 : f32
    %845 = vector.broadcast %cst_189 : f32 to vector<4x16xf32>
    %846 = arith.addf %845, %844 : vector<4x16xf32>
    %847 = arith.divf %845, %846 : vector<4x16xf32>
    %848 = vector.extract_strided_slice %837 {offsets = [0, 16], sizes = [4, 16], strides = [1, 1]} : vector<4x48xf32> to vector<4x16xf32>
    %849 = vector.extract_strided_slice %839 {offsets = [0, 16], sizes = [4, 16], strides = [1, 1]} : vector<4x48xf32> to vector<4x16xf32>
    %850 = arith.addf %848, %849 : vector<4x16xf32>
    %851 = arith.negf %850 : vector<4x16xf32>
    %852 = math.exp %851 : vector<4x16xf32>
    %cst_190 = arith.constant 1.000000e+00 : f32
    %853 = vector.broadcast %cst_190 : f32 to vector<4x16xf32>
    %854 = arith.addf %853, %852 : vector<4x16xf32>
    %855 = arith.divf %853, %854 : vector<4x16xf32>
    %856 = vector.extract_strided_slice %837 {offsets = [0, 32], sizes = [4, 16], strides = [1, 1]} : vector<4x48xf32> to vector<4x16xf32>
    %857 = vector.extract_strided_slice %839 {offsets = [0, 32], sizes = [4, 16], strides = [1, 1]} : vector<4x48xf32> to vector<4x16xf32>
    %858 = arith.mulf %847, %857 : vector<4x16xf32>
    %859 = arith.addf %856, %858 : vector<4x16xf32>
    %860 = math.tanh %859 : vector<4x16xf32>
    %cst_191 = arith.constant 1.000000e+00 : f32
    %861 = vector.broadcast %cst_191 : f32 to vector<4x16xf32>
    %862 = arith.subf %861, %855 : vector<4x16xf32>
    %863 = arith.mulf %862, %860 : vector<4x16xf32>
    %864 = arith.mulf %855, %731 : vector<4x16xf32>
    %865 = arith.addf %863, %864 : vector<4x16xf32>
    %cst_192 = arith.constant 1.000000e+00 : f32
    %866 = vector.broadcast %cst_192 : f32 to vector<4x1xf32>
    %867 = arith.subf %866, %748 : vector<4x1xf32>
    %868 = vector.broadcast %867 : vector<4x1xf32> to vector<4x16xf32>
    %869 = arith.mulf %731, %868 : vector<4x16xf32>
    %870 = vector.broadcast %748 : vector<4x1xf32> to vector<4x16xf32>
    %871 = arith.mulf %865, %870 : vector<4x16xf32>
    %872 = arith.addf %869, %871 : vector<4x16xf32>
    %873 = vector.extract_strided_slice %872 {offsets = [0, 0], sizes = [2, 16], strides = [1, 1]} : vector<4x16xf32> to vector<2x16xf32>
    %874 = vector.broadcast %746 : vector<2x1xf32> to vector<2x16xf32>
    %875 = arith.mulf %873, %874 : vector<2x16xf32>
    %876 = vector.extract_strided_slice %872 {offsets = [2, 0], sizes = [2, 16], strides = [1, 1]} : vector<4x16xf32> to vector<2x16xf32>
    %877 = vector.broadcast %747 : vector<2x1xf32> to vector<2x16xf32>
    %878 = arith.mulf %876, %877 : vector<2x16xf32>
    %879 = arith.addf %875, %878 : vector<2x16xf32>
    %c0_193 = arith.constant 0 : index
    %c5_194 = arith.constant 5 : index
    %c0_195 = arith.constant 0 : index
    %c0_196 = arith.constant 0 : index
    %880 = vector.load %arg14[%c0_193, %c5_194, %c0_195, %c0_196] : memref<1x8x2x16xf32, #tpu.memory_space<vmem>>, vector<1x1x2x16xf32>
    %881 = vector.shape_cast %880 : vector<1x1x2x16xf32> to vector<2x16xf32>
    %882 = vector.shape_cast %879 : vector<2x16xf32> to vector<1x1x2x16xf32>
    tpu.vector_store %arg14[%c0_193, %c5_194, %c0_195, %c0_196], %882 {strides = array<i32>} : memref<1x8x2x16xf32, #tpu.memory_space<vmem>>, vector<1x1x2x16xf32>,
    %c0_197 = arith.constant 0 : index
    %c6 = arith.constant 6 : index
    %c0_198 = arith.constant 0 : index
    %c0_199 = arith.constant 0 : index
    %883 = vector.load %arg1[%c0_197, %c6, %c0_198, %c0_199] : memref<1x8x2x16xf32, #tpu.memory_space<vmem>>, vector<1x1x2x16xf32>
    %884 = vector.shape_cast %883 : vector<1x1x2x16xf32> to vector<2x16xf32>
    %c0_200 = arith.constant 0 : index
    %c6_201 = arith.constant 6 : index
    %c0_202 = arith.constant 0 : index
    %c0_203 = arith.constant 0 : index
    %885 = vector.load %arg2[%c0_200, %c6_201, %c0_202, %c0_203] : memref<1x8x2x2xf32, #tpu.memory_space<vmem>>, vector<1x1x2x2xf32>
    %886 = vector.shape_cast %885 : vector<1x1x2x2xf32> to vector<2x2xf32>
    %887 = vector.extract_strided_slice %886 {offsets = [0, 0], sizes = [2, 1], strides = [1, 1]} : vector<2x2xf32> to vector<2x1xf32>
    %888 = vector.extract_strided_slice %886 {offsets = [0, 1], sizes = [2, 1], strides = [1, 1]} : vector<2x2xf32> to vector<2x1xf32>
    %889 = tpu.concatenate %887, %888 in 0 : vector<2x1xf32>, vector<2x1xf32> -> vector<4x1xf32>
    %890 = vector.extract_strided_slice %830 {offsets = [0, 0], sizes = [2, 16], strides = [1, 1]} : vector<4x16xf32> to vector<2x16xf32>
    %891 = vector.broadcast %887 : vector<2x1xf32> to vector<2x16xf32>
    %892 = arith.mulf %890, %891 : vector<2x16xf32>
    %893 = vector.extract_strided_slice %830 {offsets = [2, 0], sizes = [2, 16], strides = [1, 1]} : vector<4x16xf32> to vector<2x16xf32>
    %894 = vector.broadcast %888 : vector<2x1xf32> to vector<2x16xf32>
    %895 = arith.mulf %893, %894 : vector<2x16xf32>
    %896 = arith.addf %892, %895 : vector<2x16xf32>
    %897 = vector.extract_strided_slice %872 {offsets = [0, 0], sizes = [2, 16], strides = [1, 1]} : vector<4x16xf32> to vector<2x16xf32>
    %898 = vector.broadcast %887 : vector<2x1xf32> to vector<2x16xf32>
    %899 = arith.mulf %897, %898 : vector<2x16xf32>
    %900 = vector.extract_strided_slice %872 {offsets = [2, 0], sizes = [2, 16], strides = [1, 1]} : vector<4x16xf32> to vector<2x16xf32>
    %901 = vector.broadcast %888 : vector<2x1xf32> to vector<2x16xf32>
    %902 = arith.mulf %900, %901 : vector<2x16xf32>
    %903 = arith.addf %899, %902 : vector<2x16xf32>
    %904 = tpu.concatenate %884, %896, %903 in 1 : vector<2x16xf32>, vector<2x16xf32>, vector<2x16xf32> -> vector<2x48xf32>
    %cst_204 = arith.constant dense<0.000000e+00> : vector<2x48xf32>
    %905 = tpu.matmul %904, %1, %cst_204 {dimension_numbers = #tpu.dot_dimension_numbers<[1], [0], [0], [1], [0, 0, 1, 1], [], []>} : vector<2x48xf32>, vector<48x48xf32>, vector<2x48xf32> -> vector<2x48xf32>
    %906 = arith.addf %905, %13 : vector<2x48xf32>
    %907 = vector.extract_strided_slice %906 {offsets = [0, 0], sizes = [2, 16], strides = [1, 1]} : vector<2x48xf32> to vector<2x16xf32>
    %908 = vector.extract_strided_slice %17 {offsets = [0, 0], sizes = [2, 16], strides = [1, 1]} : vector<2x48xf32> to vector<2x16xf32>
    %909 = arith.addf %907, %908 : vector<2x16xf32>
    %910 = arith.negf %909 : vector<2x16xf32>
    %911 = math.exp %910 : vector<2x16xf32>
    %cst_205 = arith.constant 1.000000e+00 : f32
    %912 = vector.broadcast %cst_205 : f32 to vector<2x16xf32>
    %913 = arith.addf %912, %911 : vector<2x16xf32>
    %914 = arith.divf %912, %913 : vector<2x16xf32>
    %915 = vector.extract_strided_slice %906 {offsets = [0, 16], sizes = [2, 16], strides = [1, 1]} : vector<2x48xf32> to vector<2x16xf32>
    %916 = vector.extract_strided_slice %17 {offsets = [0, 16], sizes = [2, 16], strides = [1, 1]} : vector<2x48xf32> to vector<2x16xf32>
    %917 = arith.addf %915, %916 : vector<2x16xf32>
    %918 = arith.negf %917 : vector<2x16xf32>
    %919 = math.exp %918 : vector<2x16xf32>
    %cst_206 = arith.constant 1.000000e+00 : f32
    %920 = vector.broadcast %cst_206 : f32 to vector<2x16xf32>
    %921 = arith.addf %920, %919 : vector<2x16xf32>
    %922 = arith.divf %920, %921 : vector<2x16xf32>
    %923 = vector.extract_strided_slice %906 {offsets = [0, 32], sizes = [2, 16], strides = [1, 1]} : vector<2x48xf32> to vector<2x16xf32>
    %924 = vector.extract_strided_slice %17 {offsets = [0, 32], sizes = [2, 16], strides = [1, 1]} : vector<2x48xf32> to vector<2x16xf32>
    %925 = arith.mulf %914, %924 : vector<2x16xf32>
    %926 = arith.addf %923, %925 : vector<2x16xf32>
    %927 = math.tanh %926 : vector<2x16xf32>
    %cst_207 = arith.constant 1.000000e+00 : f32
    %928 = vector.broadcast %cst_207 : f32 to vector<2x16xf32>
    %929 = arith.subf %928, %922 : vector<2x16xf32>
    %930 = arith.mulf %929, %927 : vector<2x16xf32>
    %931 = arith.mulf %922, %34 : vector<2x16xf32>
    %932 = arith.addf %930, %931 : vector<2x16xf32>
    %933 = tpu.concatenate %884, %932, %903 in 1 : vector<2x16xf32>, vector<2x16xf32>, vector<2x16xf32> -> vector<2x48xf32>
    %cst_208 = arith.constant dense<0.000000e+00> : vector<2x48xf32>
    %934 = tpu.matmul %933, %3, %cst_208 {dimension_numbers = #tpu.dot_dimension_numbers<[1], [0], [0], [1], [0, 0, 1, 1], [], []>} : vector<2x48xf32>, vector<48x48xf32>, vector<2x48xf32> -> vector<2x48xf32>
    %935 = arith.addf %934, %21 : vector<2x48xf32>
    %936 = tpu.concatenate %935, %935 in 0 : vector<2x48xf32>, vector<2x48xf32> -> vector<4x48xf32>
    %cst_209 = arith.constant dense<0.000000e+00> : vector<4x48xf32>
    %937 = tpu.matmul %830, %5, %cst_209 {dimension_numbers = #tpu.dot_dimension_numbers<[1], [0], [0], [1], [0, 0, 1, 1], [], []>} : vector<4x16xf32>, vector<16x48xf32>, vector<4x48xf32> -> vector<4x48xf32>
    %938 = arith.addf %937, %25 : vector<4x48xf32>
    %939 = vector.extract_strided_slice %936 {offsets = [0, 0], sizes = [4, 16], strides = [1, 1]} : vector<4x48xf32> to vector<4x16xf32>
    %940 = vector.extract_strided_slice %938 {offsets = [0, 0], sizes = [4, 16], strides = [1, 1]} : vector<4x48xf32> to vector<4x16xf32>
    %941 = arith.addf %939, %940 : vector<4x16xf32>
    %942 = arith.negf %941 : vector<4x16xf32>
    %943 = math.exp %942 : vector<4x16xf32>
    %cst_210 = arith.constant 1.000000e+00 : f32
    %944 = vector.broadcast %cst_210 : f32 to vector<4x16xf32>
    %945 = arith.addf %944, %943 : vector<4x16xf32>
    %946 = arith.divf %944, %945 : vector<4x16xf32>
    %947 = vector.extract_strided_slice %936 {offsets = [0, 16], sizes = [4, 16], strides = [1, 1]} : vector<4x48xf32> to vector<4x16xf32>
    %948 = vector.extract_strided_slice %938 {offsets = [0, 16], sizes = [4, 16], strides = [1, 1]} : vector<4x48xf32> to vector<4x16xf32>
    %949 = arith.addf %947, %948 : vector<4x16xf32>
    %950 = arith.negf %949 : vector<4x16xf32>
    %951 = math.exp %950 : vector<4x16xf32>
    %cst_211 = arith.constant 1.000000e+00 : f32
    %952 = vector.broadcast %cst_211 : f32 to vector<4x16xf32>
    %953 = arith.addf %952, %951 : vector<4x16xf32>
    %954 = arith.divf %952, %953 : vector<4x16xf32>
    %955 = vector.extract_strided_slice %936 {offsets = [0, 32], sizes = [4, 16], strides = [1, 1]} : vector<4x48xf32> to vector<4x16xf32>
    %956 = vector.extract_strided_slice %938 {offsets = [0, 32], sizes = [4, 16], strides = [1, 1]} : vector<4x48xf32> to vector<4x16xf32>
    %957 = arith.mulf %946, %956 : vector<4x16xf32>
    %958 = arith.addf %955, %957 : vector<4x16xf32>
    %959 = math.tanh %958 : vector<4x16xf32>
    %cst_212 = arith.constant 1.000000e+00 : f32
    %960 = vector.broadcast %cst_212 : f32 to vector<4x16xf32>
    %961 = arith.subf %960, %954 : vector<4x16xf32>
    %962 = arith.mulf %961, %959 : vector<4x16xf32>
    %963 = arith.mulf %954, %830 : vector<4x16xf32>
    %964 = arith.addf %962, %963 : vector<4x16xf32>
    %cst_213 = arith.constant 1.000000e+00 : f32
    %965 = vector.broadcast %cst_213 : f32 to vector<4x1xf32>
    %966 = arith.subf %965, %889 : vector<4x1xf32>
    %967 = vector.broadcast %966 : vector<4x1xf32> to vector<4x16xf32>
    %968 = arith.mulf %830, %967 : vector<4x16xf32>
    %969 = vector.broadcast %889 : vector<4x1xf32> to vector<4x16xf32>
    %970 = arith.mulf %964, %969 : vector<4x16xf32>
    %971 = arith.addf %968, %970 : vector<4x16xf32>
    %972 = vector.extract_strided_slice %971 {offsets = [2, 0], sizes = [2, 16], strides = [1, 1]} : vector<4x16xf32> to vector<2x16xf32>
    %973 = vector.extract_strided_slice %971 {offsets = [0, 0], sizes = [2, 16], strides = [1, 1]} : vector<4x16xf32> to vector<2x16xf32>
    %974 = tpu.concatenate %972, %973 in 0 : vector<2x16xf32>, vector<2x16xf32> -> vector<4x16xf32>
    %975 = tpu.concatenate %932, %932 in 0 : vector<2x16xf32>, vector<2x16xf32> -> vector<4x16xf32>
    %976 = tpu.concatenate %974, %971, %975 in 1 : vector<4x16xf32>, vector<4x16xf32>, vector<4x16xf32> -> vector<4x48xf32>
    %cst_214 = arith.constant dense<0.000000e+00> : vector<4x48xf32>
    %977 = tpu.matmul %976, %7, %cst_214 {dimension_numbers = #tpu.dot_dimension_numbers<[1], [0], [0], [1], [0, 0, 1, 1], [], []>} : vector<4x48xf32>, vector<48x48xf32>, vector<4x48xf32> -> vector<4x48xf32>
    %978 = arith.addf %977, %29 : vector<4x48xf32>
    %cst_215 = arith.constant dense<0.000000e+00> : vector<4x48xf32>
    %979 = tpu.matmul %872, %9, %cst_215 {dimension_numbers = #tpu.dot_dimension_numbers<[1], [0], [0], [1], [0, 0, 1, 1], [], []>} : vector<4x16xf32>, vector<16x48xf32>, vector<4x48xf32> -> vector<4x48xf32>
    %980 = arith.addf %979, %33 : vector<4x48xf32>
    %981 = vector.extract_strided_slice %978 {offsets = [0, 0], sizes = [4, 16], strides = [1, 1]} : vector<4x48xf32> to vector<4x16xf32>
    %982 = vector.extract_strided_slice %980 {offsets = [0, 0], sizes = [4, 16], strides = [1, 1]} : vector<4x48xf32> to vector<4x16xf32>
    %983 = arith.addf %981, %982 : vector<4x16xf32>
    %984 = arith.negf %983 : vector<4x16xf32>
    %985 = math.exp %984 : vector<4x16xf32>
    %cst_216 = arith.constant 1.000000e+00 : f32
    %986 = vector.broadcast %cst_216 : f32 to vector<4x16xf32>
    %987 = arith.addf %986, %985 : vector<4x16xf32>
    %988 = arith.divf %986, %987 : vector<4x16xf32>
    %989 = vector.extract_strided_slice %978 {offsets = [0, 16], sizes = [4, 16], strides = [1, 1]} : vector<4x48xf32> to vector<4x16xf32>
    %990 = vector.extract_strided_slice %980 {offsets = [0, 16], sizes = [4, 16], strides = [1, 1]} : vector<4x48xf32> to vector<4x16xf32>
    %991 = arith.addf %989, %990 : vector<4x16xf32>
    %992 = arith.negf %991 : vector<4x16xf32>
    %993 = math.exp %992 : vector<4x16xf32>
    %cst_217 = arith.constant 1.000000e+00 : f32
    %994 = vector.broadcast %cst_217 : f32 to vector<4x16xf32>
    %995 = arith.addf %994, %993 : vector<4x16xf32>
    %996 = arith.divf %994, %995 : vector<4x16xf32>
    %997 = vector.extract_strided_slice %978 {offsets = [0, 32], sizes = [4, 16], strides = [1, 1]} : vector<4x48xf32> to vector<4x16xf32>
    %998 = vector.extract_strided_slice %980 {offsets = [0, 32], sizes = [4, 16], strides = [1, 1]} : vector<4x48xf32> to vector<4x16xf32>
    %999 = arith.mulf %988, %998 : vector<4x16xf32>
    %1000 = arith.addf %997, %999 : vector<4x16xf32>
    %1001 = math.tanh %1000 : vector<4x16xf32>
    %cst_218 = arith.constant 1.000000e+00 : f32
    %1002 = vector.broadcast %cst_218 : f32 to vector<4x16xf32>
    %1003 = arith.subf %1002, %996 : vector<4x16xf32>
    %1004 = arith.mulf %1003, %1001 : vector<4x16xf32>
    %1005 = arith.mulf %996, %872 : vector<4x16xf32>
    %1006 = arith.addf %1004, %1005 : vector<4x16xf32>
    %cst_219 = arith.constant 1.000000e+00 : f32
    %1007 = vector.broadcast %cst_219 : f32 to vector<4x1xf32>
    %1008 = arith.subf %1007, %889 : vector<4x1xf32>
    %1009 = vector.broadcast %1008 : vector<4x1xf32> to vector<4x16xf32>
    %1010 = arith.mulf %872, %1009 : vector<4x16xf32>
    %1011 = vector.broadcast %889 : vector<4x1xf32> to vector<4x16xf32>
    %1012 = arith.mulf %1006, %1011 : vector<4x16xf32>
    %1013 = arith.addf %1010, %1012 : vector<4x16xf32>
    %1014 = vector.extract_strided_slice %1013 {offsets = [0, 0], sizes = [2, 16], strides = [1, 1]} : vector<4x16xf32> to vector<2x16xf32>
    %1015 = vector.broadcast %887 : vector<2x1xf32> to vector<2x16xf32>
    %1016 = arith.mulf %1014, %1015 : vector<2x16xf32>
    %1017 = vector.extract_strided_slice %1013 {offsets = [2, 0], sizes = [2, 16], strides = [1, 1]} : vector<4x16xf32> to vector<2x16xf32>
    %1018 = vector.broadcast %888 : vector<2x1xf32> to vector<2x16xf32>
    %1019 = arith.mulf %1017, %1018 : vector<2x16xf32>
    %1020 = arith.addf %1016, %1019 : vector<2x16xf32>
    %c0_220 = arith.constant 0 : index
    %c6_221 = arith.constant 6 : index
    %c0_222 = arith.constant 0 : index
    %c0_223 = arith.constant 0 : index
    %1021 = vector.load %arg14[%c0_220, %c6_221, %c0_222, %c0_223] : memref<1x8x2x16xf32, #tpu.memory_space<vmem>>, vector<1x1x2x16xf32>
    %1022 = vector.shape_cast %1021 : vector<1x1x2x16xf32> to vector<2x16xf32>
    %1023 = vector.shape_cast %1020 : vector<2x16xf32> to vector<1x1x2x16xf32>
    tpu.vector_store %arg14[%c0_220, %c6_221, %c0_222, %c0_223], %1023 {strides = array<i32>} : memref<1x8x2x16xf32, #tpu.memory_space<vmem>>, vector<1x1x2x16xf32>,
    %c0_224 = arith.constant 0 : index
    %c7 = arith.constant 7 : index
    %c0_225 = arith.constant 0 : index
    %c0_226 = arith.constant 0 : index
    %1024 = vector.load %arg1[%c0_224, %c7, %c0_225, %c0_226] : memref<1x8x2x16xf32, #tpu.memory_space<vmem>>, vector<1x1x2x16xf32>
    %1025 = vector.shape_cast %1024 : vector<1x1x2x16xf32> to vector<2x16xf32>
    %c0_227 = arith.constant 0 : index
    %c7_228 = arith.constant 7 : index
    %c0_229 = arith.constant 0 : index
    %c0_230 = arith.constant 0 : index
    %1026 = vector.load %arg2[%c0_227, %c7_228, %c0_229, %c0_230] : memref<1x8x2x2xf32, #tpu.memory_space<vmem>>, vector<1x1x2x2xf32>
    %1027 = vector.shape_cast %1026 : vector<1x1x2x2xf32> to vector<2x2xf32>
    %1028 = vector.extract_strided_slice %1027 {offsets = [0, 0], sizes = [2, 1], strides = [1, 1]} : vector<2x2xf32> to vector<2x1xf32>
    %1029 = vector.extract_strided_slice %1027 {offsets = [0, 1], sizes = [2, 1], strides = [1, 1]} : vector<2x2xf32> to vector<2x1xf32>
    %1030 = tpu.concatenate %1028, %1029 in 0 : vector<2x1xf32>, vector<2x1xf32> -> vector<4x1xf32>
    %1031 = vector.extract_strided_slice %971 {offsets = [0, 0], sizes = [2, 16], strides = [1, 1]} : vector<4x16xf32> to vector<2x16xf32>
    %1032 = vector.broadcast %1028 : vector<2x1xf32> to vector<2x16xf32>
    %1033 = arith.mulf %1031, %1032 : vector<2x16xf32>
    %1034 = vector.extract_strided_slice %971 {offsets = [2, 0], sizes = [2, 16], strides = [1, 1]} : vector<4x16xf32> to vector<2x16xf32>
    %1035 = vector.broadcast %1029 : vector<2x1xf32> to vector<2x16xf32>
    %1036 = arith.mulf %1034, %1035 : vector<2x16xf32>
    %1037 = arith.addf %1033, %1036 : vector<2x16xf32>
    %1038 = vector.extract_strided_slice %1013 {offsets = [0, 0], sizes = [2, 16], strides = [1, 1]} : vector<4x16xf32> to vector<2x16xf32>
    %1039 = vector.broadcast %1028 : vector<2x1xf32> to vector<2x16xf32>
    %1040 = arith.mulf %1038, %1039 : vector<2x16xf32>
    %1041 = vector.extract_strided_slice %1013 {offsets = [2, 0], sizes = [2, 16], strides = [1, 1]} : vector<4x16xf32> to vector<2x16xf32>
    %1042 = vector.broadcast %1029 : vector<2x1xf32> to vector<2x16xf32>
    %1043 = arith.mulf %1041, %1042 : vector<2x16xf32>
    %1044 = arith.addf %1040, %1043 : vector<2x16xf32>
    %1045 = tpu.concatenate %1025, %1037, %1044 in 1 : vector<2x16xf32>, vector<2x16xf32>, vector<2x16xf32> -> vector<2x48xf32>
    %cst_231 = arith.constant dense<0.000000e+00> : vector<2x48xf32>
    %1046 = tpu.matmul %1045, %1, %cst_231 {dimension_numbers = #tpu.dot_dimension_numbers<[1], [0], [0], [1], [0, 0, 1, 1], [], []>} : vector<2x48xf32>, vector<48x48xf32>, vector<2x48xf32> -> vector<2x48xf32>
    %1047 = arith.addf %1046, %13 : vector<2x48xf32>
    %1048 = vector.extract_strided_slice %1047 {offsets = [0, 0], sizes = [2, 16], strides = [1, 1]} : vector<2x48xf32> to vector<2x16xf32>
    %1049 = vector.extract_strided_slice %17 {offsets = [0, 0], sizes = [2, 16], strides = [1, 1]} : vector<2x48xf32> to vector<2x16xf32>
    %1050 = arith.addf %1048, %1049 : vector<2x16xf32>
    %1051 = arith.negf %1050 : vector<2x16xf32>
    %1052 = math.exp %1051 : vector<2x16xf32>
    %cst_232 = arith.constant 1.000000e+00 : f32
    %1053 = vector.broadcast %cst_232 : f32 to vector<2x16xf32>
    %1054 = arith.addf %1053, %1052 : vector<2x16xf32>
    %1055 = arith.divf %1053, %1054 : vector<2x16xf32>
    %1056 = vector.extract_strided_slice %1047 {offsets = [0, 16], sizes = [2, 16], strides = [1, 1]} : vector<2x48xf32> to vector<2x16xf32>
    %1057 = vector.extract_strided_slice %17 {offsets = [0, 16], sizes = [2, 16], strides = [1, 1]} : vector<2x48xf32> to vector<2x16xf32>
    %1058 = arith.addf %1056, %1057 : vector<2x16xf32>
    %1059 = arith.negf %1058 : vector<2x16xf32>
    %1060 = math.exp %1059 : vector<2x16xf32>
    %cst_233 = arith.constant 1.000000e+00 : f32
    %1061 = vector.broadcast %cst_233 : f32 to vector<2x16xf32>
    %1062 = arith.addf %1061, %1060 : vector<2x16xf32>
    %1063 = arith.divf %1061, %1062 : vector<2x16xf32>
    %1064 = vector.extract_strided_slice %1047 {offsets = [0, 32], sizes = [2, 16], strides = [1, 1]} : vector<2x48xf32> to vector<2x16xf32>
    %1065 = vector.extract_strided_slice %17 {offsets = [0, 32], sizes = [2, 16], strides = [1, 1]} : vector<2x48xf32> to vector<2x16xf32>
    %1066 = arith.mulf %1055, %1065 : vector<2x16xf32>
    %1067 = arith.addf %1064, %1066 : vector<2x16xf32>
    %1068 = math.tanh %1067 : vector<2x16xf32>
    %cst_234 = arith.constant 1.000000e+00 : f32
    %1069 = vector.broadcast %cst_234 : f32 to vector<2x16xf32>
    %1070 = arith.subf %1069, %1063 : vector<2x16xf32>
    %1071 = arith.mulf %1070, %1068 : vector<2x16xf32>
    %1072 = arith.mulf %1063, %34 : vector<2x16xf32>
    %1073 = arith.addf %1071, %1072 : vector<2x16xf32>
    %1074 = tpu.concatenate %1025, %1073, %1044 in 1 : vector<2x16xf32>, vector<2x16xf32>, vector<2x16xf32> -> vector<2x48xf32>
    %cst_235 = arith.constant dense<0.000000e+00> : vector<2x48xf32>
    %1075 = tpu.matmul %1074, %3, %cst_235 {dimension_numbers = #tpu.dot_dimension_numbers<[1], [0], [0], [1], [0, 0, 1, 1], [], []>} : vector<2x48xf32>, vector<48x48xf32>, vector<2x48xf32> -> vector<2x48xf32>
    %1076 = arith.addf %1075, %21 : vector<2x48xf32>
    %1077 = tpu.concatenate %1076, %1076 in 0 : vector<2x48xf32>, vector<2x48xf32> -> vector<4x48xf32>
    %cst_236 = arith.constant dense<0.000000e+00> : vector<4x48xf32>
    %1078 = tpu.matmul %971, %5, %cst_236 {dimension_numbers = #tpu.dot_dimension_numbers<[1], [0], [0], [1], [0, 0, 1, 1], [], []>} : vector<4x16xf32>, vector<16x48xf32>, vector<4x48xf32> -> vector<4x48xf32>
    %1079 = arith.addf %1078, %25 : vector<4x48xf32>
    %1080 = vector.extract_strided_slice %1077 {offsets = [0, 0], sizes = [4, 16], strides = [1, 1]} : vector<4x48xf32> to vector<4x16xf32>
    %1081 = vector.extract_strided_slice %1079 {offsets = [0, 0], sizes = [4, 16], strides = [1, 1]} : vector<4x48xf32> to vector<4x16xf32>
    %1082 = arith.addf %1080, %1081 : vector<4x16xf32>
    %1083 = arith.negf %1082 : vector<4x16xf32>
    %1084 = math.exp %1083 : vector<4x16xf32>
    %cst_237 = arith.constant 1.000000e+00 : f32
    %1085 = vector.broadcast %cst_237 : f32 to vector<4x16xf32>
    %1086 = arith.addf %1085, %1084 : vector<4x16xf32>
    %1087 = arith.divf %1085, %1086 : vector<4x16xf32>
    %1088 = vector.extract_strided_slice %1077 {offsets = [0, 16], sizes = [4, 16], strides = [1, 1]} : vector<4x48xf32> to vector<4x16xf32>
    %1089 = vector.extract_strided_slice %1079 {offsets = [0, 16], sizes = [4, 16], strides = [1, 1]} : vector<4x48xf32> to vector<4x16xf32>
    %1090 = arith.addf %1088, %1089 : vector<4x16xf32>
    %1091 = arith.negf %1090 : vector<4x16xf32>
    %1092 = math.exp %1091 : vector<4x16xf32>
    %cst_238 = arith.constant 1.000000e+00 : f32
    %1093 = vector.broadcast %cst_238 : f32 to vector<4x16xf32>
    %1094 = arith.addf %1093, %1092 : vector<4x16xf32>
    %1095 = arith.divf %1093, %1094 : vector<4x16xf32>
    %1096 = vector.extract_strided_slice %1077 {offsets = [0, 32], sizes = [4, 16], strides = [1, 1]} : vector<4x48xf32> to vector<4x16xf32>
    %1097 = vector.extract_strided_slice %1079 {offsets = [0, 32], sizes = [4, 16], strides = [1, 1]} : vector<4x48xf32> to vector<4x16xf32>
    %1098 = arith.mulf %1087, %1097 : vector<4x16xf32>
    %1099 = arith.addf %1096, %1098 : vector<4x16xf32>
    %1100 = math.tanh %1099 : vector<4x16xf32>
    %cst_239 = arith.constant 1.000000e+00 : f32
    %1101 = vector.broadcast %cst_239 : f32 to vector<4x16xf32>
    %1102 = arith.subf %1101, %1095 : vector<4x16xf32>
    %1103 = arith.mulf %1102, %1100 : vector<4x16xf32>
    %1104 = arith.mulf %1095, %971 : vector<4x16xf32>
    %1105 = arith.addf %1103, %1104 : vector<4x16xf32>
    %cst_240 = arith.constant 1.000000e+00 : f32
    %1106 = vector.broadcast %cst_240 : f32 to vector<4x1xf32>
    %1107 = arith.subf %1106, %1030 : vector<4x1xf32>
    %1108 = vector.broadcast %1107 : vector<4x1xf32> to vector<4x16xf32>
    %1109 = arith.mulf %971, %1108 : vector<4x16xf32>
    %1110 = vector.broadcast %1030 : vector<4x1xf32> to vector<4x16xf32>
    %1111 = arith.mulf %1105, %1110 : vector<4x16xf32>
    %1112 = arith.addf %1109, %1111 : vector<4x16xf32>
    %1113 = vector.extract_strided_slice %1112 {offsets = [2, 0], sizes = [2, 16], strides = [1, 1]} : vector<4x16xf32> to vector<2x16xf32>
    %1114 = vector.extract_strided_slice %1112 {offsets = [0, 0], sizes = [2, 16], strides = [1, 1]} : vector<4x16xf32> to vector<2x16xf32>
    %1115 = tpu.concatenate %1113, %1114 in 0 : vector<2x16xf32>, vector<2x16xf32> -> vector<4x16xf32>
    %1116 = tpu.concatenate %1073, %1073 in 0 : vector<2x16xf32>, vector<2x16xf32> -> vector<4x16xf32>
    %1117 = tpu.concatenate %1115, %1112, %1116 in 1 : vector<4x16xf32>, vector<4x16xf32>, vector<4x16xf32> -> vector<4x48xf32>
    %cst_241 = arith.constant dense<0.000000e+00> : vector<4x48xf32>
    %1118 = tpu.matmul %1117, %7, %cst_241 {dimension_numbers = #tpu.dot_dimension_numbers<[1], [0], [0], [1], [0, 0, 1, 1], [], []>} : vector<4x48xf32>, vector<48x48xf32>, vector<4x48xf32> -> vector<4x48xf32>
    %1119 = arith.addf %1118, %29 : vector<4x48xf32>
    %cst_242 = arith.constant dense<0.000000e+00> : vector<4x48xf32>
    %1120 = tpu.matmul %1013, %9, %cst_242 {dimension_numbers = #tpu.dot_dimension_numbers<[1], [0], [0], [1], [0, 0, 1, 1], [], []>} : vector<4x16xf32>, vector<16x48xf32>, vector<4x48xf32> -> vector<4x48xf32>
    %1121 = arith.addf %1120, %33 : vector<4x48xf32>
    %1122 = vector.extract_strided_slice %1119 {offsets = [0, 0], sizes = [4, 16], strides = [1, 1]} : vector<4x48xf32> to vector<4x16xf32>
    %1123 = vector.extract_strided_slice %1121 {offsets = [0, 0], sizes = [4, 16], strides = [1, 1]} : vector<4x48xf32> to vector<4x16xf32>
    %1124 = arith.addf %1122, %1123 : vector<4x16xf32>
    %1125 = arith.negf %1124 : vector<4x16xf32>
    %1126 = math.exp %1125 : vector<4x16xf32>
    %cst_243 = arith.constant 1.000000e+00 : f32
    %1127 = vector.broadcast %cst_243 : f32 to vector<4x16xf32>
    %1128 = arith.addf %1127, %1126 : vector<4x16xf32>
    %1129 = arith.divf %1127, %1128 : vector<4x16xf32>
    %1130 = vector.extract_strided_slice %1119 {offsets = [0, 16], sizes = [4, 16], strides = [1, 1]} : vector<4x48xf32> to vector<4x16xf32>
    %1131 = vector.extract_strided_slice %1121 {offsets = [0, 16], sizes = [4, 16], strides = [1, 1]} : vector<4x48xf32> to vector<4x16xf32>
    %1132 = arith.addf %1130, %1131 : vector<4x16xf32>
    %1133 = arith.negf %1132 : vector<4x16xf32>
    %1134 = math.exp %1133 : vector<4x16xf32>
    %cst_244 = arith.constant 1.000000e+00 : f32
    %1135 = vector.broadcast %cst_244 : f32 to vector<4x16xf32>
    %1136 = arith.addf %1135, %1134 : vector<4x16xf32>
    %1137 = arith.divf %1135, %1136 : vector<4x16xf32>
    %1138 = vector.extract_strided_slice %1119 {offsets = [0, 32], sizes = [4, 16], strides = [1, 1]} : vector<4x48xf32> to vector<4x16xf32>
    %1139 = vector.extract_strided_slice %1121 {offsets = [0, 32], sizes = [4, 16], strides = [1, 1]} : vector<4x48xf32> to vector<4x16xf32>
    %1140 = arith.mulf %1129, %1139 : vector<4x16xf32>
    %1141 = arith.addf %1138, %1140 : vector<4x16xf32>
    %1142 = math.tanh %1141 : vector<4x16xf32>
    %cst_245 = arith.constant 1.000000e+00 : f32
    %1143 = vector.broadcast %cst_245 : f32 to vector<4x16xf32>
    %1144 = arith.subf %1143, %1137 : vector<4x16xf32>
    %1145 = arith.mulf %1144, %1142 : vector<4x16xf32>
    %1146 = arith.mulf %1137, %1013 : vector<4x16xf32>
    %1147 = arith.addf %1145, %1146 : vector<4x16xf32>
    %cst_246 = arith.constant 1.000000e+00 : f32
    %1148 = vector.broadcast %cst_246 : f32 to vector<4x1xf32>
    %1149 = arith.subf %1148, %1030 : vector<4x1xf32>
    %1150 = vector.broadcast %1149 : vector<4x1xf32> to vector<4x16xf32>
    %1151 = arith.mulf %1013, %1150 : vector<4x16xf32>
    %1152 = vector.broadcast %1030 : vector<4x1xf32> to vector<4x16xf32>
    %1153 = arith.mulf %1147, %1152 : vector<4x16xf32>
    %1154 = arith.addf %1151, %1153 : vector<4x16xf32>
    %1155 = vector.extract_strided_slice %1154 {offsets = [0, 0], sizes = [2, 16], strides = [1, 1]} : vector<4x16xf32> to vector<2x16xf32>
    %1156 = vector.broadcast %1028 : vector<2x1xf32> to vector<2x16xf32>
    %1157 = arith.mulf %1155, %1156 : vector<2x16xf32>
    %1158 = vector.extract_strided_slice %1154 {offsets = [2, 0], sizes = [2, 16], strides = [1, 1]} : vector<4x16xf32> to vector<2x16xf32>
    %1159 = vector.broadcast %1029 : vector<2x1xf32> to vector<2x16xf32>
    %1160 = arith.mulf %1158, %1159 : vector<2x16xf32>
    %1161 = arith.addf %1157, %1160 : vector<2x16xf32>
    %c0_247 = arith.constant 0 : index
    %c7_248 = arith.constant 7 : index
    %c0_249 = arith.constant 0 : index
    %c0_250 = arith.constant 0 : index
    %1162 = vector.load %arg14[%c0_247, %c7_248, %c0_249, %c0_250] : memref<1x8x2x16xf32, #tpu.memory_space<vmem>>, vector<1x1x2x16xf32>
    %1163 = vector.shape_cast %1162 : vector<1x1x2x16xf32> to vector<2x16xf32>
    %1164 = vector.shape_cast %1161 : vector<2x16xf32> to vector<1x1x2x16xf32>
    tpu.vector_store %arg14[%c0_247, %c7_248, %c0_249, %c0_250], %1164 {strides = array<i32>} : memref<1x8x2x16xf32, #tpu.memory_space<vmem>>, vector<1x1x2x16xf32>,
    return
  }
  func.func @transform_0(%arg0: i32) -> (i32, i32, i32, i32) {
    %c0_i32 = arith.constant 0 : i32
    %c0_i32_0 = arith.constant 0 : i32
    %c0_i32_1 = arith.constant 0 : i32
    %c0_i32_2 = arith.constant 0 : i32
    return %arg0, %c0_i32, %c0_i32_0, %c0_i32_1 : i32, i32, i32, i32
  }
  func.func @transform_1(%arg0: i32) -> (i32, i32, i32, i32) {
    %c0_i32 = arith.constant 0 : i32
    %c0_i32_0 = arith.constant 0 : i32
    %c0_i32_1 = arith.constant 0 : i32
    %c0_i32_2 = arith.constant 0 : i32
    return %arg0, %c0_i32, %c0_i32_0, %c0_i32_1 : i32, i32, i32, i32
  }
  func.func @transform_2(%arg0: i32) -> (i32, i32, i32) {
    %c0_i32 = arith.constant 0 : i32
    %c0_i32_0 = arith.constant 0 : i32
    %c0_i32_1 = arith.constant 0 : i32
    return %arg0, %c0_i32, %c0_i32_0 : i32, i32, i32
  }
  func.func @transform_3(%arg0: i32) -> (i32, i32, i32) {
    %c0_i32 = arith.constant 0 : i32
    %c0_i32_0 = arith.constant 0 : i32
    %c0_i32_1 = arith.constant 0 : i32
    return %arg0, %c0_i32, %c0_i32_0 : i32, i32, i32
  }
  func.func @transform_4(%arg0: i32) -> (i32, i32, i32) {
    %c0_i32 = arith.constant 0 : i32
    %c0_i32_0 = arith.constant 0 : i32
    %c0_i32_1 = arith.constant 0 : i32
    return %arg0, %c0_i32, %c0_i32_0 : i32, i32, i32
  }
  func.func @transform_5(%arg0: i32) -> (i32, i32, i32) {
    %c0_i32 = arith.constant 0 : i32
    %c0_i32_0 = arith.constant 0 : i32
    %c0_i32_1 = arith.constant 0 : i32
    return %arg0, %c0_i32, %c0_i32_0 : i32, i32, i32
  }
  func.func @transform_6(%arg0: i32) -> (i32, i32, i32) {
    %c0_i32 = arith.constant 0 : i32
    %c0_i32_0 = arith.constant 0 : i32
    %c0_i32_1 = arith.constant 0 : i32
    return %arg0, %c0_i32, %c0_i32_0 : i32, i32, i32
  }
  func.func @transform_7(%arg0: i32) -> (i32, i32, i32) {
    %c0_i32 = arith.constant 0 : i32
    %c0_i32_0 = arith.constant 0 : i32
    %c0_i32_1 = arith.constant 0 : i32
    return %arg0, %c0_i32, %c0_i32_0 : i32, i32, i32
  }
  func.func @transform_8(%arg0: i32) -> (i32, i32, i32) {
    %c0_i32 = arith.constant 0 : i32
    %c0_i32_0 = arith.constant 0 : i32
    %c0_i32_1 = arith.constant 0 : i32
    return %arg0, %c0_i32, %c0_i32_0 : i32, i32, i32
  }
  func.func @transform_9(%arg0: i32) -> (i32, i32, i32) {
    %c0_i32 = arith.constant 0 : i32
    %c0_i32_0 = arith.constant 0 : i32
    %c0_i32_1 = arith.constant 0 : i32
    return %arg0, %c0_i32, %c0_i32_0 : i32, i32, i32
  }
  func.func @transform_10(%arg0: i32) -> (i32, i32, i32) {
    %c0_i32 = arith.constant 0 : i32
    %c0_i32_0 = arith.constant 0 : i32
    %c0_i32_1 = arith.constant 0 : i32
    return %arg0, %c0_i32, %c0_i32_0 : i32, i32, i32
  }
  func.func @transform_11(%arg0: i32) -> (i32, i32, i32) {
    %c0_i32 = arith.constant 0 : i32
    %c0_i32_0 = arith.constant 0 : i32
    %c0_i32_1 = arith.constant 0 : i32
    return %arg0, %c0_i32, %c0_i32_0 : i32, i32, i32
  }
  func.func @transform_12(%arg0: i32) -> (i32, i32, i32) {
    %c0_i32 = arith.constant 0 : i32
    %c0_i32_0 = arith.constant 0 : i32
    %c0_i32_1 = arith.constant 0 : i32
    return %arg0, %c0_i32, %c0_i32_0 : i32, i32, i32
  }
  func.func @transform_13(%arg0: i32) -> (i32, i32, i32, i32) {
    %c0_i32 = arith.constant 0 : i32
    %c0_i32_0 = arith.constant 0 : i32
    %c0_i32_1 = arith.constant 0 : i32
    %c0_i32_2 = arith.constant 0 : i32
    return %arg0, %c0_i32, %c0_i32_0, %c0_i32_1 : i32, i32, i32, i32
  }
}

</mosaic_0001>

<bundles_post_ra>
// kernel: model_forward.1
= control target key start
LH: loop header
LB: loop body
LE: loop exit
PB: predicated region body
PF: predicated region fallthrough
CT: control target
= control target key end

     0   :  { %s6273_s25 = smov 0   ;;  %s7741_s0 = inlined_call_operand.vmem [shape: f32[2,8,2,16], index: 0, kind: input, shape index: {}]   ;;  %s7742_s1 = inlined_call_operand.vmem [shape: f32[2,8,2,2], index: 1, kind: input, shape index: {}]   ;;  %s7743_s2 = inlined_call_operand.vmem [shape: f32[2,48,48], index: 2, kind: input, shape index: {}]   ;;  %s7744_s3 = inlined_call_operand.vmem [shape: f32[2,1,48], index: 3, kind: input, shape index: {}]   ;;  %s7745_s4 = inlined_call_operand.vmem [shape: f32[2,1,48], index: 4, kind: input, shape index: {}]   ;;  %s7746_s5 = inlined_call_operand.vmem [shape: f32[2,48,48], index: 5, kind: input, shape index: {}]   ;;  %s7747_s6 = inlined_call_operand.vmem [shape: f32[2,16,48], index: 6, kind: input, shape index: {}]   ;;  %s7748_s7 = inlined_call_operand.vmem [shape: f32[2,1,48], index: 7, kind: input, shape index: {}]   ;;  %s7749_s8 = inlined_call_operand.vmem [shape: f32[2,1,48], index: 8, kind: input, shape index: {}]   ;;  %s7750_s9 = inlined_call_operand.vmem [shape: f32[2,48,48], index: 9, kind: input, shape index: {}]   ;;  %s7751_s10 = inlined_call_operand.vmem [shape: f32[2,16,48], index: 10, kind: input, shape index: {}]   ;;  %s7752_s11 = inlined_call_operand.vmem [shape: f32[2,1,48], index: 11, kind: input, shape index: {}]   ;;  %s7753_s12 = inlined_call_operand.vmem [shape: f32[2,1,48], index: 12, kind: input, shape index: {}]   ;;  %s7754_s13 = inlined_call_operand.vmem [shape: f32[2,8,2,16], index: 13, kind: output, shape index: {}]  }
   0x1   :  { %7769 = sst [smem:[#allocation2_spill]] %s7741_s0 }
   0x2   :  { %7770 = sst [smem:[#allocation3_spill]] %s7742_s1 }
   0x3   :  { %7771 = sst [smem:[#allocation4_spill]] %s7743_s2 }
   0x4   :  { %7772 = sst [smem:[#allocation5_spill]] %s7744_s3 }
   0x5 LB: > { %s5148_s26 = sadd.s32 4294967295, %s6192_s25   ;;  %p5152_p0 = scmp.ge.s32.totalorder %s6192_s25, 1  ;;  %s6192_s25 = sphi %s6273_s25, %s23_s25  }
   0x6   : > { %p495_p1 = scmp.lt.s32.totalorder %s6192_s25, 3 }
   0x8   : > { %p496_p2 = pnand %p5152_p0, %p495_p1 }
   0x9   : > { %p587_p3 = scmp.lt.s32.totalorder (!%p496_p2), %s5148_s26, 1  ;;  %s7773_s1 = sld [smem:[#allocation3_spill]] (!%p496_p2) }
   0xa   : > { %499 = sbr.rel (%p496_p2) target bundleno = 13841 (0x3611), region = 72  ;;  %s7774_s2 = sld [smem:[#allocation4_spill]] (!%p496_p2) }
   0xb   : > { %s7761_s21 = smov (!%p496_p2), 96   ;;  %s7775_s0 = sld [smem:[#allocation2_spill]] (!%p496_p2) }
   0xc   : > { %s7776_s3 = sld [smem:[#allocation5_spill]] (!%p496_p2)  ;;  %s7757_s16 = smov (!%p496_p2), 32  }
   0xd   : > { %s7755_s23 = smov (!%p496_p2), 112   ;;  %s7763_s19 = smov (!%p496_p2), 16  }
   0xf   : > { %v7765_v0 = vmov 0   ;;  %v6195_v1 = vmov 0.0   ;;  %s7785_s26 = smov (!%p587_p3, %s5148_s26), 1  ;;  %v7767_v6 = vmov 1   ;;  %vm6197_vm0 = vmmov 0  }
  0x10   : > { %5968 = vset.pattern.permute.xlu0 %v7765_v0  ;;  %5478 = vmatprep.subr.mxu0 %v6195_v1  ;;  %s6288_s27 = sshll.u32 %s7785_s26, 4  ;;  %s6291_s28 = smul.u32 48, %s7785_s26  ;;  %vm723_vm1 = vcmask 130048   ;;  %vm725_vm2 = vcmask 261120   ;;  %vm727_vm3 = vcmask 392192   ;;  %vm710_vm4 = vcmask 1041408  }
  0x11   : > { %5493 = vmatprep.subr.mxu1 %v6195_v1  ;;  %5970 = vset.pattern.permute.xlu1 %v7765_v0  ;;  %s6297_s14 = scalar_lea.vmem %s7773_s1, %s6288_s27  ;;  %s6339_s20 = scalar_lea.vmem %s7745_s4, %s7785_s26  ;;  %vm1227_vm5 = vcmask 123904  }
  0x12   : > { %v6300_v2 = vld [vmem:[%s6297_s14] sm:$0x3]  ;;  %s6306_s17 = scalar_lea.vmem %s7774_s2, %s6291_s28  ;;  %5490 = vmatprep.mubr.msk.f32.mxu0 %vm6197_vm0, %v6195_v1  ;;  %5505 = vmatprep.mubr.msk.f32.mxu1 %vm6197_vm0, %v6195_v1  ;;  %s6363_s24 = scalar_lea.vmem %s7775_s0, %s6288_s27 }
  0x13   : > { %713 = vperm.xlu0 %5968, %v6300_v2   ;;  %v6310_v3 = vld [vmem:[%s6306_s17 + $0x28] sm:$0xff]  ;;  %v6313_v4 = vld [vmem:[%s6306_s17 + $0x20] sm:$0xff]  ;;  %v6318_v5 = vld [vmem:[%s6306_s17 + $0x18] sm:$0xff]  ;;  %s6379_s15 = scalar_lea.vmem %s7776_s3, %s7785_s26  ;;  %s6394_s22 = scalar_lea.vmem %s7746_s5, %s6291_s28  ;;  %v706_v54 = vrot.slane %v6300_v2, 6 }
  0x14   : > { %5479 = vmatpush3.msra.mxu0 %v6310_v3  ;;  %v6324_v7 = vld [vmem:[%s6306_s17 + $0x10] sm:$0xff]  ;;  %v6330_v8 = vld [vmem:[%s6306_s17 + $0x8] sm:$0xff]  ;;  %v6345_v9 = vld [vmem:[%s6306_s17] sm:$0xff]  ;;  %s6431_s18 = scalar_lea.vmem %s7747_s6, %s6288_s27  ;;  %s6455_s30 = scalar_lea.vmem %s7749_s8, %s7785_s26 }
  0x15   : > { %5480 = vmatprep.subr.mxu0 %v6195_v1  ;;  %v6348_v10 = vld [vmem:[%s6339_s20] ss:$0 sm:$0xff]  ;;  %v6397_v30 = vld [vmem:[%s6394_s22 + $0x28] sm:$0xff]  ;;  %v6405_v32 = vld [vmem:[%s6394_s22 + $0x18] sm:$0xff]  ;;  %s6468_s29 = scalar_lea.vmem %s7748_s7, %s7785_s26  ;;  %s6488_s0 = scalar_lea.vmem %s7751_s10, %s6288_s27 }
  0x16   : > { %5481 = vmatpush3.msra.mxu0 %v6313_v4  ;;  %814 = vrot.lane.b32.xlu1 %v6348_v10, %s7761_s21  ;;  %v703_v15 = vld [vmem:[%s6363_s24] sm:$0x3]  ;;  %v6412_v35 = vld [vmem:[%s6394_s22 + $0x10] sm:$0xff]  ;;  %v6417_v36 = vld [vmem:[%s6394_s22 + $0x8] sm:$0xff]  ;;  %s6494_s3 = scalar_lea.vmem %s7750_s9, %s6291_s28  ;;  %s6564_s28 = scalar_lea.vmem %s7753_s12, %s7785_s26 }
  0x17   : > { %5969 = vset.pattern.permute.xlu0 %v7767_v6  ;;  %5482 = vmatprep.subr.mxu0 %v6195_v1  ;;  %v6382_v19 = vld [vmem:[%s6379_s15] ss:$0 sm:$0xff]  ;;  %v6435_v45 = vld [vmem:[%s6431_s18 + $0x8] sm:$0xff]  ;;  %s7781_s1 = smov 127  }
  0x18   : > { %718 = vperm.xlu0 %5969, %v6300_v2   ;;  %5483 = vmatpush3.msra.mxu0 %v6318_v5  ;;  %v6400_v31 = vld [vmem:[%s6394_s22 + $0x20] sm:$0xff] }
  0x19   : > { %5484 = vmatprep.subr.mxu0 %v6195_v1  ;;  %5494 = vmatpush3.msra.mxu1 %v6397_v30  ;;  %v6420_v37 = vld [vmem:[%s6394_s22] sm:$0xff] }
  0x1a   : > { %5485 = vmatpush3.msra.mxu0 %v6324_v7  ;;  %5495 = vmatprep.subr.mxu1 %v6195_v1  ;;  %v6440_v47 = vld [vmem:[%s6431_s18] sm:$0xff] }
  0x1b   : > { %5486 = vmatprep.subr.mxu0 %v6195_v1  ;;  %5496 = vmatpush3.msra.mxu1 %v6400_v31  ;;  %v6458_v50 = vld [vmem:[%s6455_s30] ss:$0 sm:$0xff] }
  0x1c   : > { %5487 = vmatpush3.msra.mxu0 %v6330_v8  ;;  %5971 = vset.pattern.permute.xlu0 %v7765_v0  ;;  %v6471_v55 = vld [vmem:[%s6468_s29] ss:$0 sm:$0xff] }
  0x1d   : > { %5488 = vmatprep.subr.mxu0 %v6195_v1  ;;  %5497 = vmatprep.subr.mxu1 %v6195_v1 }
  0x1e   : > { %5489 = vmatpush3.msra.mxu0 %v6345_v9  ;;  %5498 = vmatpush3.msra.mxu1 %v6405_v32 }
  0x1f   : > { %5530 = vmatprep.subr.mxu0 %v6195_v1  ;;  %5499 = vmatprep.subr.mxu1 %v6195_v1 }
  0x20   : > { %5500 = vmatpush3.msra.mxu1 %v6412_v35 }
  0x21   : > { %5501 = vmatprep.subr.mxu1 %v6195_v1 }
  0x22   : > { %5502 = vmatpush3.msra.mxu1 %v6417_v36 }
  0x23   : > { %5503 = vmatprep.subr.mxu1 %v6195_v1 }
  0x24   : > { %5504 = vmatpush3.msra.mxu1 %v6420_v37 }
  0x25   : > { %5508 = vmatprep.subr.mxu1 %v6195_v1 }
  0x88   : > { %v6386_v27 = vpop.permute.xlu1 %814 }
  0x8e   : > { %v6357_v11 = vpop.permute.xlu0 %713 }
  0x8f   : > { %v716_v13 = vmul.f32 0.0, %v6357_v11 }
  0x93   : > { %v6365_v12 = vpop.permute.xlu0 %718 }
  0x94   : > { %v721_v14 = vmul.f32 0.0, %v6365_v12 }
  0x96   : > { %v722_v16 = vadd.f32 %v721_v14, %v716_v13 }
  0x98   : > { %v724_v17 = vsel %vm723_vm1, %v703_v15, %v722_v16 }
  0x99   : > { %v726_v18 = vsel %vm725_vm2, %v724_v17, %v722_v16 }
  0x9a   : > { %5491 = vmatmul.mubr.msk.f32.vlgmr.msra.gmra.mxu0 %vm727_vm3, %v726_v18 }
  0x9b   : > { %5534 = vmatprep.mubr.msk.f32.mxu0 %vm6197_vm0, %v6195_v1 }
 0x15a   : > { %v797_v20 = vpop.f32.mrf.mxu0 }
 0x15b   : > { %v798_v21 = vadd.f32 %v6382_v19, %v797_v20 }
 0x15c   : > { %v5492_v22 = vpop.f32.mrf.mxu0 }
 0x15d   : > { %v807_v23 = vadd.f32 %v6348_v10, %v798_v21 }
 0x15f   : > { %v5173_v24 = vmul.f32 -1.442695, %v807_v23  ;;  %v6497_v23 = vld [vmem:[%s6488_s0 + $0x8] sm:$0xff] }
 0x160   : > { %5531 = vmatpush3.msra.mxu0 %v6497_v23 }
 0x161   : > { %5986 = vpow2.f32 %v5173_v24  ;;  %v6500_v24 = vld [vmem:[%s6488_s0] sm:$0xff]  ;;  %5532 = vmatprep.subr.mxu0 %v6195_v1 }
 0x162   : > { %5533 = vmatpush3.msra.mxu0 %v6500_v24 }
 0x163   : > { %5535 = vmatmul.mubr.f32.vlgmr.msra.gmra.mxu0 %v6195_v1  ;;  %5537 = vmatprep.subr.mxu0 %v6195_v1 }
 0x164   : > { %5538 = vmatpush3.msra.mxu0 %v6310_v3  ;;  %5549 = vmatprep.mubr.msk.f32.mxu0 %vm6197_vm0, %v6195_v1 }
 0x165   : > { %5539 = vmatprep.subr.mxu0 %v6195_v1 }
 0x166   : > { %5540 = vmatpush3.msra.mxu0 %v6313_v4 }
 0x167   : > { %5541 = vmatprep.subr.mxu0 %v6195_v1 }
 0x168   : > { %5542 = vmatpush3.msra.mxu0 %v6318_v5 }
 0x169   : > { %5543 = vmatprep.subr.mxu0 %v6195_v1 }
 0x16a   : > { %5544 = vmatpush3.msra.mxu0 %v6324_v7 }
 0x16b   : > { %5545 = vmatprep.subr.mxu0 %v6195_v1 }
 0x16c   : > { %5546 = vmatpush3.msra.mxu0 %v6330_v8 }
 0x16d   : > { %5547 = vmatprep.subr.mxu0 %v6195_v1 }
 0x16e   : > { %v5987_v25 = vpop.eup %5986  ;;  %5548 = vmatpush3.msra.mxu0 %v6345_v9 }
 0x16f   : > { %v811_v26 = vadd.f32 1.0, %v5987_v25  ;;  %v6503_v25 = vld [vmem:[%s6494_s3 + $0x28] sm:$0xff]  ;;  %5567 = vmatprep.subr.mxu0 %v6195_v1 }
 0x171   : > { %5988 = vrcp.f32 %v811_v26  ;;  %v6508_v26 = vld [vmem:[%s6494_s3 + $0x20] sm:$0xff] }
 0x17e   : > { %v5989_v28 = vpop.eup %5988 }
 0x17f   : > { %v817_v29 = vmul.f32 %v5989_v28, %v6386_v27  ;;  %v824_v39 = vsub.f32 1.0, %v5989_v28  ;;  %v830_v41 = vmul.f32 0.0, %v5989_v28  ;;  %v6515_v28 = vld [vmem:[%s6494_s3 + $0x18] sm:$0xff] }
 0x181   : > { %819 = vrot.lane.b32.xlu1 %v817_v29, %s7757_s16  ;;  %s7777_s16 = smov 32   ;;  %v6521_v29 = vld [vmem:[%s6494_s3 + $0x10] sm:$0xff] }
 0x1f3   : > { %v820_v33 = vpop.permute.xlu1 %819 }
 0x1f4   : > { %v822_v34 = vadd.f32 %v820_v33, %v798_v21  ;;  %v6528_v33 = vld [vmem:[%s6494_s3 + $0x8] sm:$0xff] }
 0x1f6   : > { %5990 = vtanh.f32 %v822_v34 }
 0x203   : > { %v5991_v38 = vpop.eup %5990 }
 0x204   : > { %826 = vrot.lane.b32.xlu1 %v5991_v38, %s7755_s23  ;;  %s7759_s23 = smov 127  }
 0x276   : > { %v827_v40 = vpop.permute.xlu1 %826 }
 0x277   : > { %v829_v42 = vmul.f32 %v827_v40, %v824_v39  ;;  %v6549_v39 = vld [vmem:[%s6494_s3] sm:$0xff] }
 0x279   : > { %v831_v43 = vadd.f32 %v830_v41, %v829_v42 }
 0x27b   : > { %v832_v44 = vsel %vm723_vm1, %v703_v15, %v831_v43  ;;  %v1031_v17 = vrot.slane %v831_v43, 6 }
 0x27c   : > { %v833_v46 = vsel %vm725_vm2, %v832_v44, %v722_v16 }
 0x27d   : > { %5506 = vmatmul.mubr.msk.f32.vlgmr.msra.gmra.mxu1 %vm727_vm3, %v833_v46  ;;  %v1033_v20 = vsel %vm710_vm4, %v831_v43, %v1031_v17 }
 0x27e   : > { %5509 = vmatpush3.msra.mxu1 %v6435_v45  ;;  %5512 = vmatprep.mubr.msk.f32.mxu1 %vm6197_vm0, %v6195_v1 }
 0x27f   : > { %5510 = vmatprep.subr.mxu1 %v6195_v1 }
 0x280   : > { %5511 = vmatpush3.msra.mxu1 %v6440_v47 }
 0x281   : > { %5513 = vmatmul.mubr.f32.vlgmr.msra.gmra.mxu1 %v6195_v1  ;;  %5515 = vmatprep.subr.mxu1 %v6195_v1 }
 0x282   : > { %5527 = vmatprep.mubr.msk.f32.mxu1 %vm6197_vm0, %v6195_v1  ;;  %5516 = vmatpush3.msra.mxu1 %v6503_v25 }
 0x283   : > { %5517 = vmatprep.subr.mxu1 %v6195_v1 }
 0x284   : > { %5518 = vmatpush3.msra.mxu1 %v6508_v26 }
 0x285   : > { %5519 = vmatprep.subr.mxu1 %v6195_v1 }
 0x286   : > { %5520 = vmatpush3.msra.mxu1 %v6515_v28 }
 0x287   : > { %5521 = vmatprep.subr.mxu1 %v6195_v1 }
 0x288   : > { %5522 = vmatpush3.msra.mxu1 %v6521_v29 }
 0x289   : > { %5523 = vmatprep.subr.mxu1 %v6195_v1 }
 0x28a   : > { %5524 = vmatpush3.msra.mxu1 %v6528_v33 }
 0x28b   : > { %5525 = vmatprep.subr.mxu1 %v6195_v1 }
 0x28c   : > { %5526 = vmatpush3.msra.mxu1 %v6549_v39 }
 0x28d   : > { %5552 = vmatprep.subr.mxu1 %v6195_v1 }
 0x33d   : > { %v903_v48 = vpop.f32.mrf.mxu1 }
 0x33e   : > { %v904_v56 = vadd.f32 %v6471_v55, %v903_v48 }
 0x33f   : > { %v5507_v49 = vpop.f32.mrf.mxu1 }
 0x340   : > { %v908_v57 = vrot.slane %v904_v56, 6 }
 0x341   : > { %v980_v51 = vpop.f32.mrf.mxu1 }
 0x342   : > { %v981_v52 = vadd.f32 %v6458_v50, %v980_v51  ;;  %v910_v58 = vsel %vm710_vm4, %v904_v56, %v908_v57  ;;  %v1183_v56 = vpop.f32.mrf.mxu0 }
 0x343   : > { %v5514_v53 = vpop.f32.mrf.mxu1 }
 0x344   : > { %992 = vrot.lane.b32.xlu0 %v981_v52, %s7761_s21  ;;  %v984_v59 = vadd.f32 %v981_v52, %v910_v58  ;;  %s7778_s21 = smov 112  }
 0x346   : > { %v5175_v60 = vmul.f32 -1.442695, %v984_v59 }
 0x348   : > { %707 = vrot.lane.b32.xlu0 %v706_v54, %s7759_s23  ;;  %5992 = vpow2.f32 %v5175_v60  ;;  %v6567_v54 = vld [vmem:[%s6564_s28] ss:$0 sm:$0xff]  ;;  %s7779_s23 = smov 96  }
 0x349   : > { %v1184_v57 = vadd.f32 %v6567_v54, %v1183_v56 }
 0x355   : > { %v5993_v61 = vpop.eup %5992 }
 0x356   : > { %v988_v62 = vadd.f32 1.0, %v5993_v61 }
 0x358   : > { %5994 = vrcp.f32 %v988_v62 }
 0x365   : > { %v6475_v63 = vpop.eup %5994 }
 0x366   : > { %v1002_v38 = vsub.f32 1.0, %v6475_v63  ;;  %v1008_v41 = vmul.f32 0.0, %v6475_v63 }
 0x3b6   : > { %v993_v13 = vpop.permute.xlu0 %992 }
 0x3b7   : > { %v995_v14 = vmul.f32 %v6475_v63, %v993_v13 }
 0x3b9   : > { %997 = vrot.lane.b32.xlu1 %v995_v14, %s7777_s16 }
 0x3ba   : > { %v708_v15 = vpop.permute.xlu0 %707 }
 0x3bb   : > { %v711_v16 = vsel %vm710_vm4, %v6300_v2, %v708_v15 }
 0x3bc   : > { %1019 = vperm.xlu0 %5971, %v711_v16   ;;  %v1010_v18 = vsub.f32 1.0, %v711_v16 }
 0x3be   : > { %1013 = vperm.xlu1 %5970, %v1010_v18  }
 0x3c0   : > { %1039 = vrot.lane.b32.xlu0 %v1033_v20, %s7763_s19  ;;  %s6593_s19 = scalar_lea.vmem %s7752_s11, %s7785_s26  ;;  %s7780_s26 = smov 16  }
 0x3c1   : > { %5972 = vset.pattern.permute.xlu0 %v7767_v6  ;;  %v6596_v63 = vld [vmem:[%s6593_s19] ss:$0 sm:$0xff] }
 0x42b   : > { %v998_v21 = vpop.permute.xlu1 %997 }
 0x42c   : > { %v1000_v22 = vadd.f32 %v998_v21, %v910_v58  ;;  %v5536_v58 = vpop.f32.mrf.mxu0 }
 0x42e   : > { %5996 = vtanh.f32 %v1000_v22 }
 0x437   : > { %v1020_v44 = vpop.permute.xlu0 %1019 }
 0x439   : > { %v1014_v34 = vpop.permute.xlu1 %1013 }
 0x43a   : > { %v1016_v46 = vmul.f32 0.0, %v1014_v34  ;;  %v6601_v34 = vld [vmem:[%s6297_s14 + $0x2] sm:$0x3] }
 0x43b   : > { %v5997_v2 = vpop.eup %5996  ;;  %v1040_v60 = vpop.permute.xlu0 %1039 }
 0x43c   : > { %1004 = vrot.lane.b32.xlu1 %v5997_v2, %s7778_s21 }
 0x4ae   : > { %v1005_v40 = vpop.permute.xlu1 %1004 }
 0x4af   : > { %v1007_v42 = vmul.f32 %v1005_v40, %v1002_v38 }
 0x4b1   : > { %v1009_v43 = vadd.f32 %v1008_v41, %v1007_v42 }
 0x4b3   : > { %v1022_v48 = vmul.f32 %v1020_v44, %v1009_v43 }
 0x4b5   : > { %v6554_v49 = vadd.f32 %v1022_v48, %v1016_v46 }
 0x4b7   : > { %v1025_v51 = vrot.slane %v6554_v49, 2  ;;  %v1027_v52 = vrot.slane %v6554_v49, 6 }
 0x4b9   : > { %v1029_v53 = vsel %vm710_vm4, %v1025_v51, %v1027_v52 }
 0x4ba   : > { %1035 = vrot.lane.b32.xlu1 %v1029_v53, %s7778_s21 }
 0x4be   : > { %1195 = vrot.lane.b32.xlu1 %v1184_v57, %s7779_s23 }
 0x52c   : > { %v1036_v59 = vpop.permute.xlu1 %1035 }
 0x52d   : > { %v1042_v61 = vsel %vm723_vm1, %v1036_v59, %v6554_v49 }
 0x52e   : > { %v1043_v62 = vsel %vm725_vm2, %v1042_v61, %v1040_v60 }
 0x52f   : > { %5528 = vmatmul.mubr.msk.f32.vlgmr.msra.gmra.mxu1 %vm727_vm3, %v1043_v62 }
 0x530   : > { %5553 = vmatpush3.msra.mxu1 %v6397_v30  ;;  %5564 = vmatprep.mubr.msk.f32.mxu1 %vm6197_vm0, %v6195_v1  ;;  %v1196_v21 = vpop.permute.xlu1 %1195 }
 0x531   : > { %5554 = vmatprep.subr.mxu1 %v6195_v1 }
 0x532   : > { %5555 = vmatpush3.msra.mxu1 %v6400_v31 }
 0x533   : > { %5556 = vmatprep.subr.mxu1 %v6195_v1 }
 0x534   : > { %5557 = vmatpush3.msra.mxu1 %v6405_v32 }
 0x535   : > { %5558 = vmatprep.subr.mxu1 %v6195_v1 }
 0x536   : > { %5559 = vmatpush3.msra.mxu1 %v6412_v35 }
 0x537   : > { %5560 = vmatprep.subr.mxu1 %v6195_v1 }
 0x538   : > { %5561 = vmatpush3.msra.mxu1 %v6417_v36 }
 0x539   : > { %5562 = vmatprep.subr.mxu1 %v6195_v1 }
 0x53a   : > { %5563 = vmatpush3.msra.mxu1 %v6420_v37 }
 0x53b   : > { %5589 = vmatprep.subr.mxu1 %v6195_v1 }
 0x5ef   : > { %v1113_v13 = vpop.f32.mrf.mxu1 }
 0x5f0   : > { %v1114_v14 = vadd.f32 %v6596_v63, %v1113_v13 }
 0x5f1   : > { %v5529_v15 = vpop.f32.mrf.mxu1 }
 0x5f2   : > { %v1187_v16 = vadd.f32 %v1184_v57, %v1114_v14 }
 0x5f4   : > { %v5177_v17 = vmul.f32 -1.442695, %v1187_v16  ;;  %v5178_v16 = vld [vmem:[%s6363_s24 + $0x2] sm:$0x3] }
 0x5f6   : > { %5998 = vpow2.f32 %v5177_v17 }
 0x603   : > { %v5999_v18 = vpop.eup %5998 }
 0x604   : > { %v1191_v20 = vadd.f32 1.0, %v5999_v18 }
 0x606   : > { %6000 = vrcp.f32 %v1191_v20 }
 0x613   : > { %v6001_v22 = vpop.eup %6000 }
 0x614   : > { %v1198_v2 = vmul.f32 %v6001_v22, %v1196_v21  ;;  %v1205_v42 = vsub.f32 1.0, %v6001_v22  ;;  %v1211_v48 = vmul.f32 0.0, %v6001_v22 }
 0x616   : > { %1200 = vrot.lane.b32.xlu0 %v1198_v2, %s7777_s16 }
 0x61a   : > { %1245 = vperm.xlu0 %5972, %v6601_v34  }
 0x61e   : > { %5973 = vset.pattern.permute.xlu0 %v7765_v0 }
 0x688   : > { %v1201_v38 = vpop.permute.xlu0 %1200 }
 0x689   : > { %v1203_v40 = vadd.f32 %v1201_v38, %v1114_v14 }
 0x68b   : > { %6002 = vtanh.f32 %v1203_v40 }
 0x695   : > { %v1246_v53 = vpop.permute.xlu0 %1245 }
 0x696   : > { %v6609_v58 = vrot.slane %v1246_v53, 6 }
 0x698   : > { %v6003_v41 = vpop.eup %6002 }
 0x699   : > { %1207 = vrot.lane.b32.xlu1 %v6003_v41, %s7778_s21 }
 0x69d   : > { %1240 = vperm.xlu1 %5970, %v6601_v34  }
 0x70b   : > { %v1208_v43 = vpop.permute.xlu1 %1207 }
 0x70c   : > { %v1210_v51 = vmul.f32 %v1208_v43, %v1205_v42 }
 0x70e   : > { %v1212_v52 = vadd.f32 %v1211_v48, %v1210_v51  ;;  %v1234_v51 = vrot.slane %v6601_v34, 6 }
 0x710   : > { %v1213_v56 = vmul.f32 %v1212_v52, %v1020_v44  ;;  %v1249_v44 = vmul.f32 %v6609_v58, %v6554_v49 }
 0x712   : > { %v6607_v57 = vadd.f32 %v1213_v56, %v1016_v46  ;;  %v1251_v14 = vrot.slane %v1249_v44, 2 }
 0x714   : > { %v1255_v59 = vmul.f32 %v6609_v58, %v6607_v57 }
 0x716   : > { %v1257_v62 = vrot.slane %v1255_v59, 2 }
 0x718   : > { %v6613_v60 = vpop.permute.xlu1 %1240 }
 0x719   : > { %v1254_v61 = vmul.f32 %v6613_v60, %v6607_v57  ;;  %v1243_v46 = vmul.f32 %v6613_v60, %v6554_v49 }
 0x71b   : > { %v1259_v13 = vadd.f32 %v1257_v62, %v1254_v61  ;;  %v1253_v15 = vadd.f32 %v1251_v14, %v1243_v46 }
 0x71d   : > { %1261 = vrot.lane.b32.xlu1 %v1259_v13, %s7780_s26  ;;  %v1264_v18 = vsel %vm723_vm1, %v5178_v16, %v1253_v15 }
 0x721   : > { %1440 = vrot.lane.b32.xlu1 %v6554_v49, %s7778_s21 }
 0x78f   : > { %v1262_v17 = vpop.permute.xlu1 %1261 }
 0x790   : > { %v1265_v20 = vsel %vm725_vm2, %v1264_v18, %v1262_v17 }
 0x791   : > { %5550 = vmatmul.mubr.msk.f32.vlgmr.msra.gmra.mxu0 %vm727_vm3, %v1265_v20 }
 0x792   : > { %5568 = vmatpush3.msra.mxu0 %v6435_v45  ;;  %5571 = vmatprep.mubr.msk.f32.mxu0 %vm6197_vm0, %v6195_v1 }
 0x793   : > { %v1441_v21 = vpop.permute.xlu1 %1440  ;;  %5569 = vmatprep.subr.mxu0 %v6195_v1 }
 0x794   : > { %5570 = vmatpush3.msra.mxu0 %v6440_v47 }
 0x795   : > { %5572 = vmatmul.mubr.msk.f32.vlgmr.msra.gmra.mxu0 %vm723_vm1, %v1441_v21  ;;  %5574 = vmatprep.subr.mxu0 %v6195_v1 }
 0x796   : > { %5575 = vmatpush3.msra.mxu0 %v6503_v25  ;;  %5586 = vmatprep.mubr.msk.f32.mxu0 %vm6197_vm0, %v6195_v1 }
 0x797   : > { %5576 = vmatprep.subr.mxu0 %v6195_v1 }
 0x798   : > { %5577 = vmatpush3.msra.mxu0 %v6508_v26 }
 0x799   : > { %5578 = vmatprep.subr.mxu0 %v6195_v1 }
 0x79a   : > { %5579 = vmatpush3.msra.mxu0 %v6515_v28 }
 0x79b   : > { %5580 = vmatprep.subr.mxu0 %v6195_v1 }
 0x79c   : > { %5581 = vmatpush3.msra.mxu0 %v6521_v29 }
 0x79d   : > { %5582 = vmatprep.subr.mxu0 %v6195_v1 }
 0x79e   : > { %5583 = vmatpush3.msra.mxu0 %v6528_v33 }
 0x79f   : > { %5584 = vmatprep.subr.mxu0 %v6195_v1 }
 0x7a0   : > { %5585 = vmatpush3.msra.mxu0 %v6549_v39 }
 0x7a1   : > { %5611 = vmatprep.subr.mxu0 %v6195_v1 }
 0x851   : > { %v1335_v22 = vpop.f32.mrf.mxu0 }
 0x852   : > { %v1336_v2 = vadd.f32 %v6382_v19, %v1335_v22 }
 0x853   : > { %v5551_v38 = vpop.f32.mrf.mxu0 }
 0x854   : > { %v1339_v40 = vadd.f32 %v6348_v10, %v1336_v2 }
 0x855   : > { %v1510_v41 = vpop.f32.mrf.mxu0 }
 0x856   : > { %v5181_v42 = vmul.f32 -1.442695, %v1339_v40  ;;  %v1511_v43 = vadd.f32 %v6458_v50, %v1510_v41 }
 0x857   : > { %v5573_v48 = vpop.f32.mrf.mxu0 }
 0x858   : > { %6004 = vpow2.f32 %v5181_v42  ;;  %1522 = vrot.lane.b32.xlu1 %v1511_v43, %s7779_s23 }
 0x85c   : > { %1235 = vrot.lane.b32.xlu1 %v1234_v51, %s7781_s1 }
 0x865   : > { %v6005_v52 = vpop.eup %6004 }
 0x866   : > { %v1343_v53 = vadd.f32 1.0, %v6005_v52 }
 0x868   : > { %6006 = vrcp.f32 %v1343_v53 }
 0x875   : > { %v6007_v56 = vpop.eup %6006 }
 0x876   : > { %v1346_v59 = vmul.f32 %v6007_v56, %v6386_v27  ;;  %v1353_v15 = vsub.f32 1.0, %v6007_v56  ;;  %v1359_v20 = vmul.f32 0.0, %v6007_v56 }
 0x878   : > { %1348 = vrot.lane.b32.xlu0 %v1346_v59, %s7777_s16 }
 0x8ca   : > { %v1523_v61 = vpop.permute.xlu1 %1522 }
 0x8ce   : > { %v1236_v62 = vpop.permute.xlu1 %1235 }
 0x8cf   : > { %v1238_v13 = vsel %vm710_vm4, %v6601_v34, %v1236_v62 }
 0x8d0   : > { %1549 = vperm.xlu1 %5970, %v1238_v13   ;;  %v1540_v59 = vsub.f32 1.0, %v1238_v13 }
 0x8ea   : > { %v1349_v44 = vpop.permute.xlu0 %1348 }
 0x8eb   : > { %v1351_v46 = vadd.f32 %v1349_v44, %v1336_v2 }
 0x8ed   : > { %6008 = vtanh.f32 %v1351_v46 }
 0x8fa   : > { %v6009_v14 = vpop.eup %6008 }
 0x8fb   : > { %1355 = vrot.lane.b32.xlu0 %v6009_v14, %s7778_s21 }
 0x96d   : > { %v1356_v18 = vpop.permute.xlu0 %1355 }
 0x96e   : > { %v1358_v21 = vmul.f32 %v1356_v18, %v1353_v15 }
 0x970   : > { %v1360_v22 = vadd.f32 %v1359_v20, %v1358_v21 }
 0x972   : > { %v1361_v38 = vsel %vm723_vm1, %v5178_v16, %v1360_v22  ;;  %v1561_v62 = vrot.slane %v1360_v22, 6 }
 0x973   : > { %v1362_v40 = vsel %vm725_vm2, %v1361_v38, %v1262_v17 }
 0x974   : > { %5565 = vmatmul.mubr.msk.f32.vlgmr.msra.gmra.mxu1 %vm727_vm3, %v1362_v40  ;;  %v1563_v44 = vsel %vm710_vm4, %v1360_v22, %v1561_v62 }
 0x975   : > { %5590 = vmatpush3.msra.mxu1 %v6497_v23  ;;  %5593 = vmatprep.mubr.msk.f32.mxu1 %vm6197_vm0, %v6195_v1 }
 0x976   : > { %5591 = vmatprep.subr.mxu1 %v6195_v1 }
 0x977   : > { %5592 = vmatpush3.msra.mxu1 %v6500_v24 }
 0x978   : > { %5596 = vmatprep.subr.mxu1 %v6195_v1 }
 0xa34   : > { %v1432_v34 = vpop.f32.mrf.mxu1 }
 0xa35   : > { %v1433_v2 = vadd.f32 %v6471_v55, %v1432_v34 }
 0xa36   : > { %v5566_v41 = vpop.f32.mrf.mxu1 }
 0xa37   : > { %v1437_v16 = vrot.slane %v1433_v2, 6 }
 0xa39   : > { %v1439_v17 = vsel %vm710_vm4, %v1433_v2, %v1437_v16 }
 0xa3a   : > { %v1514_v42 = vadd.f32 %v1511_v43, %v1439_v17 }
 0xa3c   : > { %v5184_v48 = vmul.f32 -1.442695, %v1514_v42 }
 0xa3e   : > { %6010 = vpow2.f32 %v5184_v48 }
 0xa4b   : > { %v6011_v51 = vpop.eup %6010 }
 0xa4c   : > { %v1518_v52 = vadd.f32 1.0, %v6011_v51 }
 0xa4e   : > { %6012 = vrcp.f32 %v1518_v52 }
 0xa5b   : > { %v6013_v53 = vpop.eup %6012 }
 0xa5c   : > { %v1525_v56 = vmul.f32 %v6013_v53, %v1523_v61 }
 0xa5e   : > { %1527 = vrot.lane.b32.xlu0 %v1525_v56, %s7777_s16  ;;  %v6730_v56 = vld [vmem:[%s6297_s14 + $0x4] sm:$0x3] }
 0xa62   : > { %1543 = vperm.xlu0 %5973, %v1540_v59  }
 0xa66   : > { %1648 = vrot.lane.b32.xlu0 %v6607_v57, %s7778_s21 }
 0xa67   : > { %5974 = vset.pattern.permute.xlu0 %v7767_v6 }
 0xa6a   : > { %1569 = vrot.lane.b32.xlu0 %v1563_v44, %s7780_s26 }
 0xad0   : > { %v1528_v43 = vpop.permute.xlu0 %1527 }
 0xad1   : > { %v1530_v46 = vadd.f32 %v1528_v43, %v1439_v17 }
 0xad3   : > { %6014 = vtanh.f32 %v1530_v46 }
 0xadd   : > { %v6677_v14 = vpop.permute.xlu0 %1543 }
 0xae0   : > { %v6015_v61 = vpop.eup %6014 }
 0xae1   : > { %1534 = vrot.lane.b32.xlu1 %v6015_v61, %s7778_s21  ;;  %v1649_v13 = vpop.permute.xlu0 %1648 }
 0xae2   : > { %5594 = vmatmul.mubr.msk.f32.vlgmr.msra.gmra.mxu1 %vm723_vm1, %v1649_v13 }
 0xae3   : > { %5597 = vmatpush3.msra.mxu1 %v6310_v3  ;;  %5608 = vmatprep.mubr.msk.f32.mxu1 %vm6197_vm0, %v6195_v1  ;;  %v6695_v3 = vpop.permute.xlu1 %1549 }
 0xae4   : > { %5598 = vmatprep.subr.mxu1 %v6195_v1 }
 0xae5   : > { %5599 = vmatpush3.msra.mxu1 %v6313_v4  ;;  %v1532_v4 = vsub.f32 1.0, %v6013_v53 }
 0xae6   : > { %5600 = vmatprep.subr.mxu1 %v6195_v1 }
 0xae7   : > { %5601 = vmatpush3.msra.mxu1 %v6318_v5  ;;  %v1538_v5 = vmul.f32 %v6013_v53, %v6554_v49 }
 0xae8   : > { %5602 = vmatprep.subr.mxu1 %v6195_v1 }
 0xae9   : > { %5603 = vmatpush3.msra.mxu1 %v6324_v7  ;;  %v1546_v7 = vmul.f32 %v6677_v14, %v6554_v49  ;;  %v1570_v49 = vpop.permute.xlu0 %1569 }
 0xaea   : > { %5604 = vmatprep.subr.mxu1 %v6195_v1 }
 0xaeb   : > { %5605 = vmatpush3.msra.mxu1 %v6330_v8 }
 0xaec   : > { %5606 = vmatprep.subr.mxu1 %v6195_v1 }
 0xaed   : > { %5607 = vmatpush3.msra.mxu1 %v6345_v9 }
 0xaee   : > { %5626 = vmatprep.subr.mxu1 %v6195_v1 }
 0xb53   : > { %v1535_v15 = vpop.permute.xlu1 %1534 }
 0xb54   : > { %v1537_v18 = vmul.f32 %v1535_v15, %v1532_v4  ;;  %v1748_v4 = vmul.f32 %v6677_v14, %v6607_v57 }
 0xb56   : > { %v1539_v20 = vadd.f32 %v1538_v5, %v1537_v18 }
 0xb58   : > { %v1552_v21 = vmul.f32 %v6695_v3, %v1539_v20 }
 0xb5a   : > { %v6701_v8 = vadd.f32 %v1552_v21, %v1546_v7 }
 0xb5c   : > { %v1555_v22 = vrot.slane %v6701_v8, 2  ;;  %v1557_v9 = vrot.slane %v6701_v8, 6 }
 0xb5e   : > { %v1559_v38 = vsel %vm710_vm4, %v1555_v22, %v1557_v9 }
 0xb5f   : > { %1565 = vrot.lane.b32.xlu1 %v1559_v38, %s7778_s21 }
 0xba2   : > { %v1718_v40 = vpop.f32.mrf.mxu1 }
 0xba3   : > { %v1719_v34 = vadd.f32 %v6567_v54, %v1718_v40 }
 0xba4   : > { %v5595_v2 = vpop.f32.mrf.mxu1 }
 0xba5   : > { %1730 = vrot.lane.b32.xlu1 %v1719_v34, %s7779_s23  ;;  %v5189_v2 = vld [vmem:[%s6363_s24 + $0x4] sm:$0x3] }
 0xbd1   : > { %v1566_v41 = vpop.permute.xlu1 %1565 }
 0xbd2   : > { %v1572_v16 = vsel %vm723_vm1, %v1566_v41, %v6701_v8 }
 0xbd3   : > { %v1573_v17 = vsel %vm725_vm2, %v1572_v16, %v1570_v49 }
 0xbd4   : > { %5587 = vmatmul.mubr.msk.f32.vlgmr.msra.gmra.mxu0 %vm727_vm3, %v1573_v17 }
 0xbd5   : > { %5612 = vmatpush3.msra.mxu0 %v6397_v30  ;;  %5623 = vmatprep.mubr.msk.f32.mxu0 %vm6197_vm0, %v6195_v1 }
 0xbd6   : > { %5613 = vmatprep.subr.mxu0 %v6195_v1 }
 0xbd7   : > { %5614 = vmatpush3.msra.mxu0 %v6400_v31 }
 0xbd8   : > { %5615 = vmatprep.subr.mxu0 %v6195_v1 }
 0xbd9   : > { %5616 = vmatpush3.msra.mxu0 %v6405_v32 }
 0xbda   : > { %5617 = vmatprep.subr.mxu0 %v6195_v1 }
 0xbdb   : > { %5618 = vmatpush3.msra.mxu0 %v6412_v35 }
 0xbdc   : > { %5619 = vmatprep.subr.mxu0 %v6195_v1 }
 0xbdd   : > { %5620 = vmatpush3.msra.mxu0 %v6417_v36 }
 0xbde   : > { %5621 = vmatprep.subr.mxu0 %v6195_v1 }
 0xbdf   : > { %5622 = vmatpush3.msra.mxu0 %v6420_v37 }
 0xbe0   : > { %5648 = vmatprep.subr.mxu0 %v6195_v1 }
 0xc17   : > { %v1731_v53 = vpop.permute.xlu1 %1730 }
 0xc94   : > { %v1643_v30 = vpop.f32.mrf.mxu0 }
 0xc95   : > { %v1644_v31 = vadd.f32 %v6596_v63, %v1643_v30 }
 0xc96   : > { %v5588_v42 = vpop.f32.mrf.mxu0 }
 0xc97   : > { %v1722_v32 = vadd.f32 %v1719_v34, %v1644_v31 }
 0xc99   : > { %v5187_v48 = vmul.f32 -1.442695, %v1722_v32 }
 0xc9b   : > { %6016 = vpow2.f32 %v5187_v48 }
 0xca8   : > { %v6017_v51 = vpop.eup %6016 }
 0xca9   : > { %v1726_v35 = vadd.f32 1.0, %v6017_v51 }
 0xcab   : > { %6018 = vrcp.f32 %v1726_v35  ;;  %v1768_v35 = vrot.slane %v6730_v56, 6 }
 0xcb8   : > { %v6019_v52 = vpop.eup %6018 }
 0xcb9   : > { %v1733_v36 = vmul.f32 %v6019_v52, %v1731_v53  ;;  %v1740_v44 = vsub.f32 1.0, %v6019_v52  ;;  %v1746_v46 = vmul.f32 %v6019_v52, %v6607_v57 }
 0xcbb   : > { %1735 = vrot.lane.b32.xlu0 %v1733_v36, %s7777_s16 }
 0xcbf   : > { %1779 = vperm.xlu0 %5974, %v6730_v56  }
 0xcc3   : > { %5975 = vset.pattern.permute.xlu0 %v7765_v0 }
 0xd2d   : > { %v1736_v37 = vpop.permute.xlu0 %1735 }
 0xd2e   : > { %v1738_v59 = vadd.f32 %v1736_v37, %v1644_v31 }
 0xd30   : > { %6020 = vtanh.f32 %v1738_v59 }
 0xd3a   : > { %v1780_v15 = vpop.permute.xlu0 %1779 }
 0xd3b   : > { %v6742_v20 = vrot.slane %v1780_v15, 6 }
 0xd3d   : > { %v6021_v62 = vpop.eup %6020  ;;  %v1783_v14 = vmul.f32 %v6742_v20, %v6701_v8 }
 0xd3e   : > { %1742 = vrot.lane.b32.xlu1 %v6021_v62, %s7778_s21 }
 0xd3f   : > { %v1785_v40 = vrot.slane %v1783_v14, 2 }
 0xd42   : > { %1774 = vperm.xlu1 %5970, %v6730_v56  }
 0xdb0   : > { %v1743_v43 = vpop.permute.xlu1 %1742 }
 0xdb1   : > { %v1745_v61 = vmul.f32 %v1743_v43, %v1740_v44 }
 0xdb3   : > { %v1747_v13 = vadd.f32 %v1746_v46, %v1745_v61 }
 0xdb5   : > { %v1749_v5 = vmul.f32 %v1747_v13, %v6695_v3 }
 0xdb7   : > { %v6740_v18 = vadd.f32 %v1749_v5, %v1748_v4 }
 0xdb9   : > { %v1789_v7 = vmul.f32 %v6742_v20, %v6740_v18 }
 0xdbb   : > { %v1791_v9 = vrot.slane %v1789_v7, 2 }
 0xdbd   : > { %v6746_v21 = vpop.permute.xlu1 %1774 }
 0xdbe   : > { %v1788_v22 = vmul.f32 %v6746_v21, %v6740_v18  ;;  %v1777_v3 = vmul.f32 %v6746_v21, %v6701_v8 }
 0xdc0   : > { %v1793_v38 = vadd.f32 %v1791_v9, %v1788_v22  ;;  %v1787_v34 = vadd.f32 %v1785_v40, %v1777_v3 }
 0xdc2   : > { %1795 = vrot.lane.b32.xlu1 %v1793_v38, %s7780_s26  ;;  %v1798_v49 = vsel %vm723_vm1, %v5189_v2, %v1787_v34 }
 0xdc6   : > { %1974 = vrot.lane.b32.xlu1 %v6701_v8, %s7778_s21 }
 0xe34   : > { %v1796_v41 = vpop.permute.xlu1 %1795 }
 0xe35   : > { %v1799_v16 = vsel %vm725_vm2, %v1798_v49, %v1796_v41 }
 0xe36   : > { %5609 = vmatmul.mubr.msk.f32.vlgmr.msra.gmra.mxu1 %vm727_vm3, %v1799_v16 }
 0xe37   : > { %5627 = vmatpush3.msra.mxu1 %v6435_v45  ;;  %5630 = vmatprep.mubr.msk.f32.mxu1 %vm6197_vm0, %v6195_v1 }
 0xe38   : > { %v1975_v17 = vpop.permute.xlu1 %1974  ;;  %5628 = vmatprep.subr.mxu1 %v6195_v1 }
 0xe39   : > { %5629 = vmatpush3.msra.mxu1 %v6440_v47 }
 0xe3a   : > { %5631 = vmatmul.mubr.msk.f32.vlgmr.msra.gmra.mxu1 %vm723_vm1, %v1975_v17  ;;  %5633 = vmatprep.subr.mxu1 %v6195_v1 }
 0xe3b   : > { %5634 = vmatpush3.msra.mxu1 %v6503_v25  ;;  %5645 = vmatprep.mubr.msk.f32.mxu1 %vm6197_vm0, %v6195_v1 }
 0xe3c   : > { %5635 = vmatprep.subr.mxu1 %v6195_v1 }
 0xe3d   : > { %5636 = vmatpush3.msra.mxu1 %v6508_v26 }
 0xe3e   : > { %5637 = vmatprep.subr.mxu1 %v6195_v1 }
 0xe3f   : > { %5638 = vmatpush3.msra.mxu1 %v6515_v28 }
 0xe40   : > { %5639 = vmatprep.subr.mxu1 %v6195_v1 }
 0xe41   : > { %5640 = vmatpush3.msra.mxu1 %v6521_v29 }
 0xe42   : > { %5641 = vmatprep.subr.mxu1 %v6195_v1 }
 0xe43   : > { %5642 = vmatpush3.msra.mxu1 %v6528_v33 }
 0xe44   : > { %5643 = vmatprep.subr.mxu1 %v6195_v1 }
 0xe45   : > { %5644 = vmatpush3.msra.mxu1 %v6549_v39 }
 0xe46   : > { %5670 = vmatprep.subr.mxu1 %v6195_v1 }
 0xef6   : > { %v1869_v45 = vpop.f32.mrf.mxu1 }
 0xef7   : > { %v1870_v47 = vadd.f32 %v6382_v19, %v1869_v45 }
 0xef8   : > { %v5610_v30 = vpop.f32.mrf.mxu1 }
 0xef9   : > { %v1873_v31 = vadd.f32 %v6348_v10, %v1870_v47  ;;  %v6815_v30 = vld [vmem:[%s6306_s17 + $0x28] sm:$0xff] }
 0xefa   : > { %v2044_v42 = vpop.f32.mrf.mxu1 }
 0xefb   : > { %v5192_v32 = vmul.f32 -1.442695, %v1873_v31  ;;  %v2045_v48 = vadd.f32 %v6458_v50, %v2044_v42  ;;  %v6822_v31 = vld [vmem:[%s6306_s17 + $0x20] sm:$0xff]  ;;  %v6827_v42 = vld [vmem:[%s6306_s17 + $0x18] sm:$0xff] }
 0xefc   : > { %v5632_v51 = vpop.f32.mrf.mxu1 }
 0xefd   : > { %6022 = vpow2.f32 %v5192_v32  ;;  %2056 = vrot.lane.b32.xlu1 %v2045_v48, %s7779_s23  ;;  %v6832_v32 = vld [vmem:[%s6306_s17 + $0x10] sm:$0xff]  ;;  %v6842_v51 = vld [vmem:[%s6306_s17] sm:$0xff] }
 0xf01   : > { %1769 = vrot.lane.b32.xlu1 %v1768_v35, %s7781_s1 }
 0xf0a   : > { %v6023_v52 = vpop.eup %6022 }
 0xf0b   : > { %v1877_v53 = vadd.f32 1.0, %v6023_v52 }
 0xf0d   : > { %6024 = vrcp.f32 %v1877_v53 }
 0xf1a   : > { %v6025_v36 = vpop.eup %6024 }
 0xf1b   : > { %v1880_v19 = vmul.f32 %v6025_v36, %v6386_v27  ;;  %v1887_v43 = vsub.f32 1.0, %v6025_v36  ;;  %v1893_v61 = vmul.f32 0.0, %v6025_v36 }
 0xf1d   : > { %1882 = vrot.lane.b32.xlu0 %v1880_v19, %s7777_s16 }
 0xf6f   : > { %v2057_v10 = vpop.permute.xlu1 %2056 }
 0xf73   : > { %v1770_v37 = vpop.permute.xlu1 %1769 }
 0xf74   : > { %v1772_v50 = vsel %vm710_vm4, %v6730_v56, %v1770_v37 }
 0xf75   : > { %2083 = vperm.xlu1 %5970, %v1772_v50  }
 0xf8f   : > { %v1883_v59 = vpop.permute.xlu0 %1882 }
 0xf90   : > { %v1885_v62 = vadd.f32 %v1883_v59, %v1870_v47 }
 0xf92   : > { %6026 = vtanh.f32 %v1885_v62 }
 0xf9f   : > { %v6027_v44 = vpop.eup %6026 }
 0xfa0   : > { %1889 = vrot.lane.b32.xlu0 %v6027_v44, %s7778_s21 }
 0xff0   : > { %v6846_v35 = vpop.permute.xlu1 %2083 }
0x1012   : > { %v1890_v46 = vpop.permute.xlu0 %1889 }
0x1013   : > { %v1892_v13 = vmul.f32 %v1890_v46, %v1887_v43 }
0x1015   : > { %v1894_v4 = vadd.f32 %v1893_v61, %v1892_v13 }
0x1017   : > { %v1895_v15 = vsel %vm723_vm1, %v5189_v2, %v1894_v4 }
0x1018   : > { %v1896_v5 = vsel %vm725_vm2, %v1895_v15, %v1796_v41  ;;  %v2074_v41 = vsub.f32 1.0, %v1772_v50 }
0x1019   : > { %5624 = vmatmul.mubr.msk.f32.vlgmr.msra.gmra.mxu0 %vm727_vm3, %v1896_v5 }
0x101a   : > { %5649 = vmatpush3.msra.mxu0 %v6497_v23  ;;  %5652 = vmatprep.mubr.msk.f32.mxu0 %vm6197_vm0, %v6195_v1 }
0x101b   : > { %5650 = vmatprep.subr.mxu0 %v6195_v1 }
0x101c   : > { %5651 = vmatpush3.msra.mxu0 %v6500_v24  ;;  %v2095_v24 = vrot.slane %v1894_v4, 6 }
0x101d   : > { %5655 = vmatprep.subr.mxu0 %v6195_v1 }
0x10d9   : > { %v1966_v56 = vpop.f32.mrf.mxu0 }
0x10da   : > { %v1967_v7 = vadd.f32 %v6471_v55, %v1966_v56  ;;  %v2097_v55 = vsel %vm710_vm4, %v1894_v4, %v2095_v24  ;;  %v6865_v56 = vld [vmem:[%s6394_s22 + $0x28] sm:$0xff] }
0x10db   : > { %v5625_v22 = vpop.f32.mrf.mxu0 }
0x10dc   : > { %v1971_v9 = vrot.slane %v1967_v7, 6  ;;  %v6882_v22 = vld [vmem:[%s6394_s22 + $0x10] sm:$0xff] }
0x10de   : > { %v1973_v38 = vsel %vm710_vm4, %v1967_v7, %v1971_v9  ;;  %v6877_v7 = vld [vmem:[%s6394_s22 + $0x18] sm:$0xff]  ;;  %v6887_v9 = vld [vmem:[%s6394_s22 + $0x8] sm:$0xff] }
0x10df   : > { %v2048_v14 = vadd.f32 %v2045_v48, %v1973_v38  ;;  %v6837_v48 = vld [vmem:[%s6306_s17 + $0x8] sm:$0xff] }
0x10e1   : > { %v5195_v3 = vmul.f32 -1.442695, %v2048_v14 }
0x10e3   : > { %6028 = vpow2.f32 %v5195_v3 }
0x10f0   : > { %v6029_v23 = vpop.eup %6028 }
0x10f1   : > { %v2052_v40 = vadd.f32 1.0, %v6029_v23 }
0x10f3   : > { %6030 = vrcp.f32 %v2052_v40 }
0x1100   : > { %v6031_v34 = vpop.eup %6030 }
0x1101   : > { %v2059_v2 = vmul.f32 %v6031_v34, %v2057_v10  ;;  %v2066_v52 = vsub.f32 1.0, %v6031_v34  ;;  %v2072_v36 = vmul.f32 %v6031_v34, %v6701_v8 }
0x1103   : > { %2061 = vrot.lane.b32.xlu0 %v2059_v2, %s7777_s16 }
0x1107   : > { %2077 = vperm.xlu0 %5975, %v2074_v41  }
0x110b   : > { %2182 = vrot.lane.b32.xlu0 %v6740_v18, %s7778_s21 }
0x110c   : > { %5976 = vset.pattern.permute.xlu0 %v7767_v6 }
0x110f   : > { %2103 = vrot.lane.b32.xlu0 %v2097_v55, %s7780_s26 }
0x1175   : > { %v2062_v49 = vpop.permute.xlu0 %2061 }
0x1176   : > { %v2064_v16 = vadd.f32 %v2062_v49, %v1973_v38  ;;  %v6892_v38 = vld [vmem:[%s6394_s22] sm:$0xff] }
0x1178   : > { %6032 = vtanh.f32 %v2064_v16  ;;  %v6899_v16 = vld [vmem:[%s6297_s14 + $0x6] sm:$0x3] }
0x1182   : > { %v6810_v17 = vpop.permute.xlu0 %2077 }
0x1183   : > { %v2080_v37 = vmul.f32 %v6810_v17, %v6701_v8 }
0x1185   : > { %v6033_v45 = vpop.eup %6032 }
0x1186   : > { %2068 = vrot.lane.b32.xlu1 %v6033_v45, %s7778_s21  ;;  %v2183_v47 = vpop.permute.xlu0 %2182 }
0x1187   : > { %5653 = vmatmul.mubr.msk.f32.vlgmr.msra.gmra.mxu0 %vm723_vm1, %v2183_v47 }
0x1188   : > { %5656 = vmatpush3.msra.mxu0 %v6815_v30  ;;  %5667 = vmatprep.mubr.msk.f32.mxu0 %vm6197_vm0, %v6195_v1 }
0x1189   : > { %5657 = vmatprep.subr.mxu0 %v6195_v1 }
0x118a   : > { %5658 = vmatpush3.msra.mxu0 %v6822_v31  ;;  %v2104_v4 = vpop.permute.xlu0 %2103 }
0x118b   : > { %5659 = vmatprep.subr.mxu0 %v6195_v1 }
0x118c   : > { %5660 = vmatpush3.msra.mxu0 %v6827_v42 }
0x118d   : > { %5661 = vmatprep.subr.mxu0 %v6195_v1 }
0x118e   : > { %5662 = vmatpush3.msra.mxu0 %v6832_v32 }
0x118f   : > { %5663 = vmatprep.subr.mxu0 %v6195_v1 }
0x1190   : > { %5664 = vmatpush3.msra.mxu0 %v6837_v48 }
0x1191   : > { %5665 = vmatprep.subr.mxu0 %v6195_v1 }
0x1192   : > { %5666 = vmatpush3.msra.mxu0 %v6842_v51 }
0x1193   : > { %5685 = vmatprep.subr.mxu0 %v6195_v1 }
0x11f8   : > { %v2069_v53 = vpop.permute.xlu1 %2068 }
0x11f9   : > { %v2071_v19 = vmul.f32 %v2069_v53, %v2066_v52 }
0x11fb   : > { %v2073_v10 = vadd.f32 %v2072_v36, %v2071_v19 }
0x11fd   : > { %v2086_v50 = vmul.f32 %v6846_v35, %v2073_v10 }
0x11ff   : > { %v6852_v59 = vadd.f32 %v2086_v50, %v2080_v37  ;;  %v2282_v37 = vmul.f32 %v6810_v17, %v6740_v18 }
0x1201   : > { %v2089_v62 = vrot.slane %v6852_v59, 2  ;;  %v2091_v44 = vrot.slane %v6852_v59, 6 }
0x1203   : > { %v2093_v43 = vsel %vm710_vm4, %v2089_v62, %v2091_v44 }
0x1204   : > { %2099 = vrot.lane.b32.xlu1 %v2093_v43, %s7778_s21 }
0x1247   : > { %v2252_v46 = vpop.f32.mrf.mxu0 }
0x1248   : > { %v2253_v61 = vadd.f32 %v6567_v54, %v2252_v46  ;;  %v6872_v54 = vld [vmem:[%s6394_s22 + $0x20] sm:$0xff] }
0x1249   : > { %v5654_v13 = vpop.f32.mrf.mxu0 }
0x124a   : > { %2264 = vrot.lane.b32.xlu1 %v2253_v61, %s7779_s23 }
0x1276   : > { %v2100_v8 = vpop.permute.xlu1 %2099 }
0x1277   : > { %v2106_v15 = vsel %vm723_vm1, %v2100_v8, %v6852_v59 }
0x1278   : > { %v2107_v5 = vsel %vm725_vm2, %v2106_v15, %v2104_v4 }
0x1279   : > { %5646 = vmatmul.mubr.msk.f32.vlgmr.msra.gmra.mxu1 %vm727_vm3, %v2107_v5 }
0x127a   : > { %5671 = vmatpush3.msra.mxu1 %v6865_v56  ;;  %5682 = vmatprep.mubr.msk.f32.mxu1 %vm6197_vm0, %v6195_v1 }
0x127b   : > { %5672 = vmatprep.subr.mxu1 %v6195_v1 }
0x127c   : > { %5673 = vmatpush3.msra.mxu1 %v6872_v54 }
0x127d   : > { %5674 = vmatprep.subr.mxu1 %v6195_v1 }
0x127e   : > { %5675 = vmatpush3.msra.mxu1 %v6877_v7 }
0x127f   : > { %5676 = vmatprep.subr.mxu1 %v6195_v1 }
0x1280   : > { %5677 = vmatpush3.msra.mxu1 %v6882_v22 }
0x1281   : > { %5678 = vmatprep.subr.mxu1 %v6195_v1 }
0x1282   : > { %5679 = vmatpush3.msra.mxu1 %v6887_v9 }
0x1283   : > { %5680 = vmatprep.subr.mxu1 %v6195_v1 }
0x1284   : > { %5681 = vmatpush3.msra.mxu1 %v6892_v38 }
0x1285   : > { %5707 = vmatprep.subr.mxu1 %v6195_v1 }
0x12bc   : > { %v2265_v55 = vpop.permute.xlu1 %2264 }
0x1339   : > { %v2177_v14 = vpop.f32.mrf.mxu1 }
0x133a   : > { %v2178_v3 = vadd.f32 %v6596_v63, %v2177_v14  ;;  %v6927_v14 = vld [vmem:[%s6363_s24 + $0x6] sm:$0x3] }
0x133b   : > { %v5647_v23 = vpop.f32.mrf.mxu1 }
0x133c   : > { %v2256_v40 = vadd.f32 %v2253_v61, %v2178_v3 }
0x133e   : > { %v5198_v34 = vmul.f32 -1.442695, %v2256_v40 }
0x1340   : > { %6034 = vpow2.f32 %v5198_v34  ;;  %v6937_v34 = vld [vmem:[%s6431_s18 + $0x8] sm:$0xff] }
0x134d   : > { %v6035_v2 = vpop.eup %6034 }
0x134e   : > { %v2260_v41 = vadd.f32 1.0, %v6035_v2 }
0x1350   : > { %6036 = vrcp.f32 %v2260_v41  ;;  %v6944_v41 = vld [vmem:[%s6431_s18] sm:$0xff] }
0x135d   : > { %v6037_v24 = vpop.eup %6036 }
0x135e   : > { %v2267_v49 = vmul.f32 %v6037_v24, %v2265_v55  ;;  %v2274_v52 = vsub.f32 1.0, %v6037_v24  ;;  %v2280_v36 = vmul.f32 %v6037_v24, %v6740_v18  ;;  %v6968_v55 = vld [vmem:[%s6339_s20] ss:$0 sm:$0xff] }
0x1360   : > { %2269 = vrot.lane.b32.xlu0 %v2267_v49, %s7777_s16 }
0x1364   : > { %2313 = vperm.xlu0 %5976, %v6899_v16  }
0x1368   : > { %5977 = vset.pattern.permute.xlu0 %v7765_v0 }
0x13d2   : > { %v2270_v45 = vpop.permute.xlu0 %2269 }
0x13d3   : > { %v2272_v63 = vadd.f32 %v2270_v45, %v2178_v3 }
0x13d5   : > { %6038 = vtanh.f32 %v2272_v63  ;;  %v6972_v63 = vld [vmem:[%s6455_s30] ss:$0 sm:$0xff] }
0x13df   : > { %v2314_v50 = vpop.permute.xlu0 %2313 }
0x13e0   : > { %v6911_v43 = vrot.slane %v2314_v50, 6 }
0x13e2   : > { %v6039_v47 = vpop.eup %6038  ;;  %v2317_v17 = vmul.f32 %v6911_v43, %v6852_v59 }
0x13e3   : > { %2276 = vrot.lane.b32.xlu1 %v6039_v47, %s7778_s21 }
0x13e4   : > { %v2319_v15 = vrot.slane %v2317_v17, 2 }
0x13e7   : > { %2308 = vperm.xlu1 %5970, %v6899_v16  }
0x1455   : > { %v2277_v53 = vpop.permute.xlu1 %2276 }
0x1456   : > { %v2279_v19 = vmul.f32 %v2277_v53, %v2274_v52 }
0x1458   : > { %v2281_v10 = vadd.f32 %v2280_v36, %v2279_v19 }
0x145a   : > { %v2283_v62 = vmul.f32 %v2281_v10, %v6846_v35 }
0x145c   : > { %v6909_v44 = vadd.f32 %v2283_v62, %v2282_v37 }
0x145e   : > { %v2323_v46 = vmul.f32 %v6911_v43, %v6909_v44 }
0x1460   : > { %v2325_v8 = vrot.slane %v2323_v46, 2 }
0x1462   : > { %v6915_v61 = vpop.permute.xlu1 %2308 }
0x1463   : > { %v2322_v13 = vmul.f32 %v6915_v61, %v6909_v44  ;;  %v2311_v35 = vmul.f32 %v6915_v61, %v6852_v59 }
0x1465   : > { %v2327_v4 = vadd.f32 %v2325_v8, %v2322_v13  ;;  %v2321_v5 = vadd.f32 %v2319_v15, %v2311_v35 }
0x1467   : > { %2329 = vrot.lane.b32.xlu1 %v2327_v4, %s7780_s26  ;;  %v2332_v23 = vsel %vm723_vm1, %v6927_v14, %v2321_v5 }
0x146b   : > { %2508 = vrot.lane.b32.xlu1 %v6852_v59, %s7778_s21 }
0x14d9   : > { %v6929_v3 = vpop.permute.xlu1 %2329 }
0x14da   : > { %v2333_v40 = vsel %vm725_vm2, %v2332_v23, %v6929_v3  ;;  %v6989_v23 = vld [vmem:[%s6488_s0 + $0x8] sm:$0xff] }
0x14db   : > { %5668 = vmatmul.mubr.msk.f32.vlgmr.msra.gmra.mxu0 %vm727_vm3, %v2333_v40  ;;  %v6996_v40 = vld [vmem:[%s6488_s0] sm:$0xff] }
0x14dc   : > { %5686 = vmatpush3.msra.mxu0 %v6937_v34  ;;  %5689 = vmatprep.mubr.msk.f32.mxu0 %vm6197_vm0, %v6195_v1 }
0x14dd   : > { %v2509_v2 = vpop.permute.xlu1 %2508  ;;  %5687 = vmatprep.subr.mxu0 %v6195_v1 }
0x14de   : > { %5688 = vmatpush3.msra.mxu0 %v6944_v41 }
0x14df   : > { %5690 = vmatmul.mubr.msk.f32.vlgmr.msra.gmra.mxu0 %vm723_vm1, %v2509_v2  ;;  %5692 = vmatprep.subr.mxu0 %v6195_v1  ;;  %v7001_v2 = vld [vmem:[%s6468_s29] ss:$0 sm:$0xff] }
0x14e0   : > { %5693 = vmatpush3.msra.mxu0 %v6503_v25  ;;  %5704 = vmatprep.mubr.msk.f32.mxu0 %vm6197_vm0, %v6195_v1 }
0x14e1   : > { %5694 = vmatprep.subr.mxu0 %v6195_v1 }
0x14e2   : > { %5695 = vmatpush3.msra.mxu0 %v6508_v26  ;;  %v6964_v26 = vld [vmem:[%s6379_s15] ss:$0 sm:$0xff] }
0x14e3   : > { %5696 = vmatprep.subr.mxu0 %v6195_v1 }
0x14e4   : > { %5697 = vmatpush3.msra.mxu0 %v6515_v28 }
0x14e5   : > { %5698 = vmatprep.subr.mxu0 %v6195_v1 }
0x14e6   : > { %5699 = vmatpush3.msra.mxu0 %v6521_v29 }
0x14e7   : > { %5700 = vmatprep.subr.mxu0 %v6195_v1 }
0x14e8   : > { %5701 = vmatpush3.msra.mxu0 %v6528_v33 }
0x14e9   : > { %5702 = vmatprep.subr.mxu0 %v6195_v1 }
0x14ea   : > { %5703 = vmatpush3.msra.mxu0 %v6549_v39  ;;  %v2302_v39 = vrot.slane %v6899_v16, 6 }
0x14eb   : > { %5729 = vmatprep.subr.mxu0 %v6195_v1 }
0x159b   : > { %v2403_v25 = vpop.f32.mrf.mxu0 }
0x159c   : > { %v2404_v28 = vadd.f32 %v6964_v26, %v2403_v25 }
0x159d   : > { %v5669_v24 = vpop.f32.mrf.mxu0 }
0x159e   : > { %v2407_v29 = vadd.f32 %v6968_v55, %v2404_v28 }
0x159f   : > { %v2578_v49 = vpop.f32.mrf.mxu0 }
0x15a0   : > { %v5203_v45 = vmul.f32 -1.442695, %v2407_v29  ;;  %v2579_v33 = vadd.f32 %v6972_v63, %v2578_v49 }
0x15a1   : > { %v5691_v47 = vpop.f32.mrf.mxu0 }
0x15a2   : > { %6040 = vpow2.f32 %v5203_v45  ;;  %2590 = vrot.lane.b32.xlu1 %v2579_v33, %s7779_s23 }
0x15a6   : > { %2303 = vrot.lane.b32.xlu1 %v2302_v39, %s7781_s1 }
0x15af   : > { %v6041_v52 = vpop.eup %6040 }
0x15b0   : > { %v2411_v53 = vadd.f32 1.0, %v6041_v52 }
0x15b2   : > { %6042 = vrcp.f32 %v2411_v53 }
0x15bf   : > { %v6043_v36 = vpop.eup %6042 }
0x15c0   : > { %v2414_v19 = vmul.f32 %v6043_v36, %v6386_v27  ;;  %v2421_v8 = vsub.f32 1.0, %v6043_v36  ;;  %v2427_v17 = vmul.f32 0.0, %v6043_v36 }
0x15c2   : > { %2416 = vrot.lane.b32.xlu0 %v2414_v19, %s7777_s16 }
0x1614   : > { %v2591_v10 = vpop.permute.xlu1 %2590 }
0x1618   : > { %v2304_v37 = vpop.permute.xlu1 %2303 }
0x1619   : > { %v2306_v50 = vsel %vm710_vm4, %v6899_v16, %v2304_v37 }
0x161a   : > { %2617 = vperm.xlu1 %5970, %v2306_v50   ;;  %v2608_v53 = vsub.f32 1.0, %v2306_v50 }
0x1634   : > { %v2417_v62 = vpop.permute.xlu0 %2416 }
0x1635   : > { %v2419_v46 = vadd.f32 %v2417_v62, %v2404_v28 }
0x1637   : > { %6044 = vtanh.f32 %v2419_v46 }
0x1644   : > { %v6045_v13 = vpop.eup %6044 }
0x1645   : > { %2423 = vrot.lane.b32.xlu0 %v6045_v13, %s7778_s21 }
0x1695   : > { %v7029_v46 = vpop.permute.xlu1 %2617 }
0x16b7   : > { %v2424_v4 = vpop.permute.xlu0 %2423 }
0x16b8   : > { %v2426_v35 = vmul.f32 %v2424_v4, %v2421_v8 }
0x16ba   : > { %v2428_v15 = vadd.f32 %v2427_v17, %v2426_v35 }
0x16bc   : > { %v2429_v5 = vsel %vm723_vm1, %v6927_v14, %v2428_v15  ;;  %v2629_v36 = vrot.slane %v2428_v15, 6 }
0x16bd   : > { %v2430_v16 = vsel %vm725_vm2, %v2429_v5, %v6929_v3 }
0x16be   : > { %5683 = vmatmul.mubr.msk.f32.vlgmr.msra.gmra.mxu1 %vm727_vm3, %v2430_v16  ;;  %v2631_v19 = vsel %vm710_vm4, %v2428_v15, %v2629_v36 }
0x16bf   : > { %5708 = vmatpush3.msra.mxu1 %v6989_v23  ;;  %5711 = vmatprep.mubr.msk.f32.mxu1 %vm6197_vm0, %v6195_v1 }
0x16c0   : > { %5709 = vmatprep.subr.mxu1 %v6195_v1 }
0x16c1   : > { %5710 = vmatpush3.msra.mxu1 %v6996_v40 }
0x16c2   : > { %5714 = vmatprep.subr.mxu1 %v6195_v1 }
0x177e   : > { %v2500_v14 = vpop.f32.mrf.mxu1 }
0x177f   : > { %v2501_v3 = vadd.f32 %v7001_v2, %v2500_v14 }
0x1780   : > { %v5684_v25 = vpop.f32.mrf.mxu1 }
0x1781   : > { %v2505_v28 = vrot.slane %v2501_v3, 6 }
0x1783   : > { %v2507_v24 = vsel %vm710_vm4, %v2501_v3, %v2505_v28 }
0x1784   : > { %v2582_v29 = vadd.f32 %v2579_v33, %v2507_v24 }
0x1786   : > { %v5206_v49 = vmul.f32 -1.442695, %v2582_v29 }
0x1788   : > { %6046 = vpow2.f32 %v5206_v49 }
0x1795   : > { %v6047_v45 = vpop.eup %6046 }
0x1796   : > { %v2586_v47 = vadd.f32 1.0, %v6047_v45 }
0x1798   : > { %6048 = vrcp.f32 %v2586_v47 }
0x17a5   : > { %v6049_v39 = vpop.eup %6048 }
0x17a6   : > { %v2593_v52 = vmul.f32 %v6049_v39, %v2591_v10  ;;  %v2600_v13 = vsub.f32 1.0, %v6049_v39  ;;  %v2606_v4 = vmul.f32 %v6049_v39, %v6852_v59 }
0x17a8   : > { %2595 = vrot.lane.b32.xlu0 %v2593_v52, %s7777_s16 }
0x17ac   : > { %2611 = vperm.xlu0 %5977, %v2608_v53   ;;  %v7065_v53 = vld [vmem:[%s6593_s19] ss:$0 sm:$0xff] }
0x17b0   : > { %2716 = vrot.lane.b32.xlu0 %v6909_v44, %s7778_s21 }
0x17b1   : > { %5978 = vset.pattern.permute.xlu0 %v7767_v6 }
0x17b4   : > { %2637 = vrot.lane.b32.xlu0 %v2631_v19, %s7780_s26 }
0x181a   : > { %v2596_v33 = vpop.permute.xlu0 %2595 }
0x181b   : > { %v2598_v37 = vadd.f32 %v2596_v33, %v2507_v24  ;;  %v7042_v24 = vld [vmem:[%s6564_s28] ss:$0 sm:$0xff] }
0x181d   : > { %6050 = vtanh.f32 %v2598_v37 }
0x1827   : > { %v7011_v62 = vpop.permute.xlu0 %2611 }
0x1828   : > { %v2614_v15 = vmul.f32 %v7011_v62, %v6852_v59 }
0x182a   : > { %v6051_v10 = vpop.eup %6050 }
0x182b   : > { %2602 = vrot.lane.b32.xlu1 %v6051_v10, %s7778_s21  ;;  %v2717_v50 = vpop.permute.xlu0 %2716 }
0x182c   : > { %5712 = vmatmul.mubr.msk.f32.vlgmr.msra.gmra.mxu1 %vm723_vm1, %v2717_v50 }
0x182d   : > { %5715 = vmatpush3.msra.mxu1 %v6815_v30  ;;  %5726 = vmatprep.mubr.msk.f32.mxu1 %vm6197_vm0, %v6195_v1 }
0x182e   : > { %5716 = vmatprep.subr.mxu1 %v6195_v1 }
0x182f   : > { %5717 = vmatpush3.msra.mxu1 %v6822_v31  ;;  %v2638_v45 = vpop.permute.xlu0 %2637 }
0x1830   : > { %5718 = vmatprep.subr.mxu1 %v6195_v1 }
0x1831   : > { %5719 = vmatpush3.msra.mxu1 %v6827_v42 }
0x1832   : > { %5720 = vmatprep.subr.mxu1 %v6195_v1 }
0x1833   : > { %5721 = vmatpush3.msra.mxu1 %v6832_v32 }
0x1834   : > { %5722 = vmatprep.subr.mxu1 %v6195_v1 }
0x1835   : > { %5723 = vmatpush3.msra.mxu1 %v6837_v48 }
0x1836   : > { %5724 = vmatprep.subr.mxu1 %v6195_v1 }
0x1837   : > { %5725 = vmatpush3.msra.mxu1 %v6842_v51 }
0x1838   : > { %5744 = vmatprep.subr.mxu1 %v6195_v1 }
0x189d   : > { %v2603_v8 = vpop.permute.xlu1 %2602 }
0x189e   : > { %v2605_v17 = vmul.f32 %v2603_v8, %v2600_v13 }
0x18a0   : > { %v2607_v35 = vadd.f32 %v2606_v4, %v2605_v17  ;;  %v7070_v17 = vld [vmem:[%s6297_s14 + $0x8] sm:$0x3] }
0x18a2   : > { %v2620_v5 = vmul.f32 %v7029_v46, %v2607_v35 }
0x18a4   : > { %v7035_v16 = vadd.f32 %v2620_v5, %v2614_v15 }
0x18a6   : > { %v2623_v14 = vrot.slane %v7035_v16, 2  ;;  %v2625_v3 = vrot.slane %v7035_v16, 6 }
0x18a8   : > { %v2627_v25 = vsel %vm710_vm4, %v2623_v14, %v2625_v3 }
0x18a9   : > { %2633 = vrot.lane.b32.xlu1 %v2627_v25, %s7778_s21 }
0x18ec   : > { %v2786_v28 = vpop.f32.mrf.mxu1 }
0x18ed   : > { %v2787_v29 = vadd.f32 %v7042_v24, %v2786_v28 }
0x18ee   : > { %v5713_v49 = vpop.f32.mrf.mxu1 }
0x18ef   : > { %2798 = vrot.lane.b32.xlu1 %v2787_v29, %s7779_s23  ;;  %v2816_v49 = vmul.f32 %v7011_v62, %v6909_v44 }
0x191b   : > { %v2634_v59 = vpop.permute.xlu1 %2633 }
0x191c   : > { %v2640_v47 = vsel %vm723_vm1, %v2634_v59, %v7035_v16 }
0x191d   : > { %v2641_v39 = vsel %vm725_vm2, %v2640_v47, %v2638_v45 }
0x191e   : > { %5705 = vmatmul.mubr.msk.f32.vlgmr.msra.gmra.mxu0 %vm727_vm3, %v2641_v39 }
0x191f   : > { %5730 = vmatpush3.msra.mxu0 %v6865_v56  ;;  %5741 = vmatprep.mubr.msk.f32.mxu0 %vm6197_vm0, %v6195_v1 }
0x1920   : > { %5731 = vmatprep.subr.mxu0 %v6195_v1 }
0x1921   : > { %5732 = vmatpush3.msra.mxu0 %v6872_v54 }
0x1922   : > { %5733 = vmatprep.subr.mxu0 %v6195_v1 }
0x1923   : > { %5734 = vmatpush3.msra.mxu0 %v6877_v7 }
0x1924   : > { %5735 = vmatprep.subr.mxu0 %v6195_v1 }
0x1925   : > { %5736 = vmatpush3.msra.mxu0 %v6882_v22 }
0x1926   : > { %5737 = vmatprep.subr.mxu0 %v6195_v1 }
0x1927   : > { %5738 = vmatpush3.msra.mxu0 %v6887_v9 }
0x1928   : > { %5739 = vmatprep.subr.mxu0 %v6195_v1 }
0x1929   : > { %5740 = vmatpush3.msra.mxu0 %v6892_v38 }
0x192a   : > { %5766 = vmatprep.subr.mxu0 %v6195_v1 }
0x1961   : > { %v2799_v8 = vpop.permute.xlu1 %2798 }
0x19de   : > { %v2711_v52 = vpop.f32.mrf.mxu0 }
0x19df   : > { %v2712_v36 = vadd.f32 %v7065_v53, %v2711_v52 }
0x19e0   : > { %v5706_v19 = vpop.f32.mrf.mxu0 }
0x19e1   : > { %v2790_v33 = vadd.f32 %v2787_v29, %v2712_v36 }
0x19e3   : > { %v5209_v37 = vmul.f32 -1.442695, %v2790_v33 }
0x19e5   : > { %6052 = vpow2.f32 %v5209_v37 }
0x19f2   : > { %v6053_v10 = vpop.eup %6052 }
0x19f3   : > { %v2794_v50 = vadd.f32 1.0, %v6053_v10 }
0x19f5   : > { %6054 = vrcp.f32 %v2794_v50 }
0x1a02   : > { %v6055_v13 = vpop.eup %6054 }
0x1a03   : > { %v2801_v4 = vmul.f32 %v6055_v13, %v2799_v8  ;;  %v2808_v14 = vsub.f32 1.0, %v6055_v13  ;;  %v2814_v25 = vmul.f32 %v6055_v13, %v6909_v44  ;;  %v7098_v13 = vld [vmem:[%s6363_s24 + $0x8] sm:$0x3] }
0x1a05   : > { %2803 = vrot.lane.b32.xlu0 %v2801_v4, %s7777_s16 }
0x1a09   : > { %2847 = vperm.xlu0 %5978, %v7070_v17  }
0x1a0d   : > { %5979 = vset.pattern.permute.xlu0 %v7765_v0 }
0x1a77   : > { %v2804_v35 = vpop.permute.xlu0 %2803 }
0x1a78   : > { %v2806_v15 = vadd.f32 %v2804_v35, %v2712_v36 }
0x1a7a   : > { %6056 = vtanh.f32 %v2806_v15 }
0x1a84   : > { %v2848_v59 = vpop.permute.xlu0 %2847 }
0x1a85   : > { %v7082_v39 = vrot.slane %v2848_v59, 6 }
0x1a87   : > { %v6057_v5 = vpop.eup %6056  ;;  %v2851_v62 = vmul.f32 %v7082_v39, %v7035_v16 }
0x1a88   : > { %2810 = vrot.lane.b32.xlu1 %v6057_v5, %s7778_s21  ;;  %v7115_v5 = vld [vmem:[%s6494_s3 + $0x28] sm:$0xff] }
0x1a89   : > { %v2853_v10 = vrot.slane %v2851_v62, 2 }
0x1a8c   : > { %2842 = vperm.xlu1 %5970, %v7070_v17  }
0x1afa   : > { %v2811_v3 = vpop.permute.xlu1 %2810 }
0x1afb   : > { %v2813_v28 = vmul.f32 %v2811_v3, %v2808_v14  ;;  %v7122_v14 = vld [vmem:[%s6494_s3 + $0x20] sm:$0xff]  ;;  %v7127_v3 = vld [vmem:[%s6494_s3 + $0x18] sm:$0xff] }
0x1afd   : > { %v2815_v29 = vadd.f32 %v2814_v25, %v2813_v28  ;;  %v7132_v25 = vld [vmem:[%s6494_s3 + $0x10] sm:$0xff]  ;;  %v7137_v28 = vld [vmem:[%s6494_s3 + $0x8] sm:$0xff] }
0x1aff   : > { %v2817_v45 = vmul.f32 %v2815_v29, %v7029_v46  ;;  %v7142_v29 = vld [vmem:[%s6494_s3] sm:$0xff] }
0x1b01   : > { %v7080_v47 = vadd.f32 %v2817_v45, %v2816_v49 }
0x1b03   : > { %v2857_v52 = vmul.f32 %v7082_v39, %v7080_v47 }
0x1b05   : > { %v2859_v33 = vrot.slane %v2857_v52, 2 }
0x1b07   : > { %v7086_v36 = vpop.permute.xlu1 %2842 }
0x1b08   : > { %v2856_v19 = vmul.f32 %v7086_v36, %v7080_v47  ;;  %v2845_v46 = vmul.f32 %v7086_v36, %v7035_v16 }
0x1b0a   : > { %v2861_v37 = vadd.f32 %v2859_v33, %v2856_v19  ;;  %v2855_v50 = vadd.f32 %v2853_v10, %v2845_v46  ;;  %v2836_v46 = vrot.slane %v7070_v17, 6 }
0x1b0c   : > { %2863 = vrot.lane.b32.xlu1 %v2861_v37, %s7780_s26  ;;  %v2866_v4 = vsel %vm723_vm1, %v7098_v13, %v2855_v50 }
0x1b10   : > { %3042 = vrot.lane.b32.xlu1 %v7035_v16, %s7778_s21 }
0x1b7e   : > { %v7100_v8 = vpop.permute.xlu1 %2863 }
0x1b7f   : > { %v2867_v35 = vsel %vm725_vm2, %v2866_v4, %v7100_v8 }
0x1b80   : > { %5727 = vmatmul.mubr.msk.f32.vlgmr.msra.gmra.mxu1 %vm727_vm3, %v2867_v35 }
0x1b81   : > { %5745 = vmatpush3.msra.mxu1 %v6937_v34  ;;  %5748 = vmatprep.mubr.msk.f32.mxu1 %vm6197_vm0, %v6195_v1 }
0x1b82   : > { %v3043_v15 = vpop.permute.xlu1 %3042  ;;  %5746 = vmatprep.subr.mxu1 %v6195_v1 }
0x1b83   : > { %5747 = vmatpush3.msra.mxu1 %v6944_v41 }
0x1b84   : > { %5749 = vmatmul.mubr.msk.f32.vlgmr.msra.gmra.mxu1 %vm723_vm1, %v3043_v15  ;;  %5751 = vmatprep.subr.mxu1 %v6195_v1 }
0x1b85   : > { %5752 = vmatpush3.msra.mxu1 %v7115_v5  ;;  %5763 = vmatprep.mubr.msk.f32.mxu1 %vm6197_vm0, %v6195_v1 }
0x1b86   : > { %5753 = vmatprep.subr.mxu1 %v6195_v1 }
0x1b87   : > { %5754 = vmatpush3.msra.mxu1 %v7122_v14 }
0x1b88   : > { %5755 = vmatprep.subr.mxu1 %v6195_v1 }
0x1b89   : > { %5756 = vmatpush3.msra.mxu1 %v7127_v3 }
0x1b8a   : > { %5757 = vmatprep.subr.mxu1 %v6195_v1 }
0x1b8b   : > { %5758 = vmatpush3.msra.mxu1 %v7132_v25 }
0x1b8c   : > { %5759 = vmatprep.subr.mxu1 %v6195_v1 }
0x1b8d   : > { %5760 = vmatpush3.msra.mxu1 %v7137_v28 }
0x1b8e   : > { %5761 = vmatprep.subr.mxu1 %v6195_v1 }
0x1b8f   : > { %5762 = vmatpush3.msra.mxu1 %v7142_v29 }
0x1b90   : > { %5788 = vmatprep.subr.mxu1 %v6195_v1 }
0x1c40   : > { %v2937_v49 = vpop.f32.mrf.mxu1 }
0x1c41   : > { %v2938_v59 = vadd.f32 %v6964_v26, %v2937_v49 }
0x1c42   : > { %v5728_v45 = vpop.f32.mrf.mxu1 }
0x1c43   : > { %v2941_v52 = vadd.f32 %v6968_v55, %v2938_v59 }
0x1c44   : > { %v3112_v19 = vpop.f32.mrf.mxu1 }
0x1c45   : > { %v5214_v33 = vmul.f32 -1.442695, %v2941_v52  ;;  %v3113_v37 = vadd.f32 %v6972_v63, %v3112_v19 }
0x1c46   : > { %v5750_v62 = vpop.f32.mrf.mxu1 }
0x1c47   : > { %6058 = vpow2.f32 %v5214_v33  ;;  %3124 = vrot.lane.b32.xlu1 %v3113_v37, %s7779_s23 }
0x1c4b   : > { %2837 = vrot.lane.b32.xlu1 %v2836_v46, %s7781_s1 }
0x1c54   : > { %v6059_v10 = vpop.eup %6058 }
0x1c55   : > { %v2945_v50 = vadd.f32 1.0, %v6059_v10 }
0x1c57   : > { %6060 = vrcp.f32 %v2945_v50 }
0x1c64   : > { %v6061_v4 = vpop.eup %6060 }
0x1c65   : > { %v2948_v35 = vmul.f32 %v6061_v4, %v6386_v27  ;;  %v2955_v62 = vsub.f32 1.0, %v6061_v4  ;;  %v2961_v10 = vmul.f32 0.0, %v6061_v4 }
0x1c67   : > { %2950 = vrot.lane.b32.xlu0 %v2948_v35, %s7777_s16 }
0x1cb9   : > { %v3125_v15 = vpop.permute.xlu1 %3124 }
0x1cbd   : > { %v2838_v49 = vpop.permute.xlu1 %2837 }
0x1cbe   : > { %v2840_v45 = vsel %vm710_vm4, %v7070_v17, %v2838_v49 }
0x1cbf   : > { %3151 = vperm.xlu1 %5970, %v2840_v45  }
0x1cd9   : > { %v2951_v52 = vpop.permute.xlu0 %2950 }
0x1cda   : > { %v2953_v19 = vadd.f32 %v2951_v52, %v2938_v59 }
0x1cdc   : > { %6062 = vtanh.f32 %v2953_v19 }
0x1ce9   : > { %v6063_v33 = vpop.eup %6062 }
0x1cea   : > { %2957 = vrot.lane.b32.xlu0 %v6063_v33, %s7778_s21 }
0x1d5c   : > { %v2958_v46 = vpop.permute.xlu0 %2957 }
0x1d5d   : > { %v2960_v50 = vmul.f32 %v2958_v46, %v2955_v62  ;;  %v3142_v46 = vsub.f32 1.0, %v2840_v45 }
0x1d5f   : > { %v2962_v0 = vadd.f32 %v2961_v10, %v2960_v50  ;;  %v7782_v50 = vmov 1  }
0x1d61   : > { %v2963_v35 = vsel %vm723_vm1, %v7098_v13, %v2962_v0  ;;  %v3163_v10 = vrot.slane %v2962_v0, 6 }
0x1d62   : > { %v2964_v6 = vsel %vm725_vm2, %v2963_v35, %v7100_v8 }
0x1d63   : > { %5742 = vmatmul.mubr.msk.f32.vlgmr.msra.gmra.mxu0 %vm727_vm3, %v2964_v6  ;;  %v3165_v35 = vsel %vm710_vm4, %v2962_v0, %v3163_v10  ;;  %v7194_v0 = vpop.permute.xlu1 %3151 }
0x1d64   : > { %5767 = vmatpush3.msra.mxu0 %v6989_v23  ;;  %5770 = vmatprep.mubr.msk.f32.mxu0 %vm6197_vm0, %v6195_v1 }
0x1d65   : > { %5768 = vmatprep.subr.mxu0 %v6195_v1 }
0x1d66   : > { %5769 = vmatpush3.msra.mxu0 %v6996_v40 }
0x1d67   : > { %5773 = vmatprep.subr.mxu0 %v6195_v1 }
0x1e23   : > { %v3034_v17 = vpop.f32.mrf.mxu0 }
0x1e24   : > { %v3035_v59 = vadd.f32 %v7001_v2, %v3034_v17 }
0x1e25   : > { %v5743_v13 = vpop.f32.mrf.mxu0 }
0x1e26   : > { %v3039_v4 = vrot.slane %v3035_v59, 6 }
0x1e28   : > { %v3041_v8 = vsel %vm710_vm4, %v3035_v59, %v3039_v4 }
0x1e29   : > { %v3116_v49 = vadd.f32 %v3113_v37, %v3041_v8 }
0x1e2b   : > { %v5217_v6 = vmul.f32 -1.442695, %v3116_v49 }
0x1e2d   : > { %6064 = vpow2.f32 %v5217_v6 }
0x1e3a   : > { %v6065_v52 = vpop.eup %6064 }
0x1e3b   : > { %v3120_v19 = vadd.f32 1.0, %v6065_v52 }
0x1e3d   : > { %6066 = vrcp.f32 %v3120_v19 }
0x1e4a   : > { %v6067_v33 = vpop.eup %6066 }
0x1e4b   : > { %v3127_v62 = vmul.f32 %v6067_v33, %v3125_v15 }
0x1e4d   : > { %3129 = vrot.lane.b32.xlu0 %v3127_v62, %s7777_s16 }
0x1e51   : > { %3145 = vperm.xlu0 %5979, %v3142_v46  }
0x1e55   : > { %3250 = vrot.lane.b32.xlu0 %v7080_v47, %s7778_s21 }
0x1e56   : > { %5980 = vset.pattern.permute.xlu0 %v7782_v50 }
0x1e59   : > { %3171 = vrot.lane.b32.xlu0 %v3165_v35, %s7780_s26 }
0x1ebf   : > { %v3130_v37 = vpop.permute.xlu0 %3129 }
0x1ec0   : > { %v3132_v17 = vadd.f32 %v3130_v37, %v3041_v8 }
0x1ec2   : > { %6068 = vtanh.f32 %v3132_v17 }
0x1ecc   : > { %v7176_v59 = vpop.permute.xlu0 %3145 }
0x1ecf   : > { %v6069_v15 = vpop.eup %6068 }
0x1ed0   : > { %3136 = vrot.lane.b32.xlu1 %v6069_v15, %s7778_s21  ;;  %v3251_v45 = vpop.permute.xlu0 %3250 }
0x1ed1   : > { %5771 = vmatmul.mubr.msk.f32.vlgmr.msra.gmra.mxu0 %vm723_vm1, %v3251_v45 }
0x1ed2   : > { %5774 = vmatpush3.msra.mxu0 %v6815_v30  ;;  %5785 = vmatprep.mubr.msk.f32.mxu0 %vm6197_vm0, %v6195_v1  ;;  %v3134_v30 = vsub.f32 1.0, %v6067_v33 }
0x1ed3   : > { %5775 = vmatprep.subr.mxu0 %v6195_v1 }
0x1ed4   : > { %5776 = vmatpush3.msra.mxu0 %v6822_v31 }
0x1ed5   : > { %5777 = vmatprep.subr.mxu0 %v6195_v1 }
0x1ed6   : > { %5778 = vmatpush3.msra.mxu0 %v6827_v42  ;;  %v3140_v42 = vmul.f32 %v6067_v33, %v7035_v16 }
0x1ed7   : > { %5779 = vmatprep.subr.mxu0 %v6195_v1 }
0x1ed8   : > { %5780 = vmatpush3.msra.mxu0 %v6832_v32  ;;  %v3148_v32 = vmul.f32 %v7176_v59, %v7035_v16  ;;  %v3172_v16 = vpop.permute.xlu0 %3171 }
0x1ed9   : > { %5781 = vmatprep.subr.mxu0 %v6195_v1 }
0x1eda   : > { %5782 = vmatpush3.msra.mxu0 %v6837_v48 }
0x1edb   : > { %5783 = vmatprep.subr.mxu0 %v6195_v1 }
0x1edc   : > { %5784 = vmatpush3.msra.mxu0 %v6842_v51 }
0x1edd   : > { %5803 = vmatprep.subr.mxu0 %v6195_v1 }
0x1f42   : > { %v3137_v31 = vpop.permute.xlu1 %3136 }
0x1f43   : > { %v3139_v13 = vmul.f32 %v3137_v31, %v3134_v30  ;;  %v7229_v30 = vld [vmem:[%s6297_s14 + $0xa] sm:$0x3] }
0x1f45   : > { %v3141_v4 = vadd.f32 %v3140_v42, %v3139_v13 }
0x1f47   : > { %v3154_v8 = vmul.f32 %v7194_v0, %v3141_v4 }
0x1f49   : > { %v7200_v48 = vadd.f32 %v3154_v8, %v3148_v32 }
0x1f4b   : > { %v3157_v49 = vrot.slane %v7200_v48, 2  ;;  %v3159_v51 = vrot.slane %v7200_v48, 6 }
0x1f4d   : > { %v3161_v6 = vsel %vm710_vm4, %v3157_v49, %v3159_v51 }
0x1f4e   : > { %3167 = vrot.lane.b32.xlu1 %v3161_v6, %s7778_s21  ;;  %v3350_v6 = vmul.f32 %v7176_v59, %v7080_v47 }
0x1f91   : > { %v3320_v52 = vpop.f32.mrf.mxu0 }
0x1f92   : > { %v3321_v19 = vadd.f32 %v7042_v24, %v3320_v52 }
0x1f93   : > { %v5772_v33 = vpop.f32.mrf.mxu0 }
0x1f94   : > { %3332 = vrot.lane.b32.xlu1 %v3321_v19, %s7779_s23 }
0x1fc0   : > { %v3168_v62 = vpop.permute.xlu1 %3167 }
0x1fc1   : > { %v3174_v46 = vsel %vm723_vm1, %v3168_v62, %v7200_v48 }
0x1fc2   : > { %v3175_v10 = vsel %vm725_vm2, %v3174_v46, %v3172_v16 }
0x1fc3   : > { %5764 = vmatmul.mubr.msk.f32.vlgmr.msra.gmra.mxu1 %vm727_vm3, %v3175_v10 }
0x1fc4   : > { %5789 = vmatpush3.msra.mxu1 %v6865_v56  ;;  %5800 = vmatprep.mubr.msk.f32.mxu1 %vm6197_vm0, %v6195_v1 }
0x1fc5   : > { %5790 = vmatprep.subr.mxu1 %v6195_v1 }
0x1fc6   : > { %5791 = vmatpush3.msra.mxu1 %v6872_v54 }
0x1fc7   : > { %5792 = vmatprep.subr.mxu1 %v6195_v1 }
0x1fc8   : > { %5793 = vmatpush3.msra.mxu1 %v6877_v7 }
0x1fc9   : > { %5794 = vmatprep.subr.mxu1 %v6195_v1 }
0x1fca   : > { %5795 = vmatpush3.msra.mxu1 %v6882_v22 }
0x1fcb   : > { %5796 = vmatprep.subr.mxu1 %v6195_v1 }
0x1fcc   : > { %5797 = vmatpush3.msra.mxu1 %v6887_v9 }
0x1fcd   : > { %5798 = vmatprep.subr.mxu1 %v6195_v1 }
0x1fce   : > { %5799 = vmatpush3.msra.mxu1 %v6892_v38  ;;  %v7783_v38 = vmov 0  }
0x1fcf   : > { %5825 = vmatprep.subr.mxu1 %v6195_v1 }
0x2006   : > { %v3333_v45 = vpop.permute.xlu1 %3332 }
0x2083   : > { %v3245_v56 = vpop.f32.mrf.mxu1 }
0x2084   : > { %v3246_v54 = vadd.f32 %v7065_v53, %v3245_v56 }
0x2085   : > { %v5765_v35 = vpop.f32.mrf.mxu1 }
0x2086   : > { %v3324_v7 = vadd.f32 %v3321_v19, %v3246_v54 }
0x2088   : > { %v5220_v37 = vmul.f32 -1.442695, %v3324_v7 }
0x208a   : > { %6070 = vpow2.f32 %v5220_v37  ;;  %v5222_v37 = vld [vmem:[%s6363_s24 + $0xa] sm:$0x3] }
0x2097   : > { %v6071_v17 = vpop.eup %6070 }
0x2098   : > { %v3328_v22 = vadd.f32 1.0, %v6071_v17 }
0x209a   : > { %6072 = vrcp.f32 %v3328_v22 }
0x20a7   : > { %v6073_v15 = vpop.eup %6072 }
0x20a8   : > { %v3335_v9 = vmul.f32 %v6073_v15, %v3333_v45  ;;  %v3342_v4 = vsub.f32 1.0, %v6073_v15  ;;  %v3348_v8 = vmul.f32 %v6073_v15, %v7080_v47 }
0x20aa   : > { %3337 = vrot.lane.b32.xlu0 %v3335_v9, %s7777_s16 }
0x20ae   : > { %3381 = vperm.xlu0 %5980, %v7229_v30  }
0x20b2   : > { %5981 = vset.pattern.permute.xlu0 %v7783_v38 }
0x211c   : > { %v3338_v31 = vpop.permute.xlu0 %3337 }
0x211d   : > { %v3340_v42 = vadd.f32 %v3338_v31, %v3246_v54 }
0x211f   : > { %6074 = vtanh.f32 %v3340_v42 }
0x2129   : > { %v3382_v52 = vpop.permute.xlu0 %3381 }
0x212a   : > { %v7241_v62 = vrot.slane %v3382_v52, 6 }
0x212c   : > { %v6075_v13 = vpop.eup %6074  ;;  %v3385_v59 = vmul.f32 %v7241_v62, %v7200_v48 }
0x212d   : > { %3344 = vrot.lane.b32.xlu1 %v6075_v13, %s7778_s21 }
0x212e   : > { %v3387_v35 = vrot.slane %v3385_v59, 2 }
0x2131   : > { %3376 = vperm.xlu1 %5970, %v7229_v30  }
0x219f   : > { %v3345_v32 = vpop.permute.xlu1 %3344 }
0x21a0   : > { %v3347_v49 = vmul.f32 %v3345_v32, %v3342_v4 }
0x21a2   : > { %v3349_v51 = vadd.f32 %v3348_v8, %v3347_v49  ;;  %v3370_v8 = vrot.slane %v7229_v30, 6 }
0x21a4   : > { %v3351_v19 = vmul.f32 %v3349_v51, %v7194_v0 }
0x21a6   : > { %v7239_v33 = vadd.f32 %v3351_v19, %v3350_v6 }
0x21a8   : > { %v3391_v16 = vmul.f32 %v7241_v62, %v7239_v33 }
0x21aa   : > { %v3393_v56 = vrot.slane %v3391_v16, 2 }
0x21ac   : > { %v7245_v46 = vpop.permute.xlu1 %3376 }
0x21ad   : > { %v3390_v10 = vmul.f32 %v7245_v46, %v7239_v33  ;;  %v3379_v0 = vmul.f32 %v7245_v46, %v7200_v48 }
0x21af   : > { %v3395_v54 = vadd.f32 %v3393_v56, %v3390_v10  ;;  %v3389_v7 = vadd.f32 %v3387_v35, %v3379_v0 }
0x21b1   : > { %3397 = vrot.lane.b32.xlu1 %v3395_v54, %s7780_s26  ;;  %v3400_v22 = vsel %vm723_vm1, %v5222_v37, %v3389_v7 }
0x21b5   : > { %3576 = vrot.lane.b32.xlu1 %v7200_v48, %s7778_s21 }
0x2223   : > { %v3398_v17 = vpop.permute.xlu1 %3397 }
0x2224   : > { %v3401_v15 = vsel %vm725_vm2, %v3400_v22, %v3398_v17 }
0x2225   : > { %5786 = vmatmul.mubr.msk.f32.vlgmr.msra.gmra.mxu0 %vm727_vm3, %v3401_v15 }
0x2226   : > { %5804 = vmatpush3.msra.mxu0 %v6937_v34  ;;  %5807 = vmatprep.mubr.msk.f32.mxu0 %vm6197_vm0, %v6195_v1 }
0x2227   : > { %v3577_v45 = vpop.permute.xlu1 %3576  ;;  %5805 = vmatprep.subr.mxu0 %v6195_v1 }
0x2228   : > { %5806 = vmatpush3.msra.mxu0 %v6944_v41 }
0x2229   : > { %5808 = vmatmul.mubr.msk.f32.vlgmr.msra.gmra.mxu0 %vm723_vm1, %v3577_v45  ;;  %5810 = vmatprep.subr.mxu0 %v6195_v1 }
0x222a   : > { %5811 = vmatpush3.msra.mxu0 %v7115_v5  ;;  %5822 = vmatprep.mubr.msk.f32.mxu0 %vm6197_vm0, %v6195_v1 }
0x222b   : > { %5812 = vmatprep.subr.mxu0 %v6195_v1 }
0x222c   : > { %5813 = vmatpush3.msra.mxu0 %v7122_v14 }
0x222d   : > { %5814 = vmatprep.subr.mxu0 %v6195_v1 }
0x222e   : > { %5815 = vmatpush3.msra.mxu0 %v7127_v3 }
0x222f   : > { %5816 = vmatprep.subr.mxu0 %v6195_v1 }
0x2230   : > { %5817 = vmatpush3.msra.mxu0 %v7132_v25 }
0x2231   : > { %5818 = vmatprep.subr.mxu0 %v6195_v1 }
0x2232   : > { %5819 = vmatpush3.msra.mxu0 %v7137_v28 }
0x2233   : > { %5820 = vmatprep.subr.mxu0 %v6195_v1 }
0x2234   : > { %5821 = vmatpush3.msra.mxu0 %v7142_v29 }
0x2235   : > { %5847 = vmatprep.subr.mxu0 %v6195_v1 }
0x22e5   : > { %v3471_v34 = vpop.f32.mrf.mxu0 }
0x22e6   : > { %v3472_v41 = vadd.f32 %v6964_v26, %v3471_v34 }
0x22e7   : > { %v5787_v9 = vpop.f32.mrf.mxu0 }
0x22e8   : > { %v3475_v31 = vadd.f32 %v6968_v55, %v3472_v41 }
0x22e9   : > { %v3646_v42 = vpop.f32.mrf.mxu0 }
0x22ea   : > { %v5225_v13 = vmul.f32 -1.442695, %v3475_v31  ;;  %v3647_v4 = vadd.f32 %v6972_v63, %v3646_v42 }
0x22eb   : > { %v5809_v32 = vpop.f32.mrf.mxu0 }
0x22ec   : > { %6076 = vpow2.f32 %v5225_v13  ;;  %3658 = vrot.lane.b32.xlu1 %v3647_v4, %s7779_s23 }
0x22f0   : > { %3371 = vrot.lane.b32.xlu1 %v3370_v8, %s7781_s1 }
0x22f9   : > { %v6077_v49 = vpop.eup %6076 }
0x22fa   : > { %v3479_v51 = vadd.f32 1.0, %v6077_v49 }
0x22fc   : > { %6078 = vrcp.f32 %v3479_v51 }
0x2309   : > { %v6079_v6 = vpop.eup %6078 }
0x230a   : > { %v3482_v26 = vmul.f32 %v6079_v6, %v6386_v27  ;;  %v3489_v56 = vsub.f32 1.0, %v6079_v6  ;;  %v3495_v59 = vmul.f32 0.0, %v6079_v6  ;;  %v7314_v6 = vld [vmem:[%s6306_s17 + $0x28] sm:$0xff] }
0x230c   : > { %3484 = vrot.lane.b32.xlu0 %v3482_v26, %s7777_s16  ;;  %v7321_v26 = vld [vmem:[%s6306_s17 + $0x20] sm:$0xff] }
0x235e   : > { %v3659_v55 = vpop.permute.xlu1 %3658 }
0x2362   : > { %v3372_v52 = vpop.permute.xlu1 %3371 }
0x2363   : > { %v3374_v63 = vsel %vm710_vm4, %v7229_v30, %v3372_v52  ;;  %v7331_v52 = vld [vmem:[%s6306_s17 + $0x10] sm:$0xff] }
0x2364   : > { %3685 = vperm.xlu1 %5970, %v3374_v63   ;;  %v3676_v13 = vsub.f32 1.0, %v3374_v63  ;;  %v7336_v63 = vld [vmem:[%s6306_s17 + $0x8] sm:$0xff] }
0x237e   : > { %v3485_v19 = vpop.permute.xlu0 %3484 }
0x237f   : > { %v3487_v16 = vadd.f32 %v3485_v19, %v3472_v41  ;;  %v7341_v19 = vld [vmem:[%s6306_s17] sm:$0xff] }
0x2381   : > { %6080 = vtanh.f32 %v3487_v16 }
0x238e   : > { %v6081_v10 = vpop.eup %6080 }
0x238f   : > { %3491 = vrot.lane.b32.xlu0 %v6081_v10, %s7778_s21 }
0x23df   : > { %v7345_v16 = vpop.permute.xlu1 %3685 }
0x2401   : > { %v3492_v54 = vpop.permute.xlu0 %3491 }
0x2402   : > { %v3494_v0 = vmul.f32 %v3492_v54, %v3489_v56 }
0x2404   : > { %v3496_v35 = vadd.f32 %v3495_v59, %v3494_v0 }
0x2406   : > { %v3497_v7 = vsel %vm723_vm1, %v5222_v37, %v3496_v35 }
0x2407   : > { %v3498_v22 = vsel %vm725_vm2, %v3497_v7, %v3398_v17 }
0x2408   : > { %5801 = vmatmul.mubr.msk.f32.vlgmr.msra.gmra.mxu1 %vm727_vm3, %v3498_v22 }
0x2409   : > { %5826 = vmatpush3.msra.mxu1 %v6989_v23  ;;  %5829 = vmatprep.mubr.msk.f32.mxu1 %vm6197_vm0, %v6195_v1 }
0x240a   : > { %5827 = vmatprep.subr.mxu1 %v6195_v1 }
0x240b   : > { %5828 = vmatpush3.msra.mxu1 %v6996_v40  ;;  %v3697_v40 = vrot.slane %v3496_v35, 6 }
0x240c   : > { %5832 = vmatprep.subr.mxu1 %v6195_v1 }
0x24c8   : > { %v3568_v30 = vpop.f32.mrf.mxu1 }
0x24c9   : > { %v3569_v15 = vadd.f32 %v7001_v2, %v3568_v30  ;;  %v3699_v2 = vsel %vm710_vm4, %v3496_v35, %v3697_v40  ;;  %v7386_v40 = vld [vmem:[%s6394_s22 + $0x8] sm:$0xff] }
0x24ca   : > { %v5802_v45 = vpop.f32.mrf.mxu1 }
0x24cb   : > { %v3573_v37 = vrot.slane %v3569_v15, 6 }
0x24cd   : > { %v3575_v17 = vsel %vm710_vm4, %v3569_v15, %v3573_v37 }
0x24ce   : > { %v3650_v34 = vadd.f32 %v3647_v4, %v3575_v17 }
0x24d0   : > { %v5228_v41 = vmul.f32 -1.442695, %v3650_v34 }
0x24d2   : > { %6082 = vpow2.f32 %v5228_v41 }
0x24df   : > { %v6083_v23 = vpop.eup %6082 }
0x24e0   : > { %v3654_v9 = vadd.f32 1.0, %v6083_v23 }
0x24e2   : > { %6084 = vrcp.f32 %v3654_v9 }
0x24ef   : > { %v6085_v31 = vpop.eup %6084 }
0x24f0   : > { %v3661_v42 = vmul.f32 %v6085_v31, %v3659_v55  ;;  %v7326_v55 = vld [vmem:[%s6306_s17 + $0x18] sm:$0xff]  ;;  %v3668_v10 = vsub.f32 1.0, %v6085_v31  ;;  %v3674_v54 = vmul.f32 %v6085_v31, %v7200_v48  ;;  %v7364_v31 = vld [vmem:[%s6394_s22 + $0x28] sm:$0xff] }
0x24f2   : > { %3663 = vrot.lane.b32.xlu0 %v3661_v42, %s7777_s16  ;;  %v7376_v42 = vld [vmem:[%s6394_s22 + $0x18] sm:$0xff] }
0x24f6   : > { %3679 = vperm.xlu0 %5981, %v3676_v13   ;;  %v7381_v13 = vld [vmem:[%s6394_s22 + $0x10] sm:$0xff] }
0x24fa   : > { %3784 = vrot.lane.b32.xlu0 %v7239_v33, %s7778_s21 }
0x24fb   : > { %5982 = vset.pattern.permute.xlu0 %v7782_v50 }
0x24fe   : > { %3705 = vrot.lane.b32.xlu0 %v3699_v2, %s7780_s26  ;;  %v7391_v2 = vld [vmem:[%s6394_s22] sm:$0xff] }
0x2564   : > { %v3664_v4 = vpop.permute.xlu0 %3663 }
0x2565   : > { %v3666_v32 = vadd.f32 %v3664_v4, %v3575_v17 }
0x2567   : > { %6086 = vtanh.f32 %v3666_v32 }
0x2571   : > { %v7309_v8 = vpop.permute.xlu0 %3679 }
0x2572   : > { %v3682_v35 = vmul.f32 %v7309_v8, %v7200_v48 }
0x2574   : > { %v6087_v49 = vpop.eup %6086 }
0x2575   : > { %3670 = vrot.lane.b32.xlu1 %v6087_v49, %s7778_s21  ;;  %v3785_v51 = vpop.permute.xlu0 %3784 }
0x2576   : > { %5830 = vmatmul.mubr.msk.f32.vlgmr.msra.gmra.mxu1 %vm723_vm1, %v3785_v51 }
0x2577   : > { %5833 = vmatpush3.msra.mxu1 %v7314_v6  ;;  %5844 = vmatprep.mubr.msk.f32.mxu1 %vm6197_vm0, %v6195_v1 }
0x2578   : > { %5834 = vmatprep.subr.mxu1 %v6195_v1 }
0x2579   : > { %5835 = vmatpush3.msra.mxu1 %v7321_v26  ;;  %v3706_v41 = vpop.permute.xlu0 %3705 }
0x257a   : > { %5836 = vmatprep.subr.mxu1 %v6195_v1 }
0x257b   : > { %5837 = vmatpush3.msra.mxu1 %v7326_v55 }
0x257c   : > { %5838 = vmatprep.subr.mxu1 %v6195_v1 }
0x257d   : > { %5839 = vmatpush3.msra.mxu1 %v7331_v52 }
0x257e   : > { %5840 = vmatprep.subr.mxu1 %v6195_v1 }
0x257f   : > { %5841 = vmatpush3.msra.mxu1 %v7336_v63 }
0x2580   : > { %5842 = vmatprep.subr.mxu1 %v6195_v1 }
0x2581   : > { %5843 = vmatpush3.msra.mxu1 %v7341_v19 }
0x2582   : > { %5862 = vmatprep.subr.mxu1 %v6195_v1 }
0x25e7   : > { %v3671_v56 = vpop.permute.xlu1 %3670 }
0x25e8   : > { %v3673_v59 = vmul.f32 %v3671_v56, %v3668_v10 }
0x25ea   : > { %v3675_v0 = vadd.f32 %v3674_v54, %v3673_v59 }
0x25ec   : > { %v3688_v7 = vmul.f32 %v7345_v16, %v3675_v0 }
0x25ee   : > { %v7351_v22 = vadd.f32 %v3688_v7, %v3682_v35  ;;  %v7398_v7 = vld [vmem:[%s6297_s14 + $0xc] sm:$0x3] }
0x25f0   : > { %v3691_v30 = vrot.slane %v7351_v22, 2  ;;  %v3693_v15 = vrot.slane %v7351_v22, 6 }
0x25f2   : > { %v3695_v45 = vsel %vm710_vm4, %v3691_v30, %v3693_v15 }
0x25f3   : > { %3701 = vrot.lane.b32.xlu1 %v3695_v45, %s7778_s21 }
0x2636   : > { %v3854_v37 = vpop.f32.mrf.mxu1 }
0x2637   : > { %v3855_v17 = vadd.f32 %v7042_v24, %v3854_v37  ;;  %v7371_v24 = vld [vmem:[%s6394_s22 + $0x20] sm:$0xff] }
0x2638   : > { %v5831_v34 = vpop.f32.mrf.mxu1 }
0x2639   : > { %3866 = vrot.lane.b32.xlu1 %v3855_v17, %s7779_s23 }
0x2665   : > { %v3702_v48 = vpop.permute.xlu1 %3701 }
0x2666   : > { %v3708_v23 = vsel %vm723_vm1, %v3702_v48, %v7351_v22 }
0x2667   : > { %v3709_v9 = vsel %vm725_vm2, %v3708_v23, %v3706_v41  ;;  %v3884_v41 = vmul.f32 %v7309_v8, %v7239_v33 }
0x2668   : > { %5823 = vmatmul.mubr.msk.f32.vlgmr.msra.gmra.mxu0 %vm727_vm3, %v3709_v9 }
0x2669   : > { %5848 = vmatpush3.msra.mxu0 %v7364_v31  ;;  %5859 = vmatprep.mubr.msk.f32.mxu0 %vm6197_vm0, %v6195_v1 }
0x266a   : > { %5849 = vmatprep.subr.mxu0 %v6195_v1 }
0x266b   : > { %5850 = vmatpush3.msra.mxu0 %v7371_v24 }
0x266c   : > { %5851 = vmatprep.subr.mxu0 %v6195_v1 }
0x266d   : > { %5852 = vmatpush3.msra.mxu0 %v7376_v42 }
0x266e   : > { %5853 = vmatprep.subr.mxu0 %v6195_v1 }
0x266f   : > { %5854 = vmatpush3.msra.mxu0 %v7381_v13 }
0x2670   : > { %5855 = vmatprep.subr.mxu0 %v6195_v1 }
0x2671   : > { %5856 = vmatpush3.msra.mxu0 %v7386_v40 }
0x2672   : > { %5857 = vmatprep.subr.mxu0 %v6195_v1 }
0x2673   : > { %5858 = vmatpush3.msra.mxu0 %v7391_v2 }
0x2674   : > { %5884 = vmatprep.subr.mxu0 %v6195_v1 }
0x26ab   : > { %v3867_v0 = vpop.permute.xlu1 %3866 }
0x2728   : > { %v3779_v4 = vpop.f32.mrf.mxu0 }
0x2729   : > { %v3780_v32 = vadd.f32 %v7065_v53, %v3779_v4 }
0x272a   : > { %v5824_v49 = vpop.f32.mrf.mxu0 }
0x272b   : > { %v3858_v51 = vadd.f32 %v3855_v17, %v3780_v32 }
0x272d   : > { %v5231_v10 = vmul.f32 -1.442695, %v3858_v51 }
0x272f   : > { %6088 = vpow2.f32 %v5231_v10 }
0x273c   : > { %v6089_v56 = vpop.eup %6088 }
0x273d   : > { %v3862_v54 = vadd.f32 1.0, %v6089_v56 }
0x273f   : > { %6090 = vrcp.f32 %v3862_v54 }
0x274c   : > { %v6091_v59 = vpop.eup %6090 }
0x274d   : > { %v3869_v35 = vmul.f32 %v6091_v59, %v3867_v0  ;;  %v3876_v45 = vsub.f32 1.0, %v6091_v59  ;;  %v3882_v17 = vmul.f32 %v6091_v59, %v7239_v33 }
0x274f   : > { %3871 = vrot.lane.b32.xlu0 %v3869_v35, %s7777_s16  ;;  %v7426_v35 = vld [vmem:[%s6363_s24 + $0xc] sm:$0x3] }
0x2753   : > { %3915 = vperm.xlu0 %5982, %v7398_v7  }
0x2757   : > { %5983 = vset.pattern.permute.xlu0 %v7783_v38 }
0x27c1   : > { %v3872_v30 = vpop.permute.xlu0 %3871 }
0x27c2   : > { %v3874_v53 = vadd.f32 %v3872_v30, %v3780_v32 }
0x27c4   : > { %6092 = vtanh.f32 %v3874_v53 }
0x27ce   : > { %v3916_v23 = vpop.permute.xlu0 %3915 }
0x27cf   : > { %v7410_v32 = vrot.slane %v3916_v23, 6 }
0x27d1   : > { %v6093_v15 = vpop.eup %6092  ;;  %v3919_v8 = vmul.f32 %v7410_v32, %v7351_v22 }
0x27d2   : > { %3878 = vrot.lane.b32.xlu1 %v6093_v15, %s7778_s21 }
0x27d3   : > { %v3921_v59 = vrot.slane %v3919_v8, 2 }
0x27d6   : > { %3910 = vperm.xlu1 %5970, %v7398_v7  }
0x2844   : > { %v3879_v37 = vpop.permute.xlu1 %3878 }
0x2845   : > { %v3881_v34 = vmul.f32 %v3879_v37, %v3876_v45  ;;  %v7436_v45 = vld [vmem:[%s6431_s18 + $0x8] sm:$0xff] }
0x2847   : > { %v3883_v48 = vadd.f32 %v3882_v17, %v3881_v34  ;;  %v7443_v17 = vld [vmem:[%s6431_s18] sm:$0xff] }
0x2849   : > { %v3885_v9 = vmul.f32 %v3883_v48, %v7345_v16  ;;  %v7467_v48 = vld [vmem:[%s6339_s20] ss:$0 sm:$0xff] }
0x284b   : > { %v7408_v4 = vadd.f32 %v3885_v9, %v3884_v41  ;;  %v7471_v9 = vld [vmem:[%s6455_s30] ss:$0 sm:$0xff] }
0x284d   : > { %v3925_v49 = vmul.f32 %v7410_v32, %v7408_v4 }
0x284f   : > { %v3927_v56 = vrot.slane %v3925_v49, 2 }
0x2851   : > { %v7414_v51 = vpop.permute.xlu1 %3910 }
0x2852   : > { %v3924_v10 = vmul.f32 %v7414_v51, %v7408_v4  ;;  %v3913_v16 = vmul.f32 %v7414_v51, %v7351_v22 }
0x2854   : > { %v3929_v54 = vadd.f32 %v3927_v56, %v3924_v10  ;;  %v3923_v0 = vadd.f32 %v3921_v59, %v3913_v16 }
0x2856   : > { %3931 = vrot.lane.b32.xlu1 %v3929_v54, %s7780_s26  ;;  %v3934_v53 = vsel %vm723_vm1, %v7426_v35, %v3923_v0 }
0x285a   : > { %4110 = vrot.lane.b32.xlu1 %v7351_v22, %s7778_s21 }
0x28c8   : > { %v7428_v30 = vpop.permute.xlu1 %3931 }
0x28c9   : > { %v3935_v15 = vsel %vm725_vm2, %v3934_v53, %v7428_v30 }
0x28ca   : > { %5845 = vmatmul.mubr.msk.f32.vlgmr.msra.gmra.mxu1 %vm727_vm3, %v3935_v15 }
0x28cb   : > { %5863 = vmatpush3.msra.mxu1 %v7436_v45  ;;  %5866 = vmatprep.mubr.msk.f32.mxu1 %vm6197_vm0, %v6195_v1 }
0x28cc   : > { %v4111_v37 = vpop.permute.xlu1 %4110  ;;  %5864 = vmatprep.subr.mxu1 %v6195_v1 }
0x28cd   : > { %5865 = vmatpush3.msra.mxu1 %v7443_v17 }
0x28ce   : > { %5867 = vmatmul.mubr.msk.f32.vlgmr.msra.gmra.mxu1 %vm723_vm1, %v4111_v37  ;;  %5869 = vmatprep.subr.mxu1 %v6195_v1 }
0x28cf   : > { %5870 = vmatpush3.msra.mxu1 %v7115_v5  ;;  %5881 = vmatprep.mubr.msk.f32.mxu1 %vm6197_vm0, %v6195_v1 }
0x28d0   : > { %5871 = vmatprep.subr.mxu1 %v6195_v1 }
0x28d1   : > { %5872 = vmatpush3.msra.mxu1 %v7122_v14  ;;  %v7463_v14 = vld [vmem:[%s6379_s15] ss:$0 sm:$0xff] }
0x28d2   : > { %5873 = vmatprep.subr.mxu1 %v6195_v1 }
0x28d3   : > { %5874 = vmatpush3.msra.mxu1 %v7127_v3 }
0x28d4   : > { %5875 = vmatprep.subr.mxu1 %v6195_v1 }
0x28d5   : > { %5876 = vmatpush3.msra.mxu1 %v7132_v25 }
0x28d6   : > { %5877 = vmatprep.subr.mxu1 %v6195_v1 }
0x28d7   : > { %5878 = vmatpush3.msra.mxu1 %v7137_v28 }
0x28d8   : > { %5879 = vmatprep.subr.mxu1 %v6195_v1 }
0x28d9   : > { %5880 = vmatpush3.msra.mxu1 %v7142_v29  ;;  %v3904_v29 = vrot.slane %v7398_v7, 6 }
0x28da   : > { %5906 = vmatprep.subr.mxu1 %v6195_v1 }
0x298a   : > { %v4005_v5 = vpop.f32.mrf.mxu1 }
0x298b   : > { %v4006_v3 = vadd.f32 %v7463_v14, %v4005_v5 }
0x298c   : > { %v5846_v34 = vpop.f32.mrf.mxu1 }
0x298d   : > { %v4009_v25 = vadd.f32 %v7467_v48, %v4006_v3 }
0x298e   : > { %v4180_v41 = vpop.f32.mrf.mxu1 }
0x298f   : > { %v5236_v23 = vmul.f32 -1.442695, %v4009_v25  ;;  %v4181_v28 = vadd.f32 %v7471_v9, %v4180_v41 }
0x2990   : > { %v5868_v49 = vpop.f32.mrf.mxu1 }
0x2991   : > { %6094 = vpow2.f32 %v5236_v23  ;;  %4192 = vrot.lane.b32.xlu1 %v4181_v28, %s7779_s23 }
0x2995   : > { %3905 = vrot.lane.b32.xlu1 %v3904_v29, %s7781_s1  ;;  %v7495_v29 = vld [vmem:[%s6488_s0] sm:$0xff] }
0x299e   : > { %v6095_v10 = vpop.eup %6094 }
0x299f   : > { %v4013_v56 = vadd.f32 1.0, %v6095_v10  ;;  %v7500_v10 = vld [vmem:[%s6468_s29] ss:$0 sm:$0xff] }
0x29a1   : > { %6096 = vrcp.f32 %v4013_v56 }
0x29ae   : > { %v6097_v54 = vpop.eup %6096 }
0x29af   : > { %v4016_v8 = vmul.f32 %v6097_v54, %v6386_v27  ;;  %v4023_v5 = vsub.f32 1.0, %v6097_v54  ;;  %v4029_v25 = vmul.f32 0.0, %v6097_v54 }
0x29b1   : > { %4018 = vrot.lane.b32.xlu0 %v4016_v8, %s7777_s16 }
0x2a03   : > { %v4193_v16 = vpop.permute.xlu1 %4192 }
0x2a07   : > { %v3906_v59 = vpop.permute.xlu1 %3905 }
0x2a08   : > { %v3908_v0 = vsel %vm710_vm4, %v7398_v7, %v3906_v59 }
0x2a09   : > { %4219 = vperm.xlu1 %5970, %v3908_v0  }
0x2a23   : > { %v4019_v53 = vpop.permute.xlu0 %4018 }
0x2a24   : > { %v4021_v15 = vadd.f32 %v4019_v53, %v4006_v3  ;;  %v7488_v3 = vld [vmem:[%s6488_s0 + $0x8] sm:$0xff] }
0x2a26   : > { %6098 = vtanh.f32 %v4021_v15 }
0x2a33   : > { %v6099_v37 = vpop.eup %6098 }
0x2a34   : > { %4025 = vrot.lane.b32.xlu0 %v6099_v37, %s7778_s21 }
0x2aa6   : > { %v4026_v34 = vpop.permute.xlu0 %4025 }
0x2aa7   : > { %v4028_v41 = vmul.f32 %v4026_v34, %v4023_v5 }
0x2aa9   : > { %v4030_v23 = vadd.f32 %v4029_v25, %v4028_v41  ;;  %v4210_v25 = vsub.f32 1.0, %v3908_v0 }
0x2aab   : > { %v4031_v49 = vsel %vm723_vm1, %v7426_v35, %v4030_v23  ;;  %v4231_v41 = vrot.slane %v4030_v23, 6 }
0x2aac   : > { %v4032_v7 = vsel %vm725_vm2, %v4031_v49, %v7428_v30 }
0x2aad   : > { %5860 = vmatmul.mubr.msk.f32.vlgmr.msra.gmra.mxu0 %vm727_vm3, %v4032_v7  ;;  %v4233_v49 = vsel %vm710_vm4, %v4030_v23, %v4231_v41 }
0x2aae   : > { %5885 = vmatpush3.msra.mxu0 %v7488_v3  ;;  %5888 = vmatprep.mubr.msk.f32.mxu0 %vm6197_vm0, %v6195_v1 }
0x2aaf   : > { %5886 = vmatprep.subr.mxu0 %v6195_v1 }
0x2ab0   : > { %5887 = vmatpush3.msra.mxu0 %v7495_v29 }
0x2ab1   : > { %5891 = vmatprep.subr.mxu0 %v6195_v1 }
0x2b6d   : > { %v4102_v35 = vpop.f32.mrf.mxu0 }
0x2b6e   : > { %v4103_v30 = vadd.f32 %v7500_v10, %v4102_v35 }
0x2b6f   : > { %v5861_v56 = vpop.f32.mrf.mxu0 }
0x2b70   : > { %v4107_v54 = vrot.slane %v4103_v30, 6 }
0x2b72   : > { %v4109_v8 = vsel %vm710_vm4, %v4103_v30, %v4107_v54 }
0x2b73   : > { %v4184_v59 = vadd.f32 %v4181_v28, %v4109_v8 }
0x2b75   : > { %v5239_v53 = vmul.f32 -1.442695, %v4184_v59 }
0x2b77   : > { %6100 = vpow2.f32 %v5239_v53  ;;  %v7541_v53 = vld [vmem:[%s6564_s28] ss:$0 sm:$0xff] }
0x2b84   : > { %v6101_v15 = vpop.eup %6100 }
0x2b85   : > { %v4188_v37 = vadd.f32 1.0, %v6101_v15 }
0x2b87   : > { %6102 = vrcp.f32 %v4188_v37 }
0x2b94   : > { %v6103_v5 = vpop.eup %6102 }
0x2b95   : > { %v4195_v34 = vmul.f32 %v6103_v5, %v4193_v16 }
0x2b97   : > { %4197 = vrot.lane.b32.xlu0 %v4195_v34, %s7777_s16 }
0x2b9b   : > { %4213 = vperm.xlu0 %5983, %v4210_v25  }
0x2b9f   : > { %4318 = vrot.lane.b32.xlu0 %v7408_v4, %s7778_s21 }
0x2ba0   : > { %5984 = vset.pattern.permute.xlu0 %v7782_v50  ;;  %v7528_v50 = vpop.permute.xlu1 %4219 }
0x2ba3   : > { %4239 = vrot.lane.b32.xlu0 %v4233_v49, %s7780_s26 }
0x2c09   : > { %v4198_v28 = vpop.permute.xlu0 %4197 }
0x2c0a   : > { %v4200_v7 = vadd.f32 %v4198_v28, %v4109_v8 }
0x2c0c   : > { %6104 = vtanh.f32 %v4200_v7 }
0x2c16   : > { %v7510_v35 = vpop.permute.xlu0 %4213 }
0x2c19   : > { %v6105_v16 = vpop.eup %6104 }
0x2c1a   : > { %4204 = vrot.lane.b32.xlu1 %v6105_v16, %s7778_s21  ;;  %v4319_v0 = vpop.permute.xlu0 %4318 }
0x2c1b   : > { %5889 = vmatmul.mubr.msk.f32.vlgmr.msra.gmra.mxu0 %vm723_vm1, %v4319_v0 }
0x2c1c   : > { %5892 = vmatpush3.msra.mxu0 %v7314_v6  ;;  %5903 = vmatprep.mubr.msk.f32.mxu0 %vm6197_vm0, %v6195_v1  ;;  %v4202_v6 = vsub.f32 1.0, %v6103_v5 }
0x2c1d   : > { %5893 = vmatprep.subr.mxu0 %v6195_v1 }
0x2c1e   : > { %5894 = vmatpush3.msra.mxu0 %v7321_v26 }
0x2c1f   : > { %5895 = vmatprep.subr.mxu0 %v6195_v1 }
0x2c20   : > { %5896 = vmatpush3.msra.mxu0 %v7326_v55  ;;  %v4208_v55 = vmul.f32 %v6103_v5, %v7351_v22  ;;  %v4240_v5 = vpop.permute.xlu0 %4239 }
0x2c21   : > { %5897 = vmatprep.subr.mxu0 %v6195_v1 }
0x2c22   : > { %5898 = vmatpush3.msra.mxu0 %v7331_v52  ;;  %v4216_v52 = vmul.f32 %v7510_v35, %v7351_v22 }
0x2c23   : > { %5899 = vmatprep.subr.mxu0 %v6195_v1 }
0x2c24   : > { %5900 = vmatpush3.msra.mxu0 %v7336_v63 }
0x2c25   : > { %5901 = vmatprep.subr.mxu0 %v6195_v1 }
0x2c26   : > { %5902 = vmatpush3.msra.mxu0 %v7341_v19 }
0x2c27   : > { %5921 = vmatprep.subr.mxu0 %v6195_v1 }
0x2c8c   : > { %v4205_v26 = vpop.permute.xlu1 %4204 }
0x2c8d   : > { %v4207_v23 = vmul.f32 %v4205_v26, %v4202_v6 }
0x2c8f   : > { %v4209_v30 = vadd.f32 %v4208_v55, %v4207_v23 }
0x2c91   : > { %v4222_v63 = vmul.f32 %v7528_v50, %v4209_v30 }
0x2c93   : > { %v7534_v56 = vadd.f32 %v4222_v63, %v4216_v52 }
0x2c95   : > { %v4225_v19 = vrot.slane %v7534_v56, 2  ;;  %v4227_v54 = vrot.slane %v7534_v56, 6 }
0x2c97   : > { %v4229_v8 = vsel %vm710_vm4, %v4225_v19, %v4227_v54  ;;  %v4418_v54 = vmul.f32 %v7510_v35, %v7408_v4 }
0x2c98   : > { %4235 = vrot.lane.b32.xlu1 %v4229_v8, %s7778_s21 }
0x2cdb   : > { %v4388_v59 = vpop.f32.mrf.mxu0 }
0x2cdc   : > { %v4389_v15 = vadd.f32 %v7541_v53, %v4388_v59 }
0x2cdd   : > { %v5890_v37 = vpop.f32.mrf.mxu0 }
0x2cde   : > { %4400 = vrot.lane.b32.xlu1 %v4389_v15, %s7779_s23 }
0x2d0a   : > { %v4236_v22 = vpop.permute.xlu1 %4235 }
0x2d0b   : > { %v4242_v34 = vsel %vm723_vm1, %v4236_v22, %v7534_v56 }
0x2d0c   : > { %v4243_v25 = vsel %vm725_vm2, %v4242_v34, %v4240_v5 }
0x2d0d   : > { %5882 = vmatmul.mubr.msk.f32.vlgmr.msra.gmra.mxu1 %vm727_vm3, %v4243_v25 }
0x2d0e   : > { %5907 = vmatpush3.msra.mxu1 %v7364_v31  ;;  %5918 = vmatprep.mubr.msk.f32.mxu1 %vm6197_vm0, %v6195_v1 }
0x2d0f   : > { %5908 = vmatprep.subr.mxu1 %v6195_v1 }
0x2d10   : > { %5909 = vmatpush3.msra.mxu1 %v7371_v24  ;;  %v7564_v24 = vld [vmem:[%s6593_s19] ss:$0 sm:$0xff] }
0x2d11   : > { %5910 = vmatprep.subr.mxu1 %v6195_v1 }
0x2d12   : > { %5911 = vmatpush3.msra.mxu1 %v7376_v42 }
0x2d13   : > { %5912 = vmatprep.subr.mxu1 %v6195_v1 }
0x2d14   : > { %5913 = vmatpush3.msra.mxu1 %v7381_v13 }
0x2d15   : > { %5914 = vmatprep.subr.mxu1 %v6195_v1 }
0x2d16   : > { %5915 = vmatpush3.msra.mxu1 %v7386_v40 }
0x2d17   : > { %5916 = vmatprep.subr.mxu1 %v6195_v1 }
0x2d18   : > { %5917 = vmatpush3.msra.mxu1 %v7391_v2  ;;  %v7569_v2 = vld [vmem:[%s6297_s14 + $0xe] sm:$0x3]  ;;  %s7697_s14 = scalar_lea.vmem %s7754_s13, %s6288_s27 }
0x2d19   : > { %5943 = vmatprep.subr.mxu1 %v6195_v1 }
0x2d50   : > { %v4401_v16 = vpop.permute.xlu1 %4400 }
0x2dcd   : > { %v4313_v31 = vpop.f32.mrf.mxu1 }
0x2dce   : > { %v4314_v42 = vadd.f32 %v7564_v24, %v4313_v31 }
0x2dcf   : > { %v5883_v41 = vpop.f32.mrf.mxu1 }
0x2dd0   : > { %v4392_v49 = vadd.f32 %v4389_v15, %v4314_v42  ;;  %v7597_v41 = vld [vmem:[%s6363_s24 + $0xe] sm:$0x3] }
0x2dd2   : > { %v5242_v28 = vmul.f32 -1.442695, %v4392_v49 }
0x2dd4   : > { %6106 = vpow2.f32 %v5242_v28 }
0x2de1   : > { %v6107_v13 = vpop.eup %6106 }
0x2de2   : > { %v4396_v7 = vadd.f32 1.0, %v6107_v13 }
0x2de4   : > { %6108 = vrcp.f32 %v4396_v7 }
0x2df1   : > { %v6109_v40 = vpop.eup %6108 }
0x2df2   : > { %v4403_v0 = vmul.f32 %v6109_v40, %v4401_v16  ;;  %v4410_v23 = vsub.f32 1.0, %v6109_v40  ;;  %v4416_v52 = vmul.f32 %v6109_v40, %v7408_v4  ;;  %v6180_v40 = vld [vmem:[%s6494_s3 + $0x28] sm:$0xff]  ;;  %v6182_v16 = vld [vmem:[%s6494_s3 + $0x18] sm:$0xff] }
0x2df4   : > { %4405 = vrot.lane.b32.xlu0 %v4403_v0, %s7777_s16  ;;  %v6184_v0 = vld [vmem:[%s6494_s3 + $0x8] sm:$0xff] }
0x2df8   : > { %4449 = vperm.xlu0 %5984, %v7569_v2  }
0x2dfc   : > { %5985 = vset.pattern.permute.xlu0 %v7783_v38 }
0x2e66   : > { %v4406_v6 = vpop.permute.xlu0 %4405 }
0x2e67   : > { %v4408_v26 = vadd.f32 %v4406_v6, %v4314_v42  ;;  %v6185_v6 = vld [vmem:[%s6494_s3] sm:$0xff] }
0x2e69   : > { %6110 = vtanh.f32 %v4408_v26 }
0x2e73   : > { %v4450_v8 = vpop.permute.xlu0 %4449 }
0x2e74   : > { %v7581_v15 = vrot.slane %v4450_v8, 6  ;;  %v4438_v8 = vrot.slane %v7569_v2, 6 }
0x2e76   : > { %v6111_v55 = vpop.eup %6110  ;;  %v4453_v35 = vmul.f32 %v7581_v15, %v7534_v56 }
0x2e77   : > { %4412 = vrot.lane.b32.xlu1 %v6111_v55, %s7778_s21 }
0x2e78   : > { %v4455_v31 = vrot.slane %v4453_v35, 2 }
0x2e7b   : > { %4444 = vperm.xlu1 %5970, %v7569_v2  }
0x2ee9   : > { %v4413_v30 = vpop.permute.xlu1 %4412 }
0x2eea   : > { %v4415_v63 = vmul.f32 %v4413_v30, %v4410_v23 }
0x2eec   : > { %v4417_v19 = vadd.f32 %v4416_v52, %v4415_v63 }
0x2eee   : > { %v4419_v38 = vmul.f32 %v4417_v19, %v7528_v50 }
0x2ef0   : > { %v7579_v59 = vadd.f32 %v4419_v38, %v4418_v54 }
0x2ef2   : > { %v4459_v37 = vmul.f32 %v7581_v15, %v7579_v59 }
0x2ef4   : > { %v4461_v34 = vrot.slane %v4459_v37, 2 }
0x2ef6   : > { %v7585_v22 = vpop.permute.xlu1 %4444 }
0x2ef7   : > { %v4458_v5 = vmul.f32 %v7585_v22, %v7579_v59  ;;  %v4447_v50 = vmul.f32 %v7585_v22, %v7534_v56 }
0x2ef9   : > { %v4463_v25 = vadd.f32 %v4461_v34, %v4458_v5  ;;  %v4457_v42 = vadd.f32 %v4455_v31, %v4447_v50 }
0x2efb   : > { %4465 = vrot.lane.b32.xlu1 %v4463_v25, %s7780_s26  ;;  %v4468_v28 = vsel %vm723_vm1, %v7597_v41, %v4457_v42 }
0x2eff   : > { %4644 = vrot.lane.b32.xlu1 %v7534_v56, %s7778_s21 }
0x2f6d   : > { %v7599_v49 = vpop.permute.xlu1 %4465 }
0x2f6e   : > { %v4469_v13 = vsel %vm725_vm2, %v4468_v28, %v7599_v49 }
0x2f6f   : > { %5904 = vmatmul.mubr.msk.f32.vlgmr.msra.gmra.mxu0 %vm727_vm3, %v4469_v13 }
0x2f70   : > { %5922 = vmatpush3.msra.mxu0 %v7436_v45  ;;  %5925 = vmatprep.mubr.msk.f32.mxu0 %vm6197_vm0, %v6195_v1  ;;  %v6181_v45 = vld [vmem:[%s6494_s3 + $0x20] sm:$0xff] }
0x2f71   : > { %v4645_v7 = vpop.permute.xlu1 %4644  ;;  %5923 = vmatprep.subr.mxu0 %v6195_v1 }
0x2f72   : > { %5924 = vmatpush3.msra.mxu0 %v7443_v17  ;;  %v6183_v17 = vld [vmem:[%s6494_s3 + $0x10] sm:$0xff] }
0x2f73   : > { %5926 = vmatmul.mubr.msk.f32.vlgmr.msra.gmra.mxu0 %vm723_vm1, %v4645_v7  ;;  %5928 = vmatprep.subr.mxu0 %v6195_v1 }
0x2f74   : > { %5929 = vmatpush3.msra.mxu0 %v6180_v40  ;;  %5940 = vmatprep.mubr.msk.f32.mxu0 %vm6197_vm0, %v6195_v1 }
0x2f75   : > { %5930 = vmatprep.subr.mxu0 %v6195_v1 }
0x2f76   : > { %5931 = vmatpush3.msra.mxu0 %v6181_v45 }
0x2f77   : > { %5932 = vmatprep.subr.mxu0 %v6195_v1 }
0x2f78   : > { %5933 = vmatpush3.msra.mxu0 %v6182_v16 }
0x2f79   : > { %5934 = vmatprep.subr.mxu0 %v6195_v1 }
0x2f7a   : > { %5935 = vmatpush3.msra.mxu0 %v6183_v17 }
0x2f7b   : > { %5936 = vmatprep.subr.mxu0 %v6195_v1 }
0x2f7c   : > { %5937 = vmatpush3.msra.mxu0 %v6184_v0 }
0x2f7d   : > { %5938 = vmatprep.subr.mxu0 %v6195_v1 }
0x2f7e   : > { %5939 = vmatpush3.msra.mxu0 %v6185_v6 }
0x302f   : > { %v4539_v26 = vpop.f32.mrf.mxu0 }
0x3030   : > { %v4540_v55 = vadd.f32 %v7463_v14, %v4539_v26 }
0x3031   : > { %v5905_v23 = vpop.f32.mrf.mxu0 }
0x3032   : > { %v4543_v30 = vadd.f32 %v7467_v48, %v4540_v55 }
0x3033   : > { %v4714_v52 = vpop.f32.mrf.mxu0 }
0x3034   : > { %v5247_v63 = vmul.f32 -1.442695, %v4543_v30  ;;  %v4715_v19 = vadd.f32 %v7471_v9, %v4714_v52 }
0x3035   : > { %v5927_v54 = vpop.f32.mrf.mxu0 }
0x3036   : > { %6112 = vpow2.f32 %v5247_v63  ;;  %4726 = vrot.lane.b32.xlu1 %v4715_v19, %s7779_s23 }
0x303a   : > { %4439 = vrot.lane.b32.xlu1 %v4438_v8, %s7781_s1 }
0x3043   : > { %v6113_v38 = vpop.eup %6112 }
0x3044   : > { %v4547_v37 = vadd.f32 1.0, %v6113_v38 }
0x3046   : > { %6114 = vrcp.f32 %v4547_v37 }
0x3053   : > { %v6115_v5 = vpop.eup %6114 }
0x3054   : > { %v4550_v14 = vmul.f32 %v6115_v5, %v6386_v27  ;;  %v4557_v31 = vsub.f32 1.0, %v6115_v5  ;;  %v4563_v28 = vmul.f32 0.0, %v6115_v5 }
0x3056   : > { %4552 = vrot.lane.b32.xlu0 %v4550_v14, %s7777_s16 }
0x30a8   : > { %v4727_v48 = vpop.permute.xlu1 %4726 }
0x30ac   : > { %v4440_v34 = vpop.permute.xlu1 %4439 }
0x30ad   : > { %v4442_v9 = vsel %vm710_vm4, %v7569_v2, %v4440_v34 }
0x30ae   : > { %4753 = vperm.xlu1 %5970, %v4442_v9   ;;  %v4744_v23 = vsub.f32 1.0, %v4442_v9 }
0x30c8   : > { %v4553_v25 = vpop.permute.xlu0 %4552 }
0x30c9   : > { %v4555_v35 = vadd.f32 %v4553_v25, %v4540_v55 }
0x30cb   : > { %6116 = vtanh.f32 %v4555_v35 }
0x30d8   : > { %v6117_v50 = vpop.eup %6116 }
0x30d9   : > { %4559 = vrot.lane.b32.xlu0 %v6117_v50, %s7778_s21 }
0x3129   : > { %v7658_v54 = vpop.permute.xlu1 %4753 }
0x314b   : > { %v4560_v42 = vpop.permute.xlu0 %4559 }
0x314c   : > { %v4562_v13 = vmul.f32 %v4560_v42, %v4557_v31 }
0x314e   : > { %v4564_v7 = vadd.f32 %v4563_v28, %v4562_v13 }
0x3150   : > { %v4565_v27 = vsel %vm723_vm1, %v7597_v41, %v4564_v7 }
0x3151   : > { %v4566_v40 = vsel %vm725_vm2, %v4565_v27, %v7599_v49 }
0x3152   : > { %5919 = vmatmul.mubr.msk.f32.vlgmr.msra.gmra.mxu1 %vm727_vm3, %v4566_v40 }
0x3153   : > { %5944 = vmatpush3.msra.mxu1 %v7488_v3  ;;  %5947 = vmatprep.mubr.msk.f32.mxu1 %vm6197_vm0, %v6195_v1 }
0x3154   : > { %5945 = vmatprep.subr.mxu1 %v6195_v1  ;;  %v4765_v1 = vrot.slane %v4564_v7, 6 }
0x3155   : > { %5946 = vmatpush3.msra.mxu1 %v7495_v29 }
0x3156   : > { %v4767_v29 = vsel %vm710_vm4, %v4564_v7, %v4765_v1 }
0x3212   : > { %v4636_v2 = vpop.f32.mrf.mxu1 }
0x3213   : > { %v4637_v45 = vadd.f32 %v7500_v10, %v4636_v2 }
0x3214   : > { %v5920_v16 = vpop.f32.mrf.mxu1 }
0x3215   : > { %v4641_v17 = vrot.slane %v4637_v45, 6 }
0x3217   : > { %v4643_v41 = vsel %vm710_vm4, %v4637_v45, %v4641_v17 }
0x3218   : > { %v4718_v0 = vadd.f32 %v4715_v19, %v4643_v41 }
0x321a   : > { %v5250_v49 = vmul.f32 -1.442695, %v4718_v0  ;;  %v1216_v0 = vrot.slane %v6365_v12, 6  ;;  %v2285_v12 = vmul.f32 %v6909_v44, %v6746_v21 }
0x321c   : > { %6118 = vpow2.f32 %v5250_v49  ;;  %v1218_v49 = vmul.f32 %v1216_v0, %v6607_v57 }
0x3229   : > { %v6119_v6 = vpop.eup %6118 }
0x322a   : > { %v4722_v26 = vadd.f32 1.0, %v6119_v6 }
0x322c   : > { %6120 = vrcp.f32 %v4722_v26 }
0x3239   : > { %v6121_v3 = vpop.eup %6120 }
0x323a   : > { %v4729_v55 = vmul.f32 %v6121_v3, %v4727_v48  ;;  %v4736_v8 = vsub.f32 1.0, %v6121_v3  ;;  %v4742_v37 = vmul.f32 %v6121_v3, %v7534_v56 }
0x323c   : > { %4731 = vrot.lane.b32.xlu0 %v4729_v55, %s7777_s16  ;;  %v1220_v55 = vrot.slane %v1218_v49, 2 }
0x3240   : > { %4747 = vperm.xlu0 %5985, %v4744_v23   ;;  %v2286_v23 = vmul.f32 %v6909_v44, %v6742_v20  ;;  %v4422_v20 = vmul.f32 %v7579_v59, %v7410_v32  ;;  %v1752_v32 = vmul.f32 %v6740_v18, %v6609_v58  ;;  %v3888_v58 = vmul.f32 %v7408_v4, %v7241_v62 }
0x3244   : > { %4852 = vrot.lane.b32.xlu0 %v7579_v59, %s7778_s21 }
0x3248   : > { %4773 = vrot.lane.b32.xlu0 %v4767_v29, %s7780_s26  ;;  %v2288_v29 = vrot.slane %v2286_v23, 2 }
0x32ae   : > { %v4732_v10 = vpop.permute.xlu0 %4731 }
0x32af   : > { %v4734_v30 = vadd.f32 %v4732_v10, %v4643_v41  ;;  %v3354_v10 = vmul.f32 %v7239_v33, %v7082_v39  ;;  %v4421_v39 = vmul.f32 %v7579_v59, %v7414_v51 }
0x32b1   : > { %6122 = vtanh.f32 %v4734_v30  ;;  %v2290_v30 = vadd.f32 %v2288_v29, %v2285_v12 }
0x32bb   : > { %v7654_v52 = vpop.permute.xlu0 %4747 }
0x32bc   : > { %v4750_v48 = vmul.f32 %v7654_v52, %v7534_v56 }
0x32be   : > { %v6123_v63 = vpop.eup %6122 }
0x32bf   : > { %4738 = vrot.lane.b32.xlu1 %v6123_v63, %s7778_s21  ;;  %v4853_v19 = vpop.permute.xlu0 %4852  ;;  %v3356_v63 = vrot.slane %v3354_v10, 2 }
0x32c0   : > { %5948 = vmatmul.mubr.msk.f32.vlgmr.msra.gmra.mxu1 %vm723_vm1, %v4853_v19  ;;  %v4424_v19 = vrot.slane %v4422_v20, 2 }
0x32c3   : > { %v4774_v7 = vpop.permute.xlu0 %4773 }
0x3331   : > { %v4739_v38 = vpop.permute.xlu1 %4738 }
0x3332   : > { %v4741_v5 = vmul.f32 %v4739_v38, %v4736_v8  ;;  %v4426_v8 = vadd.f32 %v4424_v19, %v4421_v39  ;;  %v1754_v38 = vrot.slane %v1752_v32, 2 }
0x3334   : > { %v4743_v14 = vadd.f32 %v4742_v37, %v4741_v5  ;;  %v2820_v37 = vmul.f32 %v7080_v47, %v6911_v43  ;;  %v2819_v43 = vmul.f32 %v7080_v47, %v6915_v61  ;;  %v4952_v47 = vmul.f32 %v7654_v52, %v7579_v59 }
0x3336   : > { %v4756_v34 = vmul.f32 %v7658_v54, %v4743_v14 }
0x3338   : > { %v4757_v9 = vadd.f32 %v4756_v34, %v4750_v48  ;;  %v1751_v48 = vmul.f32 %v6740_v18, %v6613_v60 }
0x333a   : > { %v4759_v25 = vrot.slane %v4757_v9, 2  ;;  %v4761_v35 = vrot.slane %v4757_v9, 6  ;;  %v1756_v34 = vadd.f32 %v1754_v38, %v1751_v48 }
0x333c   : > { %v4763_v50 = vsel %vm710_vm4, %v4759_v25, %v4761_v35  ;;  %v3890_v35 = vrot.slane %v3888_v58, 2 }
0x333d   : > { %4769 = vrot.lane.b32.xlu1 %v4763_v50, %s7778_s21  ;;  %v3887_v50 = vmul.f32 %v7408_v4, %v7245_v46 }
0x333f   : > { %v3892_v60 = vadd.f32 %v3890_v35, %v3887_v50 }
0x3380   : > { %v4922_v31 = vpop.f32.mrf.mxu1 }
0x3381   : > { %v4923_v42 = vadd.f32 %v7541_v53, %v4922_v31 }
0x3382   : > { %v5949_v28 = vpop.f32.mrf.mxu1 }
0x3383   : > { %4934 = vrot.lane.b32.xlu1 %v4923_v42, %s7779_s23 }
0x33af   : > { %v4770_v13 = vpop.permute.xlu1 %4769 }
0x33b0   : > { %v4776_v27 = vsel %vm723_vm1, %v4770_v13, %v4757_v9  ;;  %v2822_v9 = vrot.slane %v2820_v37, 2 }
0x33b1   : > { %v4777_v56 = vsel %vm725_vm2, %v4776_v27, %v4774_v7 }
0x33b2   : > { %5941 = vmatmul.mubr.msk.f32.vlgmr.msra.gmra.mxu0 %vm727_vm3, %v4777_v56  ;;  %v2824_v25 = vadd.f32 %v2822_v9, %v2819_v43 }
0x33f5   : > { %v4935_v26 = vpop.permute.xlu1 %4934 }
0x3472   : > { %v4847_v40 = vpop.f32.mrf.mxu0 }
0x3473   : > { %v4848_v2 = vadd.f32 %v7564_v24, %v4847_v40  ;;  %v1215_v24 = vmul.f32 %v6607_v57, %v6357_v11  ;;  %v3353_v11 = vmul.f32 %v7239_v33, %v7086_v36 }
0x3474   : > { %v5942_v45 = vpop.f32.mrf.mxu0 }
0x3475   : > { %v4926_v16 = vadd.f32 %v4923_v42, %v4848_v2  ;;  %v1222_v1 = vadd.f32 %v1220_v55, %v1215_v24  ;;  %v3358_v57 = vadd.f32 %v3356_v63, %v3353_v11 }
0x3477   : > { %v5253_v17 = vmul.f32 -1.442695, %v4926_v16 }
0x3479   : > { %6124 = vpow2.f32 %v5253_v17 }
0x3486   : > { %v6125_v41 = vpop.eup %6124 }
0x3487   : > { %v4930_v53 = vadd.f32 1.0, %v6125_v41 }
0x3489   : > { %6126 = vrcp.f32 %v4930_v53 }
0x3496   : > { %v6127_v6 = vpop.eup %6126 }
0x3497   : > { %v4937_v3 = vmul.f32 %v6127_v6, %v4935_v26  ;;  %v4944_v18 = vsub.f32 1.0, %v6127_v6  ;;  %v4950_v31 = vmul.f32 %v6127_v6, %v7579_v59 }
0x3499   : > { %4939 = vrot.lane.b32.xlu0 %v4937_v3, %s7777_s16 }
0x349d   : > { %1224 = vrot.lane.b32.xlu0 %v1222_v1, %s7778_s21 }
0x34a1   : > { %2292 = vrot.lane.b32.xlu0 %v2290_v30, %s7778_s21 }
0x34a5   : > { %3360 = vrot.lane.b32.xlu0 %v3358_v57, %s7778_s21 }
0x34a9   : > { %4428 = vrot.lane.b32.xlu0 %v4426_v8, %s7778_s21 }
0x350b   : > { %v4940_v21 = vpop.permute.xlu0 %4939 }
0x350c   : > { %v4942_v44 = vadd.f32 %v4940_v21, %v4848_v2 }
0x350e   : > { %6128 = vtanh.f32 %v4942_v44 }
0x350f   : > { %v1225_v36 = vpop.permute.xlu0 %1224 }
0x3510   : > { %1228 = vst.msk [vmem:[%s7697_s14] sm:$0x3] %vm1227_vm5, %v1225_v36 }
0x3513   : > { %v2293_v33 = vpop.permute.xlu0 %2292 }
0x3514   : > { %5199 = vst.msk [vmem:[%s7697_s14 + $0x4] sm:$0x3] %vm1227_vm5, %v2293_v33 }
0x3517   : > { %v3361_v51 = vpop.permute.xlu0 %3360 }
0x3518   : > { %5221 = vst.msk [vmem:[%s7697_s14 + $0x8] sm:$0x3] %vm1227_vm5, %v3361_v51 }
0x351b   : > { %v6129_v5 = vpop.eup %6128  ;;  %v4429_v14 = vpop.permute.xlu0 %4428 }
0x351c   : > { %5243 = vst.msk [vmem:[%s7697_s14 + $0xc] sm:$0x3] %vm1227_vm5, %v4429_v14  ;;  %4946 = vrot.lane.b32.xlu1 %v6129_v5, %s7778_s21 }
0x3520   : > { %1758 = vrot.lane.b32.xlu1 %v1756_v34, %s7778_s21 }
0x3524   : > { %2826 = vrot.lane.b32.xlu1 %v2824_v25, %s7778_s21 }
0x3528   : > { %3894 = vrot.lane.b32.xlu1 %v3892_v60, %s7778_s21 }
0x358e   : > { %v4947_v62 = vpop.permute.xlu1 %4946 }
0x358f   : > { %v4949_v42 = vmul.f32 %v4947_v62, %v4944_v18 }
0x3591   : > { %v4951_v28 = vadd.f32 %v4950_v31, %v4949_v42 }
0x3592   : > { %v1759_v61 = vpop.permute.xlu1 %1758 }
0x3593   : > { %v4953_v13 = vmul.f32 %v4951_v28, %v7658_v54  ;;  %5188 = vst.msk [vmem:[%s7697_s14 + $0x2] sm:$0x3] %vm1227_vm5, %v1759_v61 }
0x3595   : > { %v4954_v46 = vadd.f32 %v4953_v13, %v4952_v47 }
0x3596   : > { %v2827_v4 = vpop.permute.xlu1 %2826 }
0x3597   : > { %v4956_v7 = vmul.f32 %v4954_v46, %v7581_v15  ;;  %5210 = vst.msk [vmem:[%s7697_s14 + $0x6] sm:$0x3] %vm1227_vm5, %v2827_v4  ;;  %v4955_v27 = vmul.f32 %v4954_v46, %v7585_v22 }
0x3599   : > { %v4958_v56 = vrot.slane %v4956_v7, 2 }
0x359a   : > { %v3895_v40 = vpop.permute.xlu1 %3894 }
0x359b   : > { %5232 = vst.msk [vmem:[%s7697_s14 + $0xa] sm:$0x3] %vm1227_vm5, %v3895_v40  ;;  %v4960_v2 = vadd.f32 %v4958_v56, %v4955_v27 }
0x359d   : > { %4962 = vrot.lane.b32.xlu1 %v4960_v2, %s7778_s21 }
0x360f   : > { %v4963_v59 = vpop.permute.xlu1 %4962 }
0x3610   : > { %5254 = vst.msk [vmem:[%s7697_s14 + $0xe] sm:$0x3] %vm1227_vm5, %v4963_v59 }
0x3611 PF: > { %s23_s25 = sadd.s32 1, %s6192_s25  }
0x3612   : > { %p20_p4 = scmp.ge.s32.totalorder %s23_s25, 4  }
0x3614   :  { %22 = sbr.rel (!%p20_p4) target bundleno = 5 (0x5), region = 159 }

</bundles_post_ra>
